<compile_context>
chip_gen: v7x
topology: tpu7x:2x2x1
jax: 0.10.0
libtpu: 0.0.40
codegen_flags: <defaults>
</compile_context>

<pallas_src>
import math

import jax
import jax.numpy as jnp
from jax.experimental import pallas as pl
from jax.experimental.pallas import tpu as pltpu

# ---------------------------------------------------------------------------
# Model dimensions (from TetrisModel.__init__)
# ---------------------------------------------------------------------------
B = 2                       # batch
C_IN, H, W = 10, 10, 40     # Conv2d(10, ...) ; fc1 in_features = 16*10*40
C1 = 16                     # conv1 out channels
C2 = 16                     # conv2 out channels
NUM_ACTIONS = 7             # TODO(synk): `Action` enum not provided in snippet; assuming 7 actions.
FC_IN = C2 * H * W          # 6400

# Fused-kernel layout constants
HP, WP = H + 2, W + 2       # zero-padded spatial (12, 42)
PIMG = HP * WP              # 504 padded positions per image
PIMG_PAD = 512              # per-image lane stride (gap lanes are zero)
P = B * PIMG_PAD            # 1024 flattened positions on the lane axis
MARGIN = 128                # >= max tap shift (43); keeps stores lane-aligned
L = P + 2 * MARGIN          # 1280 lanes for the padded activation buffers
LANE = 128                  # lane padding for the tiny logits row
NTAPS = 9


# ---------------------------------------------------------------------------
# Fused Pallas kernel
# ---------------------------------------------------------------------------
def tetris_fused_kernel(x_ref, w1_ref, b1_ref, w2_ref, b2_ref,
                        wfc_ref, bfc_ref, mask_ref, o_ref, h1s_ref):
    # ---- conv1: 9 shifted-window matmuls on the MXU, f32 accumulation ----
    acc1 = jnp.zeros((C1, P), jnp.float32)
    for t in range(NTAPS):
        dy, dx = t // 3, t % 3
        d = (dy - 1) * WP + (dx - 1)                       # uniform lane shift for this tap
        slab = x_ref[:, MARGIN + d:MARGIN + d + P]         # [C_IN, P] bf16
        acc1 = acc1 + jnp.dot(w1_ref[t], slab,
                              preferred_element_type=jnp.float32)
    # bias + relu in f32; mask zeroes the spatial-padding / gap lanes so they
    # act as conv2's zero padding.
    h1 = jnp.maximum(acc1 + b1_ref[...], 0.0) * mask_ref[...]      # [C1, P] f32

    # keep h1 resident in VMEM (bf16 for the next MXU pass); margins must be 0.
    h1s_ref[...] = jnp.zeros((C1, L), jnp.bfloat16)
    h1s_ref[:, MARGIN:MARGIN + P] = h1.astype(jnp.bfloat16)

    # ---- conv2 ----
    acc2 = jnp.zeros((C2, P), jnp.float32)
    for t in range(NTAPS):
        dy, dx = t // 3, t % 3
        d = (dy - 1) * WP + (dx - 1)
        slab = h1s_ref[:, MARGIN + d:MARGIN + d + P]       # [C1, P] bf16
        acc2 = acc2 + jnp.dot(w2_ref[t], slab,
                              preferred_element_type=jnp.float32)
    h2 = jnp.maximum(acc2 + b2_ref[...], 0.0)              # [C2, P] f32
    # (h2 at padding/gap lanes is ignored: the fc weights there are zero.)

    # ---- fc1 + softmax: VPU multiply-reduce from VMEM-resident h2 ----
    row = jax.lax.broadcasted_iota(jnp.int32, (B, LANE), 0)
    col = jax.lax.broadcasted_iota(jnp.int32, (B, LANE), 1)
    logits = jnp.where(col < NUM_ACTIONS, 0.0, -1e30).astype(jnp.float32)
    for a in range(NUM_ACTIONS):
        w_a = wfc_ref[a]                                   # [C2, PIMG_PAD] f32
        for b in range(B):
            h2b = h2[:, b * PIMG_PAD:(b + 1) * PIMG_PAD]   # [C2, PIMG_PAD] f32
            prod = h2b * w_a
            s = jnp.sum(jnp.sum(prod, axis=1, keepdims=True),
                        axis=0, keepdims=True)             # [1, 1]
            sel = jnp.logical_and(row == b, col == a).astype(jnp.float32)
            logits = logits + sel * s
    logits = logits + bfc_ref[...]                         # [1, LANE] broadcast

    m = jnp.max(logits, axis=1, keepdims=True)
    e = jnp.exp(logits - m)                                # padded lanes -> exp(-1e30)=0
    probs = e / jnp.sum(e, axis=1, keepdims=True)
    o_ref[...] = probs[:, :NUM_ACTIONS]


_fused_call = pl.pallas_call(
    tetris_fused_kernel,
    out_shape=jax.ShapeDtypeStruct((B, NUM_ACTIONS), jnp.float32),
    scratch_shapes=[pltpu.VMEM((C1, L), jnp.bfloat16)],    # VMEM-resident h1
)


# ---------------------------------------------------------------------------
# Parameter construction (PyTorch layouts, re-packed for the fused kernel)
# ---------------------------------------------------------------------------
def init_params(key):
    """Deterministic PyTorch-layout params (uniform(+-1/sqrt(fan_in)))."""
    ks = jax.random.split(key, 6)

    def u(k, shape, fan_in):
        bound = 1.0 / math.sqrt(fan_in)
        return jax.random.uniform(k, shape, jnp.float32, -bound, bound)

    w1_pt = u(ks[0], (C1, C_IN, 3, 3), C_IN * 9)           # Conv2d weight layout
    b1 = u(ks[1], (C1,), C_IN * 9)
    w2_pt = u(ks[2], (C2, C1, 3, 3), C1 * 9)
    b2 = u(ks[3], (C2,), C1 * 9)
    wfc_pt = u(ks[4], (NUM_ACTIONS, FC_IN), FC_IN)         # Linear weight layout
    bfc = u(ks[5], (NUM_ACTIONS,), FC_IN)

    # Conv weights -> per-tap [9, Cout, Cin], bf16 for the MXU.
    w1t = jnp.transpose(w1_pt, (2, 3, 0, 1)).reshape(NTAPS, C1, C_IN).astype(jnp.bfloat16)
    w2t = jnp.transpose(w2_pt, (2, 3, 0, 1)).reshape(NTAPS, C2, C1).astype(jnp.bfloat16)
    b1c = b1.reshape(C1, 1)
    b2c = b2.reshape(C2, 1)

    # fc weight: PyTorch flatten order is (c, h, w); scatter onto the padded
    # per-image lane layout used in-kernel (zeros at padding / gap lanes).
    wfc4 = wfc_pt.reshape(NUM_ACTIONS, C2, H, W)
    wfc_lane = jnp.zeros((NUM_ACTIONS, C2, HP, WP), jnp.float32)
    wfc_lane = wfc_lane.at[:, :, 1:H + 1, 1:W + 1].set(wfc4)
    wfc_lane = jnp.pad(wfc_lane.reshape(NUM_ACTIONS, C2, PIMG),
                       ((0, 0), (0, 0), (0, PIMG_PAD - PIMG)))       # [A, C2, 512]
    bfc_pad = jnp.zeros((1, LANE), jnp.float32).at[0, :NUM_ACTIONS].set(bfc)

    # Interior (non-padding) mask over the flattened lane axis.
    m = jnp.zeros((B, HP, WP), jnp.float32).at[:, 1:H + 1, 1:W + 1].set(1.0)
    mask = jnp.pad(m.reshape(B, PIMG),
                   ((0, 0), (0, PIMG_PAD - PIMG))).reshape(1, P)

    return (w1t, b1c, w2t, b2c, wfc_lane, bfc_pad, mask)


# ---------------------------------------------------------------------------
# Forward pass: tiny XLA re-layout of the input, then one fused kernel.
# ---------------------------------------------------------------------------
@jax.jit
def tetris_forward(x_nchw, params):
    w1t, b1c, w2t, b2c, wfc_lane, bfc_pad, mask = params
    xp = jnp.pad(x_nchw, ((0, 0), (0, 0), (1, 1), (1, 1)))           # [B,C,12,42]
    xf = jnp.transpose(xp, (1, 0, 2, 3)).reshape(C_IN, B, PIMG)      # channels on sublanes
    xf = jnp.pad(xf, ((0, 0), (0, 0), (0, PIMG_PAD - PIMG))).reshape(C_IN, P)
    xl = jnp.pad(xf.astype(jnp.bfloat16), ((0, 0), (MARGIN, MARGIN)))  # [C_IN, L]
    return _fused_call(xl, w1t, b1c, w2t, b2c, wfc_lane, bfc_pad, mask)


# ---------------------------------------------------------------------------
# Main
# ---------------------------------------------------------------------------
if __name__ == "__main__":
    key = jax.random.PRNGKey(0)
    k_x, k_p = jax.random.split(key)
    x = jax.random.normal(k_x, (B, C_IN, H, W), dtype=jnp.float32)   # NCHW input
    params = init_params(k_p)

    out = tetris_forward(x, params)
    out = jax.block_until_ready(out)

    assert out.shape == (B, NUM_ACTIONS)
    assert bool(jnp.all(jnp.isfinite(out)))
    # Rows of a softmax must sum to 1.
    assert bool(jnp.allclose(jnp.sum(out, axis=1), 1.0, atol=1e-5))
    print("KERNEL_OK")
</pallas_src>

<mosaic_0001>
module attributes {stable_mosaic.version = 11 : i64} {
  func.func @tetris_fused_kernel(%arg0: memref<10x1280xbf16, #tpu.memory_space<vmem>>, %arg1: memref<9x16x10xbf16, #tpu.memory_space<vmem>>, %arg2: memref<16x1xf32, #tpu.memory_space<vmem>>, %arg3: memref<9x16x16xbf16, #tpu.memory_space<vmem>>, %arg4: memref<16x1xf32, #tpu.memory_space<vmem>>, %arg5: memref<7x16x512xf32, #tpu.memory_space<vmem>>, %arg6: memref<1x128xf32, #tpu.memory_space<vmem>>, %arg7: memref<1x1024xf32, #tpu.memory_space<vmem>>, %arg8: memref<2x7xf32, #tpu.memory_space<vmem>>, %arg9: memref<16x1280xbf16, #tpu.memory_space<vmem>>) attributes {dimension_semantics = [], scalar_prefetch = 0 : i64, scratch_operands = 1 : i64, tpu.core_type = #tpu.core_type<tc>} {
    %cst = arith.constant 0.000000e+00 : f32
    %0 = vector.broadcast %cst : f32 to vector<16x1024xf32>
    %c0 = arith.constant 0 : index
    %c85 = arith.constant 85 : index
    %1 = vector.load %arg0[%c0, %c85] : memref<10x1280xbf16, #tpu.memory_space<vmem>>, vector<10x1024xbf16>
    %c0_0 = arith.constant 0 : index
    %c0_1 = arith.constant 0 : index
    %c0_2 = arith.constant 0 : index
    %2 = vector.load %arg1[%c0_0, %c0_1, %c0_2] : memref<9x16x10xbf16, #tpu.memory_space<vmem>>, vector<1x16x10xbf16>
    %3 = vector.shape_cast %2 : vector<1x16x10xbf16> to vector<16x10xbf16>
    %cst_3 = arith.constant dense<0.000000e+00> : vector<16x1024xf32>
    %4 = tpu.matmul %3, %1, %cst_3 {dimension_numbers = #tpu.dot_dimension_numbers<[1], [0], [0], [1], [0, 0, 1, 1], [], []>} : vector<16x10xbf16>, vector<10x1024xbf16>, vector<16x1024xf32> -> vector<16x1024xf32>
    %5 = arith.addf %0, %4 : vector<16x1024xf32>
    %c0_4 = arith.constant 0 : index
    %c86 = arith.constant 86 : index
    %6 = vector.load %arg0[%c0_4, %c86] : memref<10x1280xbf16, #tpu.memory_space<vmem>>, vector<10x1024xbf16>
    %c1 = arith.constant 1 : index
    %c0_5 = arith.constant 0 : index
    %c0_6 = arith.constant 0 : index
    %7 = vector.load %arg1[%c1, %c0_5, %c0_6] : memref<9x16x10xbf16, #tpu.memory_space<vmem>>, vector<1x16x10xbf16>
    %8 = vector.shape_cast %7 : vector<1x16x10xbf16> to vector<16x10xbf16>
    %cst_7 = arith.constant dense<0.000000e+00> : vector<16x1024xf32>
    %9 = tpu.matmul %8, %6, %cst_7 {dimension_numbers = #tpu.dot_dimension_numbers<[1], [0], [0], [1], [0, 0, 1, 1], [], []>} : vector<16x10xbf16>, vector<10x1024xbf16>, vector<16x1024xf32> -> vector<16x1024xf32>
    %10 = arith.addf %5, %9 : vector<16x1024xf32>
    %c0_8 = arith.constant 0 : index
    %c87 = arith.constant 87 : index
    %11 = vector.load %arg0[%c0_8, %c87] : memref<10x1280xbf16, #tpu.memory_space<vmem>>, vector<10x1024xbf16>
    %c2 = arith.constant 2 : index
    %c0_9 = arith.constant 0 : index
    %c0_10 = arith.constant 0 : index
    %12 = vector.load %arg1[%c2, %c0_9, %c0_10] : memref<9x16x10xbf16, #tpu.memory_space<vmem>>, vector<1x16x10xbf16>
    %13 = vector.shape_cast %12 : vector<1x16x10xbf16> to vector<16x10xbf16>
    %cst_11 = arith.constant dense<0.000000e+00> : vector<16x1024xf32>
    %14 = tpu.matmul %13, %11, %cst_11 {dimension_numbers = #tpu.dot_dimension_numbers<[1], [0], [0], [1], [0, 0, 1, 1], [], []>} : vector<16x10xbf16>, vector<10x1024xbf16>, vector<16x1024xf32> -> vector<16x1024xf32>
    %15 = arith.addf %10, %14 : vector<16x1024xf32>
    %c0_12 = arith.constant 0 : index
    %c127 = arith.constant 127 : index
    %16 = vector.load %arg0[%c0_12, %c127] : memref<10x1280xbf16, #tpu.memory_space<vmem>>, vector<10x1024xbf16>
    %c3 = arith.constant 3 : index
    %c0_13 = arith.constant 0 : index
    %c0_14 = arith.constant 0 : index
    %17 = vector.load %arg1[%c3, %c0_13, %c0_14] : memref<9x16x10xbf16, #tpu.memory_space<vmem>>, vector<1x16x10xbf16>
    %18 = vector.shape_cast %17 : vector<1x16x10xbf16> to vector<16x10xbf16>
    %cst_15 = arith.constant dense<0.000000e+00> : vector<16x1024xf32>
    %19 = tpu.matmul %18, %16, %cst_15 {dimension_numbers = #tpu.dot_dimension_numbers<[1], [0], [0], [1], [0, 0, 1, 1], [], []>} : vector<16x10xbf16>, vector<10x1024xbf16>, vector<16x1024xf32> -> vector<16x1024xf32>
    %20 = arith.addf %15, %19 : vector<16x1024xf32>
    %c0_16 = arith.constant 0 : index
    %c128 = arith.constant 128 : index
    %21 = vector.load %arg0[%c0_16, %c128] : memref<10x1280xbf16, #tpu.memory_space<vmem>>, vector<10x1024xbf16>
    %c4 = arith.constant 4 : index
    %c0_17 = arith.constant 0 : index
    %c0_18 = arith.constant 0 : index
    %22 = vector.load %arg1[%c4, %c0_17, %c0_18] : memref<9x16x10xbf16, #tpu.memory_space<vmem>>, vector<1x16x10xbf16>
    %23 = vector.shape_cast %22 : vector<1x16x10xbf16> to vector<16x10xbf16>
    %cst_19 = arith.constant dense<0.000000e+00> : vector<16x1024xf32>
    %24 = tpu.matmul %23, %21, %cst_19 {dimension_numbers = #tpu.dot_dimension_numbers<[1], [0], [0], [1], [0, 0, 1, 1], [], []>} : vector<16x10xbf16>, vector<10x1024xbf16>, vector<16x1024xf32> -> vector<16x1024xf32>
    %25 = arith.addf %20, %24 : vector<16x1024xf32>
    %c0_20 = arith.constant 0 : index
    %c129 = arith.constant 129 : index
    %26 = vector.load %arg0[%c0_20, %c129] : memref<10x1280xbf16, #tpu.memory_space<vmem>>, vector<10x1024xbf16>
    %c5 = arith.constant 5 : index
    %c0_21 = arith.constant 0 : index
    %c0_22 = arith.constant 0 : index
    %27 = vector.load %arg1[%c5, %c0_21, %c0_22] : memref<9x16x10xbf16, #tpu.memory_space<vmem>>, vector<1x16x10xbf16>
    %28 = vector.shape_cast %27 : vector<1x16x10xbf16> to vector<16x10xbf16>
    %cst_23 = arith.constant dense<0.000000e+00> : vector<16x1024xf32>
    %29 = tpu.matmul %28, %26, %cst_23 {dimension_numbers = #tpu.dot_dimension_numbers<[1], [0], [0], [1], [0, 0, 1, 1], [], []>} : vector<16x10xbf16>, vector<10x1024xbf16>, vector<16x1024xf32> -> vector<16x1024xf32>
    %30 = arith.addf %25, %29 : vector<16x1024xf32>
    %c0_24 = arith.constant 0 : index
    %c169 = arith.constant 169 : index
    %31 = vector.load %arg0[%c0_24, %c169] : memref<10x1280xbf16, #tpu.memory_space<vmem>>, vector<10x1024xbf16>
    %c6 = arith.constant 6 : index
    %c0_25 = arith.constant 0 : index
    %c0_26 = arith.constant 0 : index
    %32 = vector.load %arg1[%c6, %c0_25, %c0_26] : memref<9x16x10xbf16, #tpu.memory_space<vmem>>, vector<1x16x10xbf16>
    %33 = vector.shape_cast %32 : vector<1x16x10xbf16> to vector<16x10xbf16>
    %cst_27 = arith.constant dense<0.000000e+00> : vector<16x1024xf32>
    %34 = tpu.matmul %33, %31, %cst_27 {dimension_numbers = #tpu.dot_dimension_numbers<[1], [0], [0], [1], [0, 0, 1, 1], [], []>} : vector<16x10xbf16>, vector<10x1024xbf16>, vector<16x1024xf32> -> vector<16x1024xf32>
    %35 = arith.addf %30, %34 : vector<16x1024xf32>
    %c0_28 = arith.constant 0 : index
    %c170 = arith.constant 170 : index
    %36 = vector.load %arg0[%c0_28, %c170] : memref<10x1280xbf16, #tpu.memory_space<vmem>>, vector<10x1024xbf16>
    %c7 = arith.constant 7 : index
    %c0_29 = arith.constant 0 : index
    %c0_30 = arith.constant 0 : index
    %37 = vector.load %arg1[%c7, %c0_29, %c0_30] : memref<9x16x10xbf16, #tpu.memory_space<vmem>>, vector<1x16x10xbf16>
    %38 = vector.shape_cast %37 : vector<1x16x10xbf16> to vector<16x10xbf16>
    %cst_31 = arith.constant dense<0.000000e+00> : vector<16x1024xf32>
    %39 = tpu.matmul %38, %36, %cst_31 {dimension_numbers = #tpu.dot_dimension_numbers<[1], [0], [0], [1], [0, 0, 1, 1], [], []>} : vector<16x10xbf16>, vector<10x1024xbf16>, vector<16x1024xf32> -> vector<16x1024xf32>
    %40 = arith.addf %35, %39 : vector<16x1024xf32>
    %c0_32 = arith.constant 0 : index
    %c171 = arith.constant 171 : index
    %41 = vector.load %arg0[%c0_32, %c171] : memref<10x1280xbf16, #tpu.memory_space<vmem>>, vector<10x1024xbf16>
    %c8 = arith.constant 8 : index
    %c0_33 = arith.constant 0 : index
    %c0_34 = arith.constant 0 : index
    %42 = vector.load %arg1[%c8, %c0_33, %c0_34] : memref<9x16x10xbf16, #tpu.memory_space<vmem>>, vector<1x16x10xbf16>
    %43 = vector.shape_cast %42 : vector<1x16x10xbf16> to vector<16x10xbf16>
    %cst_35 = arith.constant dense<0.000000e+00> : vector<16x1024xf32>
    %44 = tpu.matmul %43, %41, %cst_35 {dimension_numbers = #tpu.dot_dimension_numbers<[1], [0], [0], [1], [0, 0, 1, 1], [], []>} : vector<16x10xbf16>, vector<10x1024xbf16>, vector<16x1024xf32> -> vector<16x1024xf32>
    %45 = arith.addf %40, %44 : vector<16x1024xf32>
    %c0_36 = arith.constant 0 : index
    %c0_37 = arith.constant 0 : index
    %46 = vector.load %arg2[%c0_36, %c0_37] : memref<16x1xf32, #tpu.memory_space<vmem>>, vector<16x1xf32>
    %47 = vector.broadcast %46 : vector<16x1xf32> to vector<16x1024xf32>
    %48 = arith.addf %45, %47 : vector<16x1024xf32>
    %cst_38 = arith.constant 0.000000e+00 : f32
    %49 = vector.broadcast %cst_38 : f32 to vector<16x1024xf32>
    %50 = arith.maximumf %48, %49 : vector<16x1024xf32>
    %c0_39 = arith.constant 0 : index
    %c0_40 = arith.constant 0 : index
    %51 = vector.load %arg7[%c0_39, %c0_40] : memref<1x1024xf32, #tpu.memory_space<vmem>>, vector<1x1024xf32>
    %52 = vector.broadcast %51 : vector<1x1024xf32> to vector<16x1024xf32>
    %53 = arith.mulf %50, %52 : vector<16x1024xf32>
    %cst_41 = arith.constant 0.000000e+00 : bf16
    %54 = vector.broadcast %cst_41 : bf16 to vector<16x1280xbf16>
    %c0_42 = arith.constant 0 : index
    %c0_43 = arith.constant 0 : index
    %55 = vector.load %arg9[%c0_42, %c0_43] : memref<16x1280xbf16, #tpu.memory_space<vmem>>, vector<16x1280xbf16>
    tpu.vector_store %arg9[%c0_42, %c0_43], %54 {strides = array<i32>} : memref<16x1280xbf16, #tpu.memory_space<vmem>>, vector<16x1280xbf16>,
    %56 = arith.truncf %53 : vector<16x1024xf32> to vector<16x1024xbf16>
    %c0_44 = arith.constant 0 : index
    %c128_45 = arith.constant 128 : index
    %57 = vector.load %arg9[%c0_44, %c128_45] : memref<16x1280xbf16, #tpu.memory_space<vmem>>, vector<16x1024xbf16>
    tpu.vector_store %arg9[%c0_44, %c128_45], %56 {strides = array<i32>} : memref<16x1280xbf16, #tpu.memory_space<vmem>>, vector<16x1024xbf16>,
    %cst_46 = arith.constant 0.000000e+00 : f32
    %58 = vector.broadcast %cst_46 : f32 to vector<16x1024xf32>
    %c0_47 = arith.constant 0 : index
    %c85_48 = arith.constant 85 : index
    %59 = vector.load %arg9[%c0_47, %c85_48] : memref<16x1280xbf16, #tpu.memory_space<vmem>>, vector<16x1024xbf16>
    %c0_49 = arith.constant 0 : index
    %c0_50 = arith.constant 0 : index
    %c0_51 = arith.constant 0 : index
    %60 = vector.load %arg3[%c0_49, %c0_50, %c0_51] : memref<9x16x16xbf16, #tpu.memory_space<vmem>>, vector<1x16x16xbf16>
    %61 = vector.shape_cast %60 : vector<1x16x16xbf16> to vector<16x16xbf16>
    %cst_52 = arith.constant dense<0.000000e+00> : vector<16x1024xf32>
    %62 = tpu.matmul %61, %59, %cst_52 {dimension_numbers = #tpu.dot_dimension_numbers<[1], [0], [0], [1], [0, 0, 1, 1], [], []>} : vector<16x16xbf16>, vector<16x1024xbf16>, vector<16x1024xf32> -> vector<16x1024xf32>
    %63 = arith.addf %58, %62 : vector<16x1024xf32>
    %c0_53 = arith.constant 0 : index
    %c86_54 = arith.constant 86 : index
    %64 = vector.load %arg9[%c0_53, %c86_54] : memref<16x1280xbf16, #tpu.memory_space<vmem>>, vector<16x1024xbf16>
    %c1_55 = arith.constant 1 : index
    %c0_56 = arith.constant 0 : index
    %c0_57 = arith.constant 0 : index
    %65 = vector.load %arg3[%c1_55, %c0_56, %c0_57] : memref<9x16x16xbf16, #tpu.memory_space<vmem>>, vector<1x16x16xbf16>
    %66 = vector.shape_cast %65 : vector<1x16x16xbf16> to vector<16x16xbf16>
    %cst_58 = arith.constant dense<0.000000e+00> : vector<16x1024xf32>
    %67 = tpu.matmul %66, %64, %cst_58 {dimension_numbers = #tpu.dot_dimension_numbers<[1], [0], [0], [1], [0, 0, 1, 1], [], []>} : vector<16x16xbf16>, vector<16x1024xbf16>, vector<16x1024xf32> -> vector<16x1024xf32>
    %68 = arith.addf %63, %67 : vector<16x1024xf32>
    %c0_59 = arith.constant 0 : index
    %c87_60 = arith.constant 87 : index
    %69 = vector.load %arg9[%c0_59, %c87_60] : memref<16x1280xbf16, #tpu.memory_space<vmem>>, vector<16x1024xbf16>
    %c2_61 = arith.constant 2 : index
    %c0_62 = arith.constant 0 : index
    %c0_63 = arith.constant 0 : index
    %70 = vector.load %arg3[%c2_61, %c0_62, %c0_63] : memref<9x16x16xbf16, #tpu.memory_space<vmem>>, vector<1x16x16xbf16>
    %71 = vector.shape_cast %70 : vector<1x16x16xbf16> to vector<16x16xbf16>
    %cst_64 = arith.constant dense<0.000000e+00> : vector<16x1024xf32>
    %72 = tpu.matmul %71, %69, %cst_64 {dimension_numbers = #tpu.dot_dimension_numbers<[1], [0], [0], [1], [0, 0, 1, 1], [], []>} : vector<16x16xbf16>, vector<16x1024xbf16>, vector<16x1024xf32> -> vector<16x1024xf32>
    %73 = arith.addf %68, %72 : vector<16x1024xf32>
    %c0_65 = arith.constant 0 : index
    %c127_66 = arith.constant 127 : index
    %74 = vector.load %arg9[%c0_65, %c127_66] : memref<16x1280xbf16, #tpu.memory_space<vmem>>, vector<16x1024xbf16>
    %c3_67 = arith.constant 3 : index
    %c0_68 = arith.constant 0 : index
    %c0_69 = arith.constant 0 : index
    %75 = vector.load %arg3[%c3_67, %c0_68, %c0_69] : memref<9x16x16xbf16, #tpu.memory_space<vmem>>, vector<1x16x16xbf16>
    %76 = vector.shape_cast %75 : vector<1x16x16xbf16> to vector<16x16xbf16>
    %cst_70 = arith.constant dense<0.000000e+00> : vector<16x1024xf32>
    %77 = tpu.matmul %76, %74, %cst_70 {dimension_numbers = #tpu.dot_dimension_numbers<[1], [0], [0], [1], [0, 0, 1, 1], [], []>} : vector<16x16xbf16>, vector<16x1024xbf16>, vector<16x1024xf32> -> vector<16x1024xf32>
    %78 = arith.addf %73, %77 : vector<16x1024xf32>
    %c0_71 = arith.constant 0 : index
    %c128_72 = arith.constant 128 : index
    %79 = vector.load %arg9[%c0_71, %c128_72] : memref<16x1280xbf16, #tpu.memory_space<vmem>>, vector<16x1024xbf16>
    %c4_73 = arith.constant 4 : index
    %c0_74 = arith.constant 0 : index
    %c0_75 = arith.constant 0 : index
    %80 = vector.load %arg3[%c4_73, %c0_74, %c0_75] : memref<9x16x16xbf16, #tpu.memory_space<vmem>>, vector<1x16x16xbf16>
    %81 = vector.shape_cast %80 : vector<1x16x16xbf16> to vector<16x16xbf16>
    %cst_76 = arith.constant dense<0.000000e+00> : vector<16x1024xf32>
    %82 = tpu.matmul %81, %79, %cst_76 {dimension_numbers = #tpu.dot_dimension_numbers<[1], [0], [0], [1], [0, 0, 1, 1], [], []>} : vector<16x16xbf16>, vector<16x1024xbf16>, vector<16x1024xf32> -> vector<16x1024xf32>
    %83 = arith.addf %78, %82 : vector<16x1024xf32>
    %c0_77 = arith.constant 0 : index
    %c129_78 = arith.constant 129 : index
    %84 = vector.load %arg9[%c0_77, %c129_78] : memref<16x1280xbf16, #tpu.memory_space<vmem>>, vector<16x1024xbf16>
    %c5_79 = arith.constant 5 : index
    %c0_80 = arith.constant 0 : index
    %c0_81 = arith.constant 0 : index
    %85 = vector.load %arg3[%c5_79, %c0_80, %c0_81] : memref<9x16x16xbf16, #tpu.memory_space<vmem>>, vector<1x16x16xbf16>
    %86 = vector.shape_cast %85 : vector<1x16x16xbf16> to vector<16x16xbf16>
    %cst_82 = arith.constant dense<0.000000e+00> : vector<16x1024xf32>
    %87 = tpu.matmul %86, %84, %cst_82 {dimension_numbers = #tpu.dot_dimension_numbers<[1], [0], [0], [1], [0, 0, 1, 1], [], []>} : vector<16x16xbf16>, vector<16x1024xbf16>, vector<16x1024xf32> -> vector<16x1024xf32>
    %88 = arith.addf %83, %87 : vector<16x1024xf32>
    %c0_83 = arith.constant 0 : index
    %c169_84 = arith.constant 169 : index
    %89 = vector.load %arg9[%c0_83, %c169_84] : memref<16x1280xbf16, #tpu.memory_space<vmem>>, vector<16x1024xbf16>
    %c6_85 = arith.constant 6 : index
    %c0_86 = arith.constant 0 : index
    %c0_87 = arith.constant 0 : index
    %90 = vector.load %arg3[%c6_85, %c0_86, %c0_87] : memref<9x16x16xbf16, #tpu.memory_space<vmem>>, vector<1x16x16xbf16>
    %91 = vector.shape_cast %90 : vector<1x16x16xbf16> to vector<16x16xbf16>
    %cst_88 = arith.constant dense<0.000000e+00> : vector<16x1024xf32>
    %92 = tpu.matmul %91, %89, %cst_88 {dimension_numbers = #tpu.dot_dimension_numbers<[1], [0], [0], [1], [0, 0, 1, 1], [], []>} : vector<16x16xbf16>, vector<16x1024xbf16>, vector<16x1024xf32> -> vector<16x1024xf32>
    %93 = arith.addf %88, %92 : vector<16x1024xf32>
    %c0_89 = arith.constant 0 : index
    %c170_90 = arith.constant 170 : index
    %94 = vector.load %arg9[%c0_89, %c170_90] : memref<16x1280xbf16, #tpu.memory_space<vmem>>, vector<16x1024xbf16>
    %c7_91 = arith.constant 7 : index
    %c0_92 = arith.constant 0 : index
    %c0_93 = arith.constant 0 : index
    %95 = vector.load %arg3[%c7_91, %c0_92, %c0_93] : memref<9x16x16xbf16, #tpu.memory_space<vmem>>, vector<1x16x16xbf16>
    %96 = vector.shape_cast %95 : vector<1x16x16xbf16> to vector<16x16xbf16>
    %cst_94 = arith.constant dense<0.000000e+00> : vector<16x1024xf32>
    %97 = tpu.matmul %96, %94, %cst_94 {dimension_numbers = #tpu.dot_dimension_numbers<[1], [0], [0], [1], [0, 0, 1, 1], [], []>} : vector<16x16xbf16>, vector<16x1024xbf16>, vector<16x1024xf32> -> vector<16x1024xf32>
    %98 = arith.addf %93, %97 : vector<16x1024xf32>
    %c0_95 = arith.constant 0 : index
    %c171_96 = arith.constant 171 : index
    %99 = vector.load %arg9[%c0_95, %c171_96] : memref<16x1280xbf16, #tpu.memory_space<vmem>>, vector<16x1024xbf16>
    %c8_97 = arith.constant 8 : index
    %c0_98 = arith.constant 0 : index
    %c0_99 = arith.constant 0 : index
    %100 = vector.load %arg3[%c8_97, %c0_98, %c0_99] : memref<9x16x16xbf16, #tpu.memory_space<vmem>>, vector<1x16x16xbf16>
    %101 = vector.shape_cast %100 : vector<1x16x16xbf16> to vector<16x16xbf16>
    %cst_100 = arith.constant dense<0.000000e+00> : vector<16x1024xf32>
    %102 = tpu.matmul %101, %99, %cst_100 {dimension_numbers = #tpu.dot_dimension_numbers<[1], [0], [0], [1], [0, 0, 1, 1], [], []>} : vector<16x16xbf16>, vector<16x1024xbf16>, vector<16x1024xf32> -> vector<16x1024xf32>
    %103 = arith.addf %98, %102 : vector<16x1024xf32>
    %c0_101 = arith.constant 0 : index
    %c0_102 = arith.constant 0 : index
    %104 = vector.load %arg4[%c0_101, %c0_102] : memref<16x1xf32, #tpu.memory_space<vmem>>, vector<16x1xf32>
    %105 = vector.broadcast %104 : vector<16x1xf32> to vector<16x1024xf32>
    %106 = arith.addf %103, %105 : vector<16x1024xf32>
    %cst_103 = arith.constant 0.000000e+00 : f32
    %107 = vector.broadcast %cst_103 : f32 to vector<16x1024xf32>
    %108 = arith.maximumf %106, %107 : vector<16x1024xf32>
    %109 = tpu.iota {dimensions = array<i32: 0>} : vector<2x128xi32>
    %110 = tpu.iota {dimensions = array<i32: 1>} : vector<2x128xi32>
    %c7_i32 = arith.constant 7 : i32
    %111 = vector.broadcast %c7_i32 : i32 to vector<2x128xi32>
    %112 = arith.cmpi slt, %110, %111 : vector<2x128xi32>
    %cst_104 = arith.constant 0.000000e+00 : f32
    %cst_105 = arith.constant -1.000000e+30 : f32
    %113 = vector.broadcast %cst_104 : f32 to vector<2x128xf32>
    %114 = vector.broadcast %cst_105 : f32 to vector<2x128xf32>
    %115 = arith.select %112, %113, %114 : vector<2x128xi1>, vector<2x128xf32>
    %c0_106 = arith.constant 0 : index
    %c0_107 = arith.constant 0 : index
    %c0_108 = arith.constant 0 : index
    %116 = vector.load %arg5[%c0_106, %c0_107, %c0_108] : memref<7x16x512xf32, #tpu.memory_space<vmem>>, vector<1x16x512xf32>
    %117 = vector.shape_cast %116 : vector<1x16x512xf32> to vector<16x512xf32>
    %118 = vector.extract_strided_slice %108 {offsets = [0, 0], sizes = [16, 512], strides = [1, 1]} : vector<16x1024xf32> to vector<16x512xf32>
    %119 = arith.mulf %118, %117 : vector<16x512xf32>
    %cst_109 = arith.constant dense<0.000000e+00> : vector<16xf32>
    %120 = vector.multi_reduction <add>, %119, %cst_109 [1] : vector<16x512xf32> to vector<16xf32>
    %121 = vector.shape_cast %120 : vector<16xf32> to vector<16x1xf32>
    %cst_110 = arith.constant dense<0.000000e+00> : vector<1xf32>
    %122 = vector.multi_reduction <add>, %121, %cst_110 [0] : vector<16x1xf32> to vector<1xf32>
    %123 = vector.shape_cast %122 : vector<1xf32> to vector<1x1xf32>
    %c0_i32 = arith.constant 0 : i32
    %124 = vector.broadcast %c0_i32 : i32 to vector<2x128xi32>
    %125 = arith.cmpi eq, %109, %124 : vector<2x128xi32>
    %c0_i32_111 = arith.constant 0 : i32
    %126 = vector.broadcast %c0_i32_111 : i32 to vector<2x128xi32>
    %127 = arith.cmpi eq, %110, %126 : vector<2x128xi32>
    %128 = arith.andi %125, %127 : vector<2x128xi1>
    %129 = arith.extui %128 : vector<2x128xi1> to vector<2x128xi32>
    %130 = arith.sitofp %129 : vector<2x128xi32> to vector<2x128xf32>
    %131 = vector.broadcast %123 : vector<1x1xf32> to vector<2x128xf32>
    %132 = arith.mulf %130, %131 : vector<2x128xf32>
    %133 = arith.addf %115, %132 : vector<2x128xf32>
    %134 = vector.extract_strided_slice %108 {offsets = [0, 512], sizes = [16, 512], strides = [1, 1]} : vector<16x1024xf32> to vector<16x512xf32>
    %135 = arith.mulf %134, %117 : vector<16x512xf32>
    %cst_112 = arith.constant dense<0.000000e+00> : vector<16xf32>
    %136 = vector.multi_reduction <add>, %135, %cst_112 [1] : vector<16x512xf32> to vector<16xf32>
    %137 = vector.shape_cast %136 : vector<16xf32> to vector<16x1xf32>
    %cst_113 = arith.constant dense<0.000000e+00> : vector<1xf32>
    %138 = vector.multi_reduction <add>, %137, %cst_113 [0] : vector<16x1xf32> to vector<1xf32>
    %139 = vector.shape_cast %138 : vector<1xf32> to vector<1x1xf32>
    %c1_i32 = arith.constant 1 : i32
    %140 = vector.broadcast %c1_i32 : i32 to vector<2x128xi32>
    %141 = arith.cmpi eq, %109, %140 : vector<2x128xi32>
    %c0_i32_114 = arith.constant 0 : i32
    %142 = vector.broadcast %c0_i32_114 : i32 to vector<2x128xi32>
    %143 = arith.cmpi eq, %110, %142 : vector<2x128xi32>
    %144 = arith.andi %141, %143 : vector<2x128xi1>
    %145 = arith.extui %144 : vector<2x128xi1> to vector<2x128xi32>
    %146 = arith.sitofp %145 : vector<2x128xi32> to vector<2x128xf32>
    %147 = vector.broadcast %139 : vector<1x1xf32> to vector<2x128xf32>
    %148 = arith.mulf %146, %147 : vector<2x128xf32>
    %149 = arith.addf %133, %148 : vector<2x128xf32>
    %c1_115 = arith.constant 1 : index
    %c0_116 = arith.constant 0 : index
    %c0_117 = arith.constant 0 : index
    %150 = vector.load %arg5[%c1_115, %c0_116, %c0_117] : memref<7x16x512xf32, #tpu.memory_space<vmem>>, vector<1x16x512xf32>
    %151 = vector.shape_cast %150 : vector<1x16x512xf32> to vector<16x512xf32>
    %152 = vector.extract_strided_slice %108 {offsets = [0, 0], sizes = [16, 512], strides = [1, 1]} : vector<16x1024xf32> to vector<16x512xf32>
    %153 = arith.mulf %152, %151 : vector<16x512xf32>
    %cst_118 = arith.constant dense<0.000000e+00> : vector<16xf32>
    %154 = vector.multi_reduction <add>, %153, %cst_118 [1] : vector<16x512xf32> to vector<16xf32>
    %155 = vector.shape_cast %154 : vector<16xf32> to vector<16x1xf32>
    %cst_119 = arith.constant dense<0.000000e+00> : vector<1xf32>
    %156 = vector.multi_reduction <add>, %155, %cst_119 [0] : vector<16x1xf32> to vector<1xf32>
    %157 = vector.shape_cast %156 : vector<1xf32> to vector<1x1xf32>
    %c0_i32_120 = arith.constant 0 : i32
    %158 = vector.broadcast %c0_i32_120 : i32 to vector<2x128xi32>
    %159 = arith.cmpi eq, %109, %158 : vector<2x128xi32>
    %c1_i32_121 = arith.constant 1 : i32
    %160 = vector.broadcast %c1_i32_121 : i32 to vector<2x128xi32>
    %161 = arith.cmpi eq, %110, %160 : vector<2x128xi32>
    %162 = arith.andi %159, %161 : vector<2x128xi1>
    %163 = arith.extui %162 : vector<2x128xi1> to vector<2x128xi32>
    %164 = arith.sitofp %163 : vector<2x128xi32> to vector<2x128xf32>
    %165 = vector.broadcast %157 : vector<1x1xf32> to vector<2x128xf32>
    %166 = arith.mulf %164, %165 : vector<2x128xf32>
    %167 = arith.addf %149, %166 : vector<2x128xf32>
    %168 = vector.extract_strided_slice %108 {offsets = [0, 512], sizes = [16, 512], strides = [1, 1]} : vector<16x1024xf32> to vector<16x512xf32>
    %169 = arith.mulf %168, %151 : vector<16x512xf32>
    %cst_122 = arith.constant dense<0.000000e+00> : vector<16xf32>
    %170 = vector.multi_reduction <add>, %169, %cst_122 [1] : vector<16x512xf32> to vector<16xf32>
    %171 = vector.shape_cast %170 : vector<16xf32> to vector<16x1xf32>
    %cst_123 = arith.constant dense<0.000000e+00> : vector<1xf32>
    %172 = vector.multi_reduction <add>, %171, %cst_123 [0] : vector<16x1xf32> to vector<1xf32>
    %173 = vector.shape_cast %172 : vector<1xf32> to vector<1x1xf32>
    %c1_i32_124 = arith.constant 1 : i32
    %174 = vector.broadcast %c1_i32_124 : i32 to vector<2x128xi32>
    %175 = arith.cmpi eq, %109, %174 : vector<2x128xi32>
    %c1_i32_125 = arith.constant 1 : i32
    %176 = vector.broadcast %c1_i32_125 : i32 to vector<2x128xi32>
    %177 = arith.cmpi eq, %110, %176 : vector<2x128xi32>
    %178 = arith.andi %175, %177 : vector<2x128xi1>
    %179 = arith.extui %178 : vector<2x128xi1> to vector<2x128xi32>
    %180 = arith.sitofp %179 : vector<2x128xi32> to vector<2x128xf32>
    %181 = vector.broadcast %173 : vector<1x1xf32> to vector<2x128xf32>
    %182 = arith.mulf %180, %181 : vector<2x128xf32>
    %183 = arith.addf %167, %182 : vector<2x128xf32>
    %c2_126 = arith.constant 2 : index
    %c0_127 = arith.constant 0 : index
    %c0_128 = arith.constant 0 : index
    %184 = vector.load %arg5[%c2_126, %c0_127, %c0_128] : memref<7x16x512xf32, #tpu.memory_space<vmem>>, vector<1x16x512xf32>
    %185 = vector.shape_cast %184 : vector<1x16x512xf32> to vector<16x512xf32>
    %186 = vector.extract_strided_slice %108 {offsets = [0, 0], sizes = [16, 512], strides = [1, 1]} : vector<16x1024xf32> to vector<16x512xf32>
    %187 = arith.mulf %186, %185 : vector<16x512xf32>
    %cst_129 = arith.constant dense<0.000000e+00> : vector<16xf32>
    %188 = vector.multi_reduction <add>, %187, %cst_129 [1] : vector<16x512xf32> to vector<16xf32>
    %189 = vector.shape_cast %188 : vector<16xf32> to vector<16x1xf32>
    %cst_130 = arith.constant dense<0.000000e+00> : vector<1xf32>
    %190 = vector.multi_reduction <add>, %189, %cst_130 [0] : vector<16x1xf32> to vector<1xf32>
    %191 = vector.shape_cast %190 : vector<1xf32> to vector<1x1xf32>
    %c0_i32_131 = arith.constant 0 : i32
    %192 = vector.broadcast %c0_i32_131 : i32 to vector<2x128xi32>
    %193 = arith.cmpi eq, %109, %192 : vector<2x128xi32>
    %c2_i32 = arith.constant 2 : i32
    %194 = vector.broadcast %c2_i32 : i32 to vector<2x128xi32>
    %195 = arith.cmpi eq, %110, %194 : vector<2x128xi32>
    %196 = arith.andi %193, %195 : vector<2x128xi1>
    %197 = arith.extui %196 : vector<2x128xi1> to vector<2x128xi32>
    %198 = arith.sitofp %197 : vector<2x128xi32> to vector<2x128xf32>
    %199 = vector.broadcast %191 : vector<1x1xf32> to vector<2x128xf32>
    %200 = arith.mulf %198, %199 : vector<2x128xf32>
    %201 = arith.addf %183, %200 : vector<2x128xf32>
    %202 = vector.extract_strided_slice %108 {offsets = [0, 512], sizes = [16, 512], strides = [1, 1]} : vector<16x1024xf32> to vector<16x512xf32>
    %203 = arith.mulf %202, %185 : vector<16x512xf32>
    %cst_132 = arith.constant dense<0.000000e+00> : vector<16xf32>
    %204 = vector.multi_reduction <add>, %203, %cst_132 [1] : vector<16x512xf32> to vector<16xf32>
    %205 = vector.shape_cast %204 : vector<16xf32> to vector<16x1xf32>
    %cst_133 = arith.constant dense<0.000000e+00> : vector<1xf32>
    %206 = vector.multi_reduction <add>, %205, %cst_133 [0] : vector<16x1xf32> to vector<1xf32>
    %207 = vector.shape_cast %206 : vector<1xf32> to vector<1x1xf32>
    %c1_i32_134 = arith.constant 1 : i32
    %208 = vector.broadcast %c1_i32_134 : i32 to vector<2x128xi32>
    %209 = arith.cmpi eq, %109, %208 : vector<2x128xi32>
    %c2_i32_135 = arith.constant 2 : i32
    %210 = vector.broadcast %c2_i32_135 : i32 to vector<2x128xi32>
    %211 = arith.cmpi eq, %110, %210 : vector<2x128xi32>
    %212 = arith.andi %209, %211 : vector<2x128xi1>
    %213 = arith.extui %212 : vector<2x128xi1> to vector<2x128xi32>
    %214 = arith.sitofp %213 : vector<2x128xi32> to vector<2x128xf32>
    %215 = vector.broadcast %207 : vector<1x1xf32> to vector<2x128xf32>
    %216 = arith.mulf %214, %215 : vector<2x128xf32>
    %217 = arith.addf %201, %216 : vector<2x128xf32>
    %c3_136 = arith.constant 3 : index
    %c0_137 = arith.constant 0 : index
    %c0_138 = arith.constant 0 : index
    %218 = vector.load %arg5[%c3_136, %c0_137, %c0_138] : memref<7x16x512xf32, #tpu.memory_space<vmem>>, vector<1x16x512xf32>
    %219 = vector.shape_cast %218 : vector<1x16x512xf32> to vector<16x512xf32>
    %220 = vector.extract_strided_slice %108 {offsets = [0, 0], sizes = [16, 512], strides = [1, 1]} : vector<16x1024xf32> to vector<16x512xf32>
    %221 = arith.mulf %220, %219 : vector<16x512xf32>
    %cst_139 = arith.constant dense<0.000000e+00> : vector<16xf32>
    %222 = vector.multi_reduction <add>, %221, %cst_139 [1] : vector<16x512xf32> to vector<16xf32>
    %223 = vector.shape_cast %222 : vector<16xf32> to vector<16x1xf32>
    %cst_140 = arith.constant dense<0.000000e+00> : vector<1xf32>
    %224 = vector.multi_reduction <add>, %223, %cst_140 [0] : vector<16x1xf32> to vector<1xf32>
    %225 = vector.shape_cast %224 : vector<1xf32> to vector<1x1xf32>
    %c0_i32_141 = arith.constant 0 : i32
    %226 = vector.broadcast %c0_i32_141 : i32 to vector<2x128xi32>
    %227 = arith.cmpi eq, %109, %226 : vector<2x128xi32>
    %c3_i32 = arith.constant 3 : i32
    %228 = vector.broadcast %c3_i32 : i32 to vector<2x128xi32>
    %229 = arith.cmpi eq, %110, %228 : vector<2x128xi32>
    %230 = arith.andi %227, %229 : vector<2x128xi1>
    %231 = arith.extui %230 : vector<2x128xi1> to vector<2x128xi32>
    %232 = arith.sitofp %231 : vector<2x128xi32> to vector<2x128xf32>
    %233 = vector.broadcast %225 : vector<1x1xf32> to vector<2x128xf32>
    %234 = arith.mulf %232, %233 : vector<2x128xf32>
    %235 = arith.addf %217, %234 : vector<2x128xf32>
    %236 = vector.extract_strided_slice %108 {offsets = [0, 512], sizes = [16, 512], strides = [1, 1]} : vector<16x1024xf32> to vector<16x512xf32>
    %237 = arith.mulf %236, %219 : vector<16x512xf32>
    %cst_142 = arith.constant dense<0.000000e+00> : vector<16xf32>
    %238 = vector.multi_reduction <add>, %237, %cst_142 [1] : vector<16x512xf32> to vector<16xf32>
    %239 = vector.shape_cast %238 : vector<16xf32> to vector<16x1xf32>
    %cst_143 = arith.constant dense<0.000000e+00> : vector<1xf32>
    %240 = vector.multi_reduction <add>, %239, %cst_143 [0] : vector<16x1xf32> to vector<1xf32>
    %241 = vector.shape_cast %240 : vector<1xf32> to vector<1x1xf32>
    %c1_i32_144 = arith.constant 1 : i32
    %242 = vector.broadcast %c1_i32_144 : i32 to vector<2x128xi32>
    %243 = arith.cmpi eq, %109, %242 : vector<2x128xi32>
    %c3_i32_145 = arith.constant 3 : i32
    %244 = vector.broadcast %c3_i32_145 : i32 to vector<2x128xi32>
    %245 = arith.cmpi eq, %110, %244 : vector<2x128xi32>
    %246 = arith.andi %243, %245 : vector<2x128xi1>
    %247 = arith.extui %246 : vector<2x128xi1> to vector<2x128xi32>
    %248 = arith.sitofp %247 : vector<2x128xi32> to vector<2x128xf32>
    %249 = vector.broadcast %241 : vector<1x1xf32> to vector<2x128xf32>
    %250 = arith.mulf %248, %249 : vector<2x128xf32>
    %251 = arith.addf %235, %250 : vector<2x128xf32>
    %c4_146 = arith.constant 4 : index
    %c0_147 = arith.constant 0 : index
    %c0_148 = arith.constant 0 : index
    %252 = vector.load %arg5[%c4_146, %c0_147, %c0_148] : memref<7x16x512xf32, #tpu.memory_space<vmem>>, vector<1x16x512xf32>
    %253 = vector.shape_cast %252 : vector<1x16x512xf32> to vector<16x512xf32>
    %254 = vector.extract_strided_slice %108 {offsets = [0, 0], sizes = [16, 512], strides = [1, 1]} : vector<16x1024xf32> to vector<16x512xf32>
    %255 = arith.mulf %254, %253 : vector<16x512xf32>
    %cst_149 = arith.constant dense<0.000000e+00> : vector<16xf32>
    %256 = vector.multi_reduction <add>, %255, %cst_149 [1] : vector<16x512xf32> to vector<16xf32>
    %257 = vector.shape_cast %256 : vector<16xf32> to vector<16x1xf32>
    %cst_150 = arith.constant dense<0.000000e+00> : vector<1xf32>
    %258 = vector.multi_reduction <add>, %257, %cst_150 [0] : vector<16x1xf32> to vector<1xf32>
    %259 = vector.shape_cast %258 : vector<1xf32> to vector<1x1xf32>
    %c0_i32_151 = arith.constant 0 : i32
    %260 = vector.broadcast %c0_i32_151 : i32 to vector<2x128xi32>
    %261 = arith.cmpi eq, %109, %260 : vector<2x128xi32>
    %c4_i32 = arith.constant 4 : i32
    %262 = vector.broadcast %c4_i32 : i32 to vector<2x128xi32>
    %263 = arith.cmpi eq, %110, %262 : vector<2x128xi32>
    %264 = arith.andi %261, %263 : vector<2x128xi1>
    %265 = arith.extui %264 : vector<2x128xi1> to vector<2x128xi32>
    %266 = arith.sitofp %265 : vector<2x128xi32> to vector<2x128xf32>
    %267 = vector.broadcast %259 : vector<1x1xf32> to vector<2x128xf32>
    %268 = arith.mulf %266, %267 : vector<2x128xf32>
    %269 = arith.addf %251, %268 : vector<2x128xf32>
    %270 = vector.extract_strided_slice %108 {offsets = [0, 512], sizes = [16, 512], strides = [1, 1]} : vector<16x1024xf32> to vector<16x512xf32>
    %271 = arith.mulf %270, %253 : vector<16x512xf32>
    %cst_152 = arith.constant dense<0.000000e+00> : vector<16xf32>
    %272 = vector.multi_reduction <add>, %271, %cst_152 [1] : vector<16x512xf32> to vector<16xf32>
    %273 = vector.shape_cast %272 : vector<16xf32> to vector<16x1xf32>
    %cst_153 = arith.constant dense<0.000000e+00> : vector<1xf32>
    %274 = vector.multi_reduction <add>, %273, %cst_153 [0] : vector<16x1xf32> to vector<1xf32>
    %275 = vector.shape_cast %274 : vector<1xf32> to vector<1x1xf32>
    %c1_i32_154 = arith.constant 1 : i32
    %276 = vector.broadcast %c1_i32_154 : i32 to vector<2x128xi32>
    %277 = arith.cmpi eq, %109, %276 : vector<2x128xi32>
    %c4_i32_155 = arith.constant 4 : i32
    %278 = vector.broadcast %c4_i32_155 : i32 to vector<2x128xi32>
    %279 = arith.cmpi eq, %110, %278 : vector<2x128xi32>
    %280 = arith.andi %277, %279 : vector<2x128xi1>
    %281 = arith.extui %280 : vector<2x128xi1> to vector<2x128xi32>
    %282 = arith.sitofp %281 : vector<2x128xi32> to vector<2x128xf32>
    %283 = vector.broadcast %275 : vector<1x1xf32> to vector<2x128xf32>
    %284 = arith.mulf %282, %283 : vector<2x128xf32>
    %285 = arith.addf %269, %284 : vector<2x128xf32>
    %c5_156 = arith.constant 5 : index
    %c0_157 = arith.constant 0 : index
    %c0_158 = arith.constant 0 : index
    %286 = vector.load %arg5[%c5_156, %c0_157, %c0_158] : memref<7x16x512xf32, #tpu.memory_space<vmem>>, vector<1x16x512xf32>
    %287 = vector.shape_cast %286 : vector<1x16x512xf32> to vector<16x512xf32>
    %288 = vector.extract_strided_slice %108 {offsets = [0, 0], sizes = [16, 512], strides = [1, 1]} : vector<16x1024xf32> to vector<16x512xf32>
    %289 = arith.mulf %288, %287 : vector<16x512xf32>
    %cst_159 = arith.constant dense<0.000000e+00> : vector<16xf32>
    %290 = vector.multi_reduction <add>, %289, %cst_159 [1] : vector<16x512xf32> to vector<16xf32>
    %291 = vector.shape_cast %290 : vector<16xf32> to vector<16x1xf32>
    %cst_160 = arith.constant dense<0.000000e+00> : vector<1xf32>
    %292 = vector.multi_reduction <add>, %291, %cst_160 [0] : vector<16x1xf32> to vector<1xf32>
    %293 = vector.shape_cast %292 : vector<1xf32> to vector<1x1xf32>
    %c0_i32_161 = arith.constant 0 : i32
    %294 = vector.broadcast %c0_i32_161 : i32 to vector<2x128xi32>
    %295 = arith.cmpi eq, %109, %294 : vector<2x128xi32>
    %c5_i32 = arith.constant 5 : i32
    %296 = vector.broadcast %c5_i32 : i32 to vector<2x128xi32>
    %297 = arith.cmpi eq, %110, %296 : vector<2x128xi32>
    %298 = arith.andi %295, %297 : vector<2x128xi1>
    %299 = arith.extui %298 : vector<2x128xi1> to vector<2x128xi32>
    %300 = arith.sitofp %299 : vector<2x128xi32> to vector<2x128xf32>
    %301 = vector.broadcast %293 : vector<1x1xf32> to vector<2x128xf32>
    %302 = arith.mulf %300, %301 : vector<2x128xf32>
    %303 = arith.addf %285, %302 : vector<2x128xf32>
    %304 = vector.extract_strided_slice %108 {offsets = [0, 512], sizes = [16, 512], strides = [1, 1]} : vector<16x1024xf32> to vector<16x512xf32>
    %305 = arith.mulf %304, %287 : vector<16x512xf32>
    %cst_162 = arith.constant dense<0.000000e+00> : vector<16xf32>
    %306 = vector.multi_reduction <add>, %305, %cst_162 [1] : vector<16x512xf32> to vector<16xf32>
    %307 = vector.shape_cast %306 : vector<16xf32> to vector<16x1xf32>
    %cst_163 = arith.constant dense<0.000000e+00> : vector<1xf32>
    %308 = vector.multi_reduction <add>, %307, %cst_163 [0] : vector<16x1xf32> to vector<1xf32>
    %309 = vector.shape_cast %308 : vector<1xf32> to vector<1x1xf32>
    %c1_i32_164 = arith.constant 1 : i32
    %310 = vector.broadcast %c1_i32_164 : i32 to vector<2x128xi32>
    %311 = arith.cmpi eq, %109, %310 : vector<2x128xi32>
    %c5_i32_165 = arith.constant 5 : i32
    %312 = vector.broadcast %c5_i32_165 : i32 to vector<2x128xi32>
    %313 = arith.cmpi eq, %110, %312 : vector<2x128xi32>
    %314 = arith.andi %311, %313 : vector<2x128xi1>
    %315 = arith.extui %314 : vector<2x128xi1> to vector<2x128xi32>
    %316 = arith.sitofp %315 : vector<2x128xi32> to vector<2x128xf32>
    %317 = vector.broadcast %309 : vector<1x1xf32> to vector<2x128xf32>
    %318 = arith.mulf %316, %317 : vector<2x128xf32>
    %319 = arith.addf %303, %318 : vector<2x128xf32>
    %c6_166 = arith.constant 6 : index
    %c0_167 = arith.constant 0 : index
    %c0_168 = arith.constant 0 : index
    %320 = vector.load %arg5[%c6_166, %c0_167, %c0_168] : memref<7x16x512xf32, #tpu.memory_space<vmem>>, vector<1x16x512xf32>
    %321 = vector.shape_cast %320 : vector<1x16x512xf32> to vector<16x512xf32>
    %322 = vector.extract_strided_slice %108 {offsets = [0, 0], sizes = [16, 512], strides = [1, 1]} : vector<16x1024xf32> to vector<16x512xf32>
    %323 = arith.mulf %322, %321 : vector<16x512xf32>
    %cst_169 = arith.constant dense<0.000000e+00> : vector<16xf32>
    %324 = vector.multi_reduction <add>, %323, %cst_169 [1] : vector<16x512xf32> to vector<16xf32>
    %325 = vector.shape_cast %324 : vector<16xf32> to vector<16x1xf32>
    %cst_170 = arith.constant dense<0.000000e+00> : vector<1xf32>
    %326 = vector.multi_reduction <add>, %325, %cst_170 [0] : vector<16x1xf32> to vector<1xf32>
    %327 = vector.shape_cast %326 : vector<1xf32> to vector<1x1xf32>
    %c0_i32_171 = arith.constant 0 : i32
    %328 = vector.broadcast %c0_i32_171 : i32 to vector<2x128xi32>
    %329 = arith.cmpi eq, %109, %328 : vector<2x128xi32>
    %c6_i32 = arith.constant 6 : i32
    %330 = vector.broadcast %c6_i32 : i32 to vector<2x128xi32>
    %331 = arith.cmpi eq, %110, %330 : vector<2x128xi32>
    %332 = arith.andi %329, %331 : vector<2x128xi1>
    %333 = arith.extui %332 : vector<2x128xi1> to vector<2x128xi32>
    %334 = arith.sitofp %333 : vector<2x128xi32> to vector<2x128xf32>
    %335 = vector.broadcast %327 : vector<1x1xf32> to vector<2x128xf32>
    %336 = arith.mulf %334, %335 : vector<2x128xf32>
    %337 = arith.addf %319, %336 : vector<2x128xf32>
    %338 = vector.extract_strided_slice %108 {offsets = [0, 512], sizes = [16, 512], strides = [1, 1]} : vector<16x1024xf32> to vector<16x512xf32>
    %339 = arith.mulf %338, %321 : vector<16x512xf32>
    %cst_172 = arith.constant dense<0.000000e+00> : vector<16xf32>
    %340 = vector.multi_reduction <add>, %339, %cst_172 [1] : vector<16x512xf32> to vector<16xf32>
    %341 = vector.shape_cast %340 : vector<16xf32> to vector<16x1xf32>
    %cst_173 = arith.constant dense<0.000000e+00> : vector<1xf32>
    %342 = vector.multi_reduction <add>, %341, %cst_173 [0] : vector<16x1xf32> to vector<1xf32>
    %343 = vector.shape_cast %342 : vector<1xf32> to vector<1x1xf32>
    %c1_i32_174 = arith.constant 1 : i32
    %344 = vector.broadcast %c1_i32_174 : i32 to vector<2x128xi32>
    %345 = arith.cmpi eq, %109, %344 : vector<2x128xi32>
    %c6_i32_175 = arith.constant 6 : i32
    %346 = vector.broadcast %c6_i32_175 : i32 to vector<2x128xi32>
    %347 = arith.cmpi eq, %110, %346 : vector<2x128xi32>
    %348 = arith.andi %345, %347 : vector<2x128xi1>
    %349 = arith.extui %348 : vector<2x128xi1> to vector<2x128xi32>
    %350 = arith.sitofp %349 : vector<2x128xi32> to vector<2x128xf32>
    %351 = vector.broadcast %343 : vector<1x1xf32> to vector<2x128xf32>
    %352 = arith.mulf %350, %351 : vector<2x128xf32>
    %353 = arith.addf %337, %352 : vector<2x128xf32>
    %c0_176 = arith.constant 0 : index
    %c0_177 = arith.constant 0 : index
    %354 = vector.load %arg6[%c0_176, %c0_177] : memref<1x128xf32, #tpu.memory_space<vmem>>, vector<1x128xf32>
    %355 = vector.broadcast %354 : vector<1x128xf32> to vector<2x128xf32>
    %356 = arith.addf %353, %355 : vector<2x128xf32>
    %cst_178 = arith.constant dense<0xFF800000> : vector<2xf32>
    %357 = vector.multi_reduction <maximumf>, %356, %cst_178 [1] : vector<2x128xf32> to vector<2xf32>
    %358 = vector.shape_cast %357 : vector<2xf32> to vector<2x1xf32>
    %359 = vector.broadcast %358 : vector<2x1xf32> to vector<2x128xf32>
    %360 = arith.subf %356, %359 : vector<2x128xf32>
    %361 = math.exp %360 : vector<2x128xf32>
    %cst_179 = arith.constant dense<0.000000e+00> : vector<2xf32>
    %362 = vector.multi_reduction <add>, %361, %cst_179 [1] : vector<2x128xf32> to vector<2xf32>
    %363 = vector.shape_cast %362 : vector<2xf32> to vector<2x1xf32>
    %364 = vector.broadcast %363 : vector<2x1xf32> to vector<2x128xf32>
    %365 = arith.divf %361, %364 : vector<2x128xf32>
    %366 = vector.extract_strided_slice %365 {offsets = [0, 0], sizes = [2, 7], strides = [1, 1]} : vector<2x128xf32> to vector<2x7xf32>
    %c0_180 = arith.constant 0 : index
    %c0_181 = arith.constant 0 : index
    %367 = vector.load %arg8[%c0_180, %c0_181] : memref<2x7xf32, #tpu.memory_space<vmem>>, vector<2x7xf32>
    tpu.vector_store %arg8[%c0_180, %c0_181], %366 {strides = array<i32>} : memref<2x7xf32, #tpu.memory_space<vmem>>, vector<2x7xf32>,
    return
  }
}

</mosaic_0001>

<bundles_post_ra>
// kernel: tetris_forward.1
= control target key start
LH: loop header
LB: loop body
LE: loop exit
PB: predicated region body
PF: predicated region fallthrough
CT: control target
= control target key end

     0   :  { %s5722_s29 = smov 42   ;;  %v5723_v8 = vmov 0   ;;  %s5724_s24 = smov 43   ;;  %s7265_s0 = inlined_call_operand.vmem [shape: bf16[10,1280], index: 0, kind: input, shape index: {}]   ;;  %s7266_s1 = inlined_call_operand.vmem [shape: bf16[9,16,10], index: 1, kind: input, shape index: {}]   ;;  %s7267_s2 = inlined_call_operand.vmem [shape: f32[16,1], index: 2, kind: input, shape index: {}]   ;;  %s7268_s3 = inlined_call_operand.vmem [shape: bf16[9,16,16], index: 3, kind: input, shape index: {}]   ;;  %s7269_s4 = inlined_call_operand.vmem [shape: f32[16,1], index: 4, kind: input, shape index: {}]   ;;  %s7270_s5 = inlined_call_operand.vmem [shape: f32[7,16,512], index: 5, kind: input, shape index: {}]   ;;  %s7271_s6 = inlined_call_operand.vmem [shape: f32[1,128], index: 6, kind: input, shape index: {}]   ;;  %s7272_s7 = inlined_call_operand.vmem [shape: f32[1,1024], index: 7, kind: input, shape index: {}]   ;;  %s7273_s8 = inlined_call_operand.hbm [shape: f32[2,7], index: 8, kind: output, shape index: {}]  }
   0x1   :  { %v5646_v0 = vld [vmem:[%s7265_s0 + $0x8] ss:$40 sps:$4 sm:$0x1f]   ;;  %v5650_v2 = vld [vmem:[%s7265_s0 + $0xc] ss:$40 sps:$4 sm:$0x1f]   ;;  %176 = vmatprep.mubr.bf16.mxu0 %v5723_v8  ;;  %219 = vmatprep.mubr.bf16.mxu1 %v5723_v8 }
   0x2   :  { %92 = vrot.lane.b32.xlu1 %v5646_v0, %s5722_s29  ;;  %v5648_v1 = vld [vmem:[%s7265_s0] ss:$40 sps:$4 sm:$0x1f]   ;;  %v5651_v3 = vld [vmem:[%s7265_s0 + $0x4] ss:$40 sps:$4 sm:$0x1f]   ;;  %5644 = vset.pattern.permute.xlu0 %v5723_v8 }
   0x3   :  { %88 = vrot.lane.b32.xlu0 %v5648_v1, %s5722_s29  ;;  %v5652_v4 = vld [vmem:[%s7265_s0 + $0x14] ss:$40 sps:$4 sm:$0x1f]   ;;  %v5654_v5 = vld [vmem:[%s7265_s0 + $0x10] ss:$40 sps:$4 sm:$0x1f]   ;;  %5645 = vset.pattern.permute.xlu1 %v5723_v8 }
   0x4   :  { %v5655_v6 = vld [vmem:[%s7265_s0 + $0x1c] ss:$40 sps:$4 sm:$0x1f]   ;;  %v5657_v7 = vld [vmem:[%s7265_s0 + $0x18] ss:$40 sps:$4 sm:$0x1f]  }
   0x5   :  { %v5658_v9 = vld [vmem:[%s7265_s0 + $0x20] ss:$40 sps:$4 sm:$0x1f]  }
   0x6   :  { %94 = vrot.lane.b32.xlu1 %v5650_v2, %s5722_s29 }
   0x7   :  { %90 = vrot.lane.b32.xlu0 %v5651_v3, %s5722_s29 }
   0xa   :  { %98 = vrot.lane.b32.xlu1 %v5652_v4, %s5722_s29 }
   0xb   :  { %96 = vrot.lane.b32.xlu0 %v5654_v5, %s5722_s29 }
   0xe   :  { %102 = vrot.lane.b32.xlu1 %v5655_v6, %s5722_s29 }
   0xf   :  { %100 = vrot.lane.b32.xlu0 %v5657_v7, %s5722_s29 }
  0x12   :  { %321 = vrot.lane.b32.xlu1 %v5648_v1, %s5724_s24 }
  0x13   :  { %104 = vrot.lane.b32.xlu0 %v5658_v9, %s5722_s29 }
  0x16   :  { %325 = vrot.lane.b32.xlu1 %v5646_v0, %s5724_s24 }
  0x17   :  { %323 = vrot.lane.b32.xlu0 %v5651_v3, %s5724_s24 }
  0x18   :  { %13 = vsyncpa [#allocation4], 0  ;;  %s5725_s25 = smov 41   ;;  %s5726_s26 = smov 1   ;;  %v5846_v10 = vld [vmem:[%s7265_s0 + $0x4] sm:$0xff]  ;;  %v5859_v13 = vld [vmem:[%s7265_s0 + $0xc] sm:$0xff] }
  0x19   :  { %v1315_v11 = vld [vmem:[%s7265_s0 + $0x2c] sm:$0x11]  ;;  %v1316_v14 = vld [vmem:[%s7265_s0 + $0x34] sm:$0x11]  ;;  %s5727_s14 = smov 127   ;;  %v5889_v21 = vld [vmem:[%s7265_s0 + $0x1c] sm:$0xff] }
  0x1a   :  { %329 = vrot.lane.b32.xlu1 %v5654_v5, %s5724_s24  ;;  %v5854_v12 = vcombine.high %v5846_v10, %v1315_v11  ;;  %v5202_v15 = vcombine.low %v5846_v10, %v1315_v11  ;;  %v5869_v16 = vcombine.high %v5859_v13, %v1316_v14  ;;  %v5874_v17 = vld [vmem:[%s7265_s0 + $0x14] sm:$0xff]  ;;  %v1317_v18 = vld [vmem:[%s7265_s0 + $0x3c] sm:$0x11]  ;;  %v5204_v19 = vcombine.low %v5859_v13, %v1316_v14  ;;  %v1318_v22 = vld [vmem:[%s7265_s0 + $0x44] sm:$0x11]  ;;  %s5728_s28 = smov 87  }
  0x1b   :  { %327 = vrot.lane.b32.xlu0 %v5650_v2, %s5724_s24  ;;  %v5884_v20 = vcombine.high %v5874_v17, %v1317_v18  ;;  %v5896_v23 = vcombine.low %v5874_v17, %v1317_v18  ;;  %v5901_v24 = vcombine.high %v5889_v21, %v1318_v22  ;;  %v5906_v25 = vcombine.low %v5889_v21, %v1318_v22  ;;  %v5915_v26 = vld [vmem:[%s7265_s0 + $0x24] ss:$40 sps:$4 sm:$0x1f]   ;;  %s5729_s30 = smov 86   ;;  %s5730_s11 = smov 85   ;;  %v5670_v22 = vld [vmem:[%s7266_s1 + $0x10] sm:$0xff]  }
  0x1c   :  { %vm106_vm0 = vcmask 343040   ;;  %vm119_vm1 = vcmask 1044480   ;;  %v5668_v36 = vld [vmem:[%s7266_s1 + $0x8] sm:$0xff]   ;;  %vm115_vm2 = vcmask 80896   ;;  %vm339_vm3 = vcmask 351232   ;;  %v5669_v56 = vld [vmem:[%s7266_s1] sm:$0xff]  }
  0x1d   :  { %v2358_v62 = vld [vmem:[%s7267_s2 + $0x8] sm:$0xff]  ;;  %v2357_v63 = vld [vmem:[%s7267_s2] sm:$0xff]  ;;  %vm573_vm4 = vcmask 334848   ;;  %vm823_vm5 = vcmask 7168   ;;  %vm1383_vm6 = vcmask 1039360   ;;  %vm1633_vm7 = vcmask 711680  }
  0x1e   :  { %333 = vrot.lane.b32.xlu1 %v5657_v7, %s5724_s24  ;;  %vm1883_vm8 = vcmask 703488   ;;  %vm2133_vm9 = vcmask 695296   ;;  %vm2547_vm10 = vcmask 130048   ;;  %s5733_s21 = smov [#allocation3]  }
  0x1f   :  { %331 = vrot.lane.b32.xlu0 %v5652_v4, %s5724_s24  ;;  %s5121_s22 = sshll.u32 %s5733_s21, 4  ;;  %s5122_s22 = int_to_ptr.vmem [resolvable:$true] %s5121_s22 }
  0x20   :  { %p5703_p1 = scmp.lt.s32.totalorder %s5122_s22, %s5122_s22 }
  0x22   :  { %337 = vrot.lane.b32.xlu1 %v5658_v9, %s5724_s24 }
  0x23   :  { %335 = vrot.lane.b32.xlu0 %v5655_v6, %s5724_s24 }
  0x26   :  { %557 = vrot.lane.b32.xlu1 %v5651_v3, %s5725_s25 }
  0x27   :  { %555 = vrot.lane.b32.xlu0 %v5648_v1, %s5725_s25 }
  0x2a   :  { %561 = vrot.lane.b32.xlu1 %v5650_v2, %s5725_s25 }
  0x2b   :  { %559 = vrot.lane.b32.xlu0 %v5646_v0, %s5725_s25 }
  0x2e   :  { %565 = vrot.lane.b32.xlu1 %v5652_v4, %s5725_s25 }
  0x2f   :  { %563 = vrot.lane.b32.xlu0 %v5654_v5, %s5725_s25 }
  0x32   :  { %569 = vrot.lane.b32.xlu1 %v5655_v6, %s5725_s25 }
  0x33   :  { %567 = vrot.lane.b32.xlu0 %v5657_v7, %s5725_s25 }
  0x36   :  { %805 = vrot.lane.b32.xlu1 %v5648_v1, %s5726_s26 }
  0x37   :  { %571 = vrot.lane.b32.xlu0 %v5658_v9, %s5725_s25 }
  0x3a   :  { %809 = vrot.lane.b32.xlu1 %v5646_v0, %s5726_s26 }
  0x3b   :  { %807 = vrot.lane.b32.xlu0 %v5651_v3, %s5726_s26 }
  0x3e   :  { %813 = vrot.lane.b32.xlu1 %v5654_v5, %s5726_s26 }
  0x3f   :  { %811 = vrot.lane.b32.xlu0 %v5650_v2, %s5726_s26 }
  0x42   :  { %817 = vrot.lane.b32.xlu1 %v5657_v7, %s5726_s26 }
  0x43   :  { %815 = vrot.lane.b32.xlu0 %v5652_v4, %s5726_s26 }
  0x46   :  { %821 = vrot.lane.b32.xlu1 %v5658_v9, %s5726_s26 }
  0x47   :  { %819 = vrot.lane.b32.xlu0 %v5655_v6, %s5726_s26 }
  0x4a   :  { %1367 = vrot.lane.b32.xlu1 %v5854_v12, %s5727_s14 }
  0x4b   :  { %1365 = vrot.lane.b32.xlu0 %v5202_v15, %s5727_s14 }
  0x4e   :  { %1371 = vrot.lane.b32.xlu1 %v5869_v16, %s5727_s14 }
  0x4f   :  { %1369 = vrot.lane.b32.xlu0 %v5204_v19, %s5727_s14 }
  0x52   :  { %1375 = vrot.lane.b32.xlu1 %v5884_v20, %s5727_s14 }
  0x53   :  { %1373 = vrot.lane.b32.xlu0 %v5896_v23, %s5727_s14 }
  0x56   :  { %1379 = vrot.lane.b32.xlu1 %v5901_v24, %s5727_s14 }
  0x57   :  { %1377 = vrot.lane.b32.xlu0 %v5906_v25, %s5727_s14 }
  0x5a   :  { %1615 = vrot.lane.b32.xlu1 %v5202_v15, %s5728_s28 }
  0x5b   :  { %1381 = vrot.lane.b32.xlu0 %v5915_v26, %s5727_s14 }
  0x5e   :  { %1619 = vrot.lane.b32.xlu1 %v5204_v19, %s5728_s28 }
  0x5f   :  { %1617 = vrot.lane.b32.xlu0 %v5854_v12, %s5728_s28 }
  0x62   :  { %1623 = vrot.lane.b32.xlu1 %v5896_v23, %s5728_s28 }
  0x63   :  { %1621 = vrot.lane.b32.xlu0 %v5869_v16, %s5728_s28 }
  0x66   :  { %1627 = vrot.lane.b32.xlu1 %v5906_v25, %s5728_s28 }
  0x67   :  { %1625 = vrot.lane.b32.xlu0 %v5884_v20, %s5728_s28 }
  0x6a   :  { %1631 = vrot.lane.b32.xlu1 %v5915_v26, %s5728_s28 }
  0x6b   :  { %1629 = vrot.lane.b32.xlu0 %v5901_v24, %s5728_s28 }
  0x6e   :  { %1867 = vrot.lane.b32.xlu1 %v5854_v12, %s5729_s30 }
  0x6f   :  { %1865 = vrot.lane.b32.xlu0 %v5202_v15, %s5729_s30 }
  0x72   :  { %1871 = vrot.lane.b32.xlu1 %v5869_v16, %s5729_s30 }
  0x73   :  { %1869 = vrot.lane.b32.xlu0 %v5204_v19, %s5729_s30 }
  0x74   :  { %v93_v27 = vpop.permute.xlu1 %92 }
  0x75   :  { %v89_v28 = vpop.permute.xlu0 %88 }
  0x76   :  { %1875 = vrot.lane.b32.xlu1 %v5884_v20, %s5729_s30 }
  0x77   :  { %1873 = vrot.lane.b32.xlu0 %v5896_v23, %s5729_s30 }
  0x78   :  { %v95_v29 = vpop.permute.xlu1 %94 }
  0x79   :  { %v91_v30 = vpop.permute.xlu0 %90  ;;  %v109_v35 = vsel %vm106_vm0, %v93_v27, %v95_v29 }
  0x7a   :  { %1879 = vrot.lane.b32.xlu1 %v5901_v24, %s5729_s30  ;;  %v108_v31 = vsel %vm106_vm0, %v91_v30, %v93_v27  ;;  %v107_v32 = vsel %vm106_vm0, %v89_v28, %v91_v30  ;;  %v127_v39 = vsel %vm119_vm1, %v109_v35, 0 }
  0x7b   :  { %5141 = vmatprep.subr.msk.bf16.mxu0 %vm119_vm1, %v108_v31  ;;  %v121_v33 = vsel %vm119_vm1, %v107_v32, 0  ;;  %1877 = vrot.lane.b32.xlu0 %v5906_v25, %s5729_s30 }
  0x7c   :  { %v99_v34 = vpop.permute.xlu1 %98  ;;  %145 = vmatpush1.bf16.msra.mxu0 %v121_v33 }
  0x7d   :  { %v97_v37 = vpop.permute.xlu0 %96 }
  0x7e   :  { %2115 = vrot.lane.b32.xlu1 %v5202_v15, %s5730_s11  ;;  %v110_v38 = vsel %vm106_vm0, %v95_v29, %v97_v37  ;;  %v111_v41 = vsel %vm106_vm0, %v97_v37, %v99_v34 }
  0x7f   :  { %5143 = vmatprep.subr.msk.bf16.mxu1 %vm119_vm1, %v110_v38  ;;  %1881 = vrot.lane.b32.xlu0 %v5915_v26, %s5729_s30  ;;  %v133_v44 = vsel %vm119_vm1, %v111_v41, 0 }
  0x80   :  { %v103_v40 = vpop.permute.xlu1 %102  ;;  %188 = vmatpush1.bf16.msra.mxu1 %v127_v39  ;;  %5142 = vmatmul.mubr.msk.bf16.vlgmr.msra.gmra.mrb[0].mxu0 %vm115_vm2, %v5668_v36 }
  0x81   :  { %v101_v42 = vpop.permute.xlu0 %100  ;;  %262 = vmatprep.mubr.bf16.mxu0 %v5723_v8 }
  0x82   :  { %2119 = vrot.lane.b32.xlu1 %v5204_v19, %s5730_s11  ;;  %v112_v43 = vsel %vm106_vm0, %v99_v34, %v101_v42  ;;  %v113_v46 = vsel %vm106_vm0, %v101_v42, %v103_v40 }
  0x83   :  { %5145 = vmatprep.subr.msk.bf16.mxu0 %vm119_vm1, %v112_v43  ;;  %2117 = vrot.lane.b32.xlu0 %v5854_v12, %s5730_s11  ;;  %v139_v49 = vsel %vm119_vm1, %v113_v46, 0  ;;  %v5671_v43 = vld [vmem:[%s7266_s1 + $0x18] sm:$0xff]  }
  0x84   :  { %v322_v45 = vpop.permute.xlu1 %321  ;;  %231 = vmatpush1.bf16.msra.mxu0 %v133_v44  ;;  %5144 = vmatmul.mubr.msk.bf16.vlgmr.msra.gmra.mrb[0].mxu1 %vm115_vm2, %v5668_v36 }
  0x85   :  { %v105_v47 = vpop.permute.xlu0 %104  ;;  %305 = vmatprep.mubr.bf16.mxu1 %v5723_v8 }
  0x86   :  { %2123 = vrot.lane.b32.xlu1 %v5896_v23, %s5730_s11  ;;  %v114_v48 = vsel %vm106_vm0, %v103_v40, %v105_v47  ;;  %v1051_v47 = vld [vmem:[%s7265_s0 + $0x2c] sm:$0x11] }
  0x87   :  { %5147 = vmatprep.subr.msk.bf16.mxu1 %vm119_vm1, %v114_v48  ;;  %2121 = vrot.lane.b32.xlu0 %v5869_v16, %s5730_s11 }
  0x88   :  { %v326_v50 = vpop.permute.xlu1 %325  ;;  %274 = vmatpush1.bf16.msra.mxu1 %v139_v49  ;;  %5146 = vmatmul.mubr.msk.bf16.vlgmr.msra.gmra.mrb[4].mxu0 %vm115_vm2, %v5668_v36 }
  0x89   :  { %v324_v51 = vpop.permute.xlu0 %323  ;;  %407 = vmatprep.mubr.bf16.mxu0 %v5723_v8 }
  0x8a   :  { %2127 = vrot.lane.b32.xlu1 %v5906_v25, %s5730_s11  ;;  %v340_v52 = vsel %vm339_vm3, %v322_v45, %v324_v51  ;;  %v341_v53 = vsel %vm339_vm3, %v324_v51, %v326_v50  ;;  %v5184_v51 = vcombine.high %v5846_v10, %v1051_v47 }
  0x8b   :  { %5150 = vmatprep.subr.msk.bf16.mxu0 %vm119_vm1, %v341_v53  ;;  %v352_v54 = vsel %vm119_vm1, %v340_v52, 0  ;;  %2125 = vrot.lane.b32.xlu0 %v5884_v20, %s5730_s11  ;;  %v5183_v52 = vcombine.low %v5846_v10, %v1051_v47 }
  0x8c   :  { %v330_v55 = vpop.permute.xlu1 %329  ;;  %376 = vmatpush1.bf16.msra.mxu0 %v352_v54  ;;  %5148 = vmatmul.mubr.msk.bf16.vlgmr.msra.gmra.mrb[4].mxu1 %vm115_vm2, %v5668_v36 }
  0x8d   :  { %v328_v57 = vpop.permute.xlu0 %327  ;;  %450 = vmatprep.mubr.bf16.mxu1 %v5723_v8 }
  0x8e   :  { %2131 = vrot.lane.b32.xlu1 %v5915_v26, %s5730_s11  ;;  %v342_v58 = vsel %vm339_vm3, %v326_v50, %v328_v57  ;;  %v343_v59 = vsel %vm339_vm3, %v328_v57, %v330_v55 }
  0x8f   :  { %5152 = vmatprep.subr.msk.bf16.mxu1 %vm119_vm1, %v343_v59  ;;  %v358_v60 = vsel %vm119_vm1, %v342_v58, 0  ;;  %2129 = vrot.lane.b32.xlu0 %v5901_v24, %s5730_s11  ;;  %v1053_v58 = vld [vmem:[%s7265_s0 + $0x3c] sm:$0x11]  ;;  %v1099_v59 = vsel %vm119_vm1, %v5183_v52, 0 }
  0x90   :  { %v334_v61 = vpop.permute.xlu1 %333  ;;  %419 = vmatpush1.bf16.msra.mxu1 %v358_v60  ;;  %5151 = vmatmul.mubr.msk.bf16.vlgmr.msra.gmra.mrb[0].mxu0 %vm115_vm2, %v5669_v56 }
  0x91   :  { %v332_v0 = vpop.permute.xlu0 %331  ;;  %493 = vmatprep.mubr.bf16.mxu0 %v5723_v8 }
  0x92   :  { %2366 = vperm.xlu1 %5645, %v2358_v62   ;;  %v344_v1 = vsel %vm339_vm3, %v330_v55, %v332_v0  ;;  %v345_v2 = vsel %vm339_vm3, %v332_v0, %v334_v61  ;;  %v1052_v55 = vld [vmem:[%s7265_s0 + $0x34] sm:$0x11]  ;;  %v5188_v0 = vcombine.high %v5874_v17, %v1053_v58 }
  0x93   :  { %5154 = vmatprep.subr.msk.bf16.mxu0 %vm119_vm1, %v345_v2  ;;  %v364_v3 = vsel %vm119_vm1, %v344_v1, 0  ;;  %2361 = vperm.xlu0 %5644, %v2357_v63   ;;  %v5186_v60 = vcombine.high %v5859_v13, %v1052_v55  ;;  %v1054_v1 = vld [vmem:[%s7265_s0 + $0x44] sm:$0x11] }
  0x94   :  { %v338_v4 = vpop.permute.xlu1 %337  ;;  %462 = vmatpush1.bf16.msra.mxu0 %v364_v3  ;;  %5153 = vmatmul.mubr.msk.bf16.vlgmr.msra.gmra.mrb[0].mxu1 %vm115_vm2, %v5669_v56 }
  0x95   :  { %v336_v5 = vpop.permute.xlu0 %335  ;;  %536 = vmatprep.mubr.bf16.mxu1 %v5723_v8 }
  0x96   :  { %2513 = vrot.lane.b32.xlu1 %v5723_v8, %s5722_s29  ;;  %v346_v6 = vsel %vm339_vm3, %v334_v61, %v336_v5  ;;  %v347_v7 = vsel %vm339_vm3, %v336_v5, %v338_v4  ;;  %v5185_v61 = vcombine.low %v5859_v13, %v1052_v55  ;;  %v5187_v5 = vcombine.low %v5874_v17, %v1053_v58 }
  0x97   :  { %5156 = vmatprep.subr.msk.bf16.mxu1 %vm119_vm1, %v347_v7  ;;  %v370_v9 = vsel %vm119_vm1, %v346_v6, 0  ;;  %v5190_v6 = vcombine.high %v5889_v21, %v1054_v1  ;;  %v5674_v7 = vld [vmem:[%s7266_s1 + $0x20] sm:$0xff]   ;;  %v5189_v17 = vcombine.low %v5889_v21, %v1054_v1 }
  0x98   :  { %v558_v11 = vpop.permute.xlu1 %557  ;;  %505 = vmatpush1.bf16.msra.mxu1 %v370_v9  ;;  %5155 = vmatmul.mubr.msk.bf16.vlgmr.msra.gmra.mrb[4].mxu0 %vm115_vm2, %v5669_v56  ;;  %v1105_v4 = vsel %vm119_vm1, %v5185_v61, 0 }
  0x99   :  { %v556_v12 = vpop.permute.xlu0 %555  ;;  %641 = vmatprep.mubr.bf16.mxu0 %v5723_v8 }
  0x9a   :  { %v574_v15 = vsel %vm573_vm4, %v556_v12, %v558_v11  ;;  %v1111_v12 = vsel %vm119_vm1, %v5187_v5, 0 }
  0x9b   :  { %v586_v19 = vsel %vm119_vm1, %v574_v15, 0 }
  0x9c   :  { %v562_v14 = vpop.permute.xlu1 %561  ;;  %5157 = vmatmul.mubr.msk.bf16.vlgmr.msra.gmra.mrb[4].mxu1 %vm115_vm2, %v5669_v56 }
  0x9d   :  { %v560_v16 = vpop.permute.xlu0 %559  ;;  %684 = vmatprep.mubr.bf16.mxu1 %v5723_v8 }
  0x9e   :  { %v575_v18 = vsel %vm573_vm4, %v558_v11, %v560_v16  ;;  %v576_v23 = vsel %vm573_vm4, %v560_v16, %v562_v14 }
  0x9f   :  { %5161 = vmatprep.subr.msk.bf16.mxu0 %vm119_vm1, %v575_v18  ;;  %v592_v26 = vsel %vm119_vm1, %v576_v23, 0  ;;  %v1117_v18 = vsel %vm119_vm1, %v5189_v17, 0 }
  0xa0   :  { %v566_v20 = vpop.permute.xlu1 %565  ;;  %610 = vmatpush1.bf16.msra.mxu0 %v586_v19 }
  0xa1   :  { %v564_v24 = vpop.permute.xlu0 %563 }
  0xa2   :  { %v577_v25 = vsel %vm573_vm4, %v562_v14, %v564_v24  ;;  %v578_v28 = vsel %vm573_vm4, %v564_v24, %v566_v20 }
  0xa3   :  { %5162 = vmatmul.mubr.msk.bf16.vlgmr.msra.gmra.mrb[0].mxu0 %vm115_vm2, %v5670_v22  ;;  %5163 = vmatprep.subr.msk.bf16.mxu1 %vm119_vm1, %v577_v25  ;;  %v598_v31 = vsel %vm119_vm1, %v578_v28, 0 }
  0xa4   :  { %v570_v27 = vpop.permute.xlu1 %569  ;;  %653 = vmatpush1.bf16.msra.mxu1 %v592_v26  ;;  %727 = vmatprep.mubr.bf16.mxu0 %v5723_v8 }
  0xa5   :  { %v568_v29 = vpop.permute.xlu0 %567 }
  0xa6   :  { %v579_v30 = vsel %vm573_vm4, %v566_v20, %v568_v29  ;;  %v580_v33 = vsel %vm573_vm4, %v568_v29, %v570_v27 }
  0xa7   :  { %5164 = vmatmul.mubr.msk.bf16.vlgmr.msra.gmra.mrb[0].mxu1 %vm115_vm2, %v5670_v22  ;;  %5165 = vmatprep.subr.msk.bf16.mxu0 %vm119_vm1, %v579_v30  ;;  %v604_v36 = vsel %vm119_vm1, %v580_v33, 0  ;;  %v5681_v30 = vld [vmem:[%s7266_s1 + $0x28] sm:$0xff]  }
  0xa8   :  { %v806_v32 = vpop.permute.xlu1 %805  ;;  %696 = vmatpush1.bf16.msra.mxu0 %v598_v31  ;;  %770 = vmatprep.mubr.bf16.mxu1 %v5723_v8 }
  0xa9   :  { %v572_v34 = vpop.permute.xlu0 %571 }
  0xaa   :  { %v581_v35 = vsel %vm573_vm4, %v570_v27, %v572_v34 }
  0xab   :  { %5166 = vmatmul.mubr.msk.bf16.vlgmr.msra.gmra.mrb[4].mxu0 %vm115_vm2, %v5670_v22  ;;  %5167 = vmatprep.subr.msk.bf16.mxu1 %vm119_vm1, %v581_v35 }
  0xac   :  { %v810_v37 = vpop.permute.xlu1 %809  ;;  %739 = vmatpush1.bf16.msra.mxu1 %v604_v36  ;;  %891 = vmatprep.mubr.bf16.mxu0 %v5723_v8 }
  0xad   :  { %v808_v38 = vpop.permute.xlu0 %807 }
  0xae   :  { %v824_v39 = vsel %vm823_vm5, %v806_v32, %v808_v38  ;;  %v825_v40 = vsel %vm823_vm5, %v808_v38, %v810_v37 }
  0xaf   :  { %5168 = vmatmul.mubr.msk.bf16.vlgmr.msra.gmra.mrb[4].mxu1 %vm115_vm2, %v5670_v22  ;;  %5172 = vmatprep.subr.msk.bf16.mxu0 %vm119_vm1, %v825_v40  ;;  %v836_v41 = vsel %vm119_vm1, %v824_v39, 0 }
  0xb0   :  { %v814_v42 = vpop.permute.xlu1 %813  ;;  %860 = vmatpush1.bf16.msra.mxu0 %v836_v41  ;;  %934 = vmatprep.mubr.bf16.mxu1 %v5723_v8 }
  0xb1   :  { %v812_v44 = vpop.permute.xlu0 %811 }
  0xb2   :  { %v826_v45 = vsel %vm823_vm5, %v810_v37, %v812_v44  ;;  %v827_v46 = vsel %vm823_vm5, %v812_v44, %v814_v42 }
  0xb3   :  { %5173 = vmatmul.mubr.msk.bf16.vlgmr.msra.gmra.mrb[0].mxu0 %vm115_vm2, %v5671_v43  ;;  %5174 = vmatprep.subr.msk.bf16.mxu1 %vm119_vm1, %v827_v46  ;;  %v842_v48 = vsel %vm119_vm1, %v826_v45, 0 }
  0xb4   :  { %v818_v49 = vpop.permute.xlu1 %817  ;;  %903 = vmatpush1.bf16.msra.mxu1 %v842_v48  ;;  %977 = vmatprep.mubr.bf16.mxu0 %v5723_v8 }
  0xb5   :  { %v816_v50 = vpop.permute.xlu0 %815 }
  0xb6   :  { %v828_v53 = vsel %vm823_vm5, %v814_v42, %v816_v50  ;;  %v829_v54 = vsel %vm823_vm5, %v816_v50, %v818_v49 }
  0xb7   :  { %5175 = vmatmul.mubr.msk.bf16.vlgmr.msra.gmra.mrb[0].mxu1 %vm115_vm2, %v5671_v43  ;;  %5176 = vmatprep.subr.msk.bf16.mxu0 %vm119_vm1, %v829_v54  ;;  %v848_v56 = vsel %vm119_vm1, %v828_v53, 0 }
  0xb8   :  { %v822_v57 = vpop.permute.xlu1 %821  ;;  %946 = vmatpush1.bf16.msra.mxu0 %v848_v56  ;;  %1020 = vmatprep.mubr.bf16.mxu1 %v5723_v8 }
  0xb9   :  { %v820_v10 = vpop.permute.xlu0 %819  ;;  %5191 = vmatprep.subr.msk.bf16.mxu0 %vm119_vm1, %v5184_v51  ;;  %v5682_v51 = vld [vmem:[%s7266_s1 + $0x30] sm:$0xff]  }
  0xba   :  { %v830_v62 = vsel %vm823_vm5, %v818_v49, %v820_v10  ;;  %v831_v63 = vsel %vm823_vm5, %v820_v10, %v822_v57 }
  0xbb   :  { %5177 = vmatmul.mubr.msk.bf16.vlgmr.msra.gmra.mrb[4].mxu0 %vm115_vm2, %v5671_v43  ;;  %5178 = vmatprep.subr.msk.bf16.mxu1 %vm119_vm1, %v831_v63  ;;  %v854_v2 = vsel %vm119_vm1, %v830_v62, 0 }
  0xbc   :  { %v1368_v3 = vpop.permute.xlu1 %1367  ;;  %989 = vmatpush1.bf16.msra.mxu1 %v854_v2  ;;  %1123 = vmatpush1.bf16.msra.mxu0 %v1099_v59 }
  0xbd   :  { %v1366_v13 = vpop.permute.xlu0 %1365  ;;  %1154 = vmatprep.mubr.bf16.mxu0 %v5723_v8  ;;  %5193 = vmatprep.subr.msk.bf16.mxu1 %vm119_vm1, %v5186_v60 }
  0xbe   :  { %5195 = vmatprep.subr.msk.bf16.mxu0 %vm119_vm1, %v5188_v0  ;;  %v1384_v21 = vsel %vm1383_vm6, %v1366_v13, %v1368_v3 }
  0xbf   :  { %5179 = vmatmul.mubr.msk.bf16.vlgmr.msra.gmra.mrb[4].mxu1 %vm115_vm2, %v5671_v43  ;;  %v1396_v24 = vsel %vm119_vm1, %v1384_v21, 0 }
  0xc0   :  { %v1372_v9 = vpop.permute.xlu1 %1371  ;;  %1166 = vmatpush1.bf16.msra.mxu1 %v1105_v4  ;;  %1197 = vmatprep.mubr.bf16.mxu1 %v5723_v8 }
  0xc1   :  { %v1370_v11 = vpop.permute.xlu0 %1369  ;;  %5197 = vmatprep.subr.msk.bf16.mxu1 %vm119_vm1, %v5190_v6  ;;  %v5683_v6 = vld [vmem:[%s7266_s1 + $0x38] sm:$0xff]  }
  0xc2   :  { %v1385_v14 = vsel %vm1383_vm6, %v1368_v3, %v1370_v11  ;;  %v1386_v26 = vsel %vm1383_vm6, %v1370_v11, %v1372_v9 }
  0xc3   :  { %5192 = vmatmul.mubr.msk.bf16.vlgmr.msra.gmra.mrb[0].mxu0 %vm115_vm2, %v5674_v7  ;;  %v1402_v29 = vsel %vm119_vm1, %v1386_v26, 0 }
  0xc4   :  { %v1376_v15 = vpop.permute.xlu1 %1375  ;;  %1209 = vmatpush1.bf16.msra.mxu0 %v1111_v12  ;;  %1240 = vmatprep.mubr.bf16.mxu0 %v5723_v8 }
  0xc5   :  { %5211 = vmatprep.subr.msk.bf16.mxu0 %vm119_vm1, %v1385_v14  ;;  %v1374_v16 = vpop.permute.xlu0 %1373 }
  0xc6   :  { %v1387_v19 = vsel %vm1383_vm6, %v1372_v9, %v1374_v16  ;;  %v1388_v32 = vsel %vm1383_vm6, %v1374_v16, %v1376_v15 }
  0xc7   :  { %5194 = vmatmul.mubr.msk.bf16.vlgmr.msra.gmra.mrb[0].mxu1 %vm115_vm2, %v5674_v7  ;;  %v1408_v35 = vsel %vm119_vm1, %v1388_v32, 0 }
  0xc8   :  { %v1380_v20 = vpop.permute.xlu1 %1379  ;;  %1252 = vmatpush1.bf16.msra.mxu1 %v1117_v18  ;;  %1283 = vmatprep.mubr.bf16.mxu1 %v5723_v8 }
  0xc9   :  { %5213 = vmatprep.subr.msk.bf16.mxu1 %vm119_vm1, %v1387_v19  ;;  %v1378_v22 = vpop.permute.xlu0 %1377 }
  0xca   :  { %v1389_v23 = vsel %vm1383_vm6, %v1376_v15, %v1378_v22  ;;  %v1390_v37 = vsel %vm1383_vm6, %v1378_v22, %v1380_v20 }
  0xcb   :  { %5196 = vmatmul.mubr.msk.bf16.vlgmr.msra.gmra.mrb[4].mxu0 %vm115_vm2, %v5674_v7  ;;  %v1414_v40 = vsel %vm119_vm1, %v1390_v37, 0  ;;  %v7274_v37 = vlaneseq }
  0xcc   :  { %v1616_v25 = vpop.permute.xlu1 %1615  ;;  %1420 = vmatpush1.bf16.msra.mxu0 %v1396_v24  ;;  %1451 = vmatprep.mubr.bf16.mxu0 %v5723_v8 }
  0xcd   :  { %5215 = vmatprep.subr.msk.bf16.mxu0 %vm119_vm1, %v1389_v23  ;;  %v1382_v27 = vpop.permute.xlu0 %1381 }
  0xce   :  { %v1391_v28 = vsel %vm1383_vm6, %v1380_v20, %v1382_v27 }
  0xcf   :  { %5198 = vmatmul.mubr.msk.bf16.vlgmr.msra.gmra.mrb[4].mxu1 %vm115_vm2, %v5674_v7 }
  0xd0   :  { %v1620_v31 = vpop.permute.xlu1 %1619  ;;  %1463 = vmatpush1.bf16.msra.mxu1 %v1402_v29  ;;  %1494 = vmatprep.mubr.bf16.mxu1 %v5723_v8 }
  0xd1   :  { %5217 = vmatprep.subr.msk.bf16.mxu1 %vm119_vm1, %v1391_v28  ;;  %v1618_v33 = vpop.permute.xlu0 %1617 }
  0xd2   :  { %v1635_v34 = vsel %vm1633_vm7, %v1618_v33, %v1620_v31  ;;  %v1634_v42 = vsel %vm1633_vm7, %v1616_v25, %v1618_v33 }
  0xd3   :  { %5212 = vmatmul.mubr.msk.bf16.vlgmr.msra.gmra.mrb[0].mxu0 %vm115_vm2, %v5681_v30  ;;  %v1646_v45 = vsel %vm119_vm1, %v1634_v42, 0  ;;  %v6239_v42 = vld [vmem:[%s7272_s7] sm:$0xff] }
  0xd4   :  { %v1624_v36 = vpop.permute.xlu1 %1623  ;;  %1506 = vmatpush1.bf16.msra.mxu0 %v1408_v35  ;;  %1537 = vmatprep.mubr.bf16.mxu0 %v5723_v8 }
  0xd5   :  { %v1622_v38 = vpop.permute.xlu0 %1621  ;;  %5222 = vmatprep.subr.msk.bf16.mxu0 %vm119_vm1, %v1635_v34 }
  0xd6   :  { %v1637_v39 = vsel %vm1633_vm7, %v1622_v38, %v1624_v36  ;;  %v1636_v47 = vsel %vm1633_vm7, %v1620_v31, %v1622_v38  ;;  %v6231_v38 = vshrl.u32 %v7274_v37, 7 }
  0xd7   :  { %5214 = vmatmul.mubr.msk.bf16.vlgmr.msra.gmra.mrb[0].mxu1 %vm115_vm2, %v5681_v30  ;;  %v1652_v50 = vsel %vm119_vm1, %v1636_v47, 0 }
  0xd8   :  { %v1628_v41 = vpop.permute.xlu1 %1627  ;;  %1549 = vmatpush1.bf16.msra.mxu1 %v1414_v40  ;;  %1580 = vmatprep.mubr.bf16.mxu1 %v5723_v8  ;;  %7301 = vst [vmem:[#allocation6_spill] sm:$0xff] %v6231_v38  ;;  %v2405_v40 = vsub.s32 0, %v6231_v38  ;;  %v2413_v47 = vsub.s32 2, %v6231_v38 }
  0xd9   :  { %v1626_v43 = vpop.permute.xlu0 %1625  ;;  %5224 = vmatprep.subr.msk.bf16.mxu1 %vm119_vm1, %v1637_v39 }
  0xda   :  { %v1639_v44 = vsel %vm1633_vm7, %v1626_v43, %v1628_v41  ;;  %v1638_v53 = vsel %vm1633_vm7, %v1624_v36, %v1626_v43  ;;  %v2409_v43 = vsub.s32 1, %v6231_v38 }
  0xdb   :  { %5216 = vmatmul.mubr.msk.bf16.vlgmr.msra.gmra.mrb[4].mxu0 %vm115_vm2, %v5681_v30  ;;  %v1658_v55 = vsel %vm119_vm1, %v1638_v53, 0 }
  0xdc   :  { %v1632_v46 = vpop.permute.xlu1 %1631  ;;  %1670 = vmatpush1.bf16.msra.mxu0 %v1646_v45  ;;  %1701 = vmatprep.mubr.bf16.mxu0 %v5723_v8 }
  0xdd   :  { %v1630_v48 = vpop.permute.xlu0 %1629  ;;  %5226 = vmatprep.subr.msk.bf16.mxu0 %vm119_vm1, %v1639_v44 }
  0xde   :  { %v1641_v49 = vsel %vm1633_vm7, %v1630_v48, %v1632_v46  ;;  %v1640_v57 = vsel %vm1633_vm7, %v1628_v41, %v1630_v48  ;;  %v2417_v48 = vsub.s32 3, %v6231_v38 }
  0xdf   :  { %5218 = vmatmul.mubr.msk.bf16.vlgmr.msra.gmra.mrb[4].mxu1 %vm115_vm2, %v5681_v30  ;;  %v1664_v60 = vsel %vm119_vm1, %v1640_v57, 0  ;;  %v5684_v30 = vld [vmem:[%s7266_s1 + $0x40] sm:$0xff]  }
  0xe0   :  { %v1868_v52 = vpop.permute.xlu1 %1867  ;;  %1713 = vmatpush1.bf16.msra.mxu1 %v1652_v50  ;;  %1744 = vmatprep.mubr.bf16.mxu1 %v5723_v8 }
  0xe1   :  { %v1866_v54 = vpop.permute.xlu0 %1865  ;;  %5228 = vmatprep.subr.msk.bf16.mxu1 %vm119_vm1, %v1641_v49 }
  0xe2   :  { %v1884_v10 = vsel %vm1883_vm8, %v1866_v54, %v1868_v52 }
  0xe3   :  { %5223 = vmatmul.mubr.msk.bf16.vlgmr.msra.gmra.mrb[0].mxu0 %vm115_vm2, %v5682_v51  ;;  %v1896_v62 = vsel %vm119_vm1, %v1884_v10, 0 }
  0xe4   :  { %v1872_v56 = vpop.permute.xlu1 %1871  ;;  %1756 = vmatpush1.bf16.msra.mxu0 %v1658_v55  ;;  %1787 = vmatprep.mubr.bf16.mxu0 %v5723_v8  ;;  %v2406_v55 = vrot.slane %v6239_v42, %v2405_v40 }
  0xe5   :  { %v1870_v58 = vpop.permute.xlu0 %1869 }
  0xe6   :  { %v1885_v59 = vsel %vm1883_vm8, %v1868_v52, %v1870_v58  ;;  %v1886_v0 = vsel %vm1883_vm8, %v1870_v58, %v1872_v56  ;;  %v2425_v52 = vsub.s32 5, %v6231_v38  ;;  %v2410_v58 = vrot.slane %v6239_v42, %v2409_v43 }
  0xe7   :  { %5225 = vmatmul.mubr.msk.bf16.vlgmr.msra.gmra.mrb[0].mxu1 %vm115_vm2, %v5682_v51  ;;  %5233 = vmatprep.subr.msk.bf16.mxu0 %vm119_vm1, %v1885_v59  ;;  %v1902_v3 = vsel %vm119_vm1, %v1886_v0, 0  ;;  %v2418_v0 = vrot.slane %v6239_v42, %v2417_v48 }
  0xe8   :  { %v1876_v61 = vpop.permute.xlu1 %1875  ;;  %1799 = vmatpush1.bf16.msra.mxu1 %v1664_v60  ;;  %1830 = vmatprep.mubr.bf16.mxu1 %v5723_v8 }
  0xe9   :  { %v1874_v63 = vpop.permute.xlu0 %1873 }
  0xea   :  { %v1887_v1 = vsel %vm1883_vm8, %v1872_v56, %v1874_v63  ;;  %v1888_v4 = vsel %vm1883_vm8, %v1874_v63, %v1876_v61 }
  0xeb   :  { %5227 = vmatmul.mubr.msk.bf16.vlgmr.msra.gmra.mrb[4].mxu0 %vm115_vm2, %v5682_v51  ;;  %5235 = vmatprep.subr.msk.bf16.mxu1 %vm119_vm1, %v1887_v1  ;;  %v1908_v9 = vsel %vm119_vm1, %v1888_v4, 0  ;;  %v2426_v4 = vrot.slane %v6239_v42, %v2425_v52 }
  0xec   :  { %v1880_v2 = vpop.permute.xlu1 %1879  ;;  %1920 = vmatpush1.bf16.msra.mxu0 %v1896_v62  ;;  %1951 = vmatprep.mubr.bf16.mxu0 %v5723_v8  ;;  %v2414_v62 = vrot.slane %v6239_v42, %v2413_v47 }
  0xed   :  { %v1878_v13 = vpop.permute.xlu0 %1877 }
  0xee   :  { %v1889_v5 = vsel %vm1883_vm8, %v1876_v61, %v1878_v13  ;;  %v1890_v12 = vsel %vm1883_vm8, %v1878_v13, %v1880_v2 }
  0xef   :  { %5229 = vmatmul.mubr.msk.bf16.vlgmr.msra.gmra.mrb[4].mxu1 %vm115_vm2, %v5682_v51  ;;  %5237 = vmatprep.subr.msk.bf16.mxu0 %vm119_vm1, %v1889_v5  ;;  %v1914_v15 = vsel %vm119_vm1, %v1890_v12, 0  ;;  %v2421_v51 = vsub.s32 4, %v6231_v38 }
  0xf0   :  { %v2116_v7 = vpop.permute.xlu1 %2115  ;;  %1963 = vmatpush1.bf16.msra.mxu1 %v1902_v3  ;;  %1994 = vmatprep.mubr.bf16.mxu1 %v5723_v8 }
  0xf1   :  { %v1882_v11 = vpop.permute.xlu0 %1881  ;;  %v2422_v13 = vrot.slane %v6239_v42, %v2421_v51 }
  0xf2   :  { %v1891_v17 = vsel %vm1883_vm8, %v1880_v2, %v1882_v11 }
  0xf3   :  { %5234 = vmatmul.mubr.msk.bf16.vlgmr.msra.gmra.mrb[0].mxu0 %vm115_vm2, %v5683_v6  ;;  %5239 = vmatprep.subr.msk.bf16.mxu1 %vm119_vm1, %v1891_v17 }
  0xf4   :  { %v2120_v14 = vpop.permute.xlu1 %2119  ;;  %2006 = vmatpush1.bf16.msra.mxu0 %v1908_v9  ;;  %2037 = vmatprep.mubr.bf16.mxu0 %v5723_v8 }
  0xf5   :  { %v2118_v16 = vpop.permute.xlu0 %2117 }
  0xf6   :  { %v2134_v18 = vsel %vm2133_vm9, %v2116_v7, %v2118_v16  ;;  %v2135_v19 = vsel %vm2133_vm9, %v2118_v16, %v2120_v14 }
  0xf7   :  { %5236 = vmatmul.mubr.msk.bf16.vlgmr.msra.gmra.mrb[0].mxu1 %vm115_vm2, %v5683_v6  ;;  %5244 = vmatprep.subr.msk.bf16.mxu0 %vm119_vm1, %v2135_v19  ;;  %v2146_v21 = vsel %vm119_vm1, %v2134_v18, 0 }
  0xf8   :  { %v2124_v20 = vpop.permute.xlu1 %2123  ;;  %2049 = vmatpush1.bf16.msra.mxu1 %v1914_v15  ;;  %2080 = vmatprep.mubr.bf16.mxu1 %v5723_v8 }
  0xf9   :  { %v2122_v22 = vpop.permute.xlu0 %2121 }
  0xfa   :  { %v2136_v23 = vsel %vm2133_vm9, %v2120_v14, %v2122_v22  ;;  %v2137_v24 = vsel %vm2133_vm9, %v2122_v22, %v2124_v20  ;;  %v2429_v22 = vsub.s32 6, %v6231_v38 }
  0xfb   :  { %5238 = vmatmul.mubr.msk.bf16.vlgmr.msra.gmra.mrb[4].mxu0 %vm115_vm2, %v5683_v6  ;;  %5246 = vmatprep.subr.msk.bf16.mxu1 %vm119_vm1, %v2137_v24  ;;  %v2152_v26 = vsel %vm119_vm1, %v2136_v23, 0 }
  0xfc   :  { %v2128_v25 = vpop.permute.xlu1 %2127  ;;  %2170 = vmatpush1.bf16.msra.mxu0 %v2146_v21  ;;  %2201 = vmatprep.mubr.bf16.mxu0 %v5723_v8 }
  0xfd   :  { %v2126_v27 = vpop.permute.xlu0 %2125 }
  0xfe   :  { %v2138_v28 = vsel %vm2133_vm9, %v2124_v20, %v2126_v27  ;;  %v2139_v29 = vsel %vm2133_vm9, %v2126_v27, %v2128_v25  ;;  %v2433_v27 = vsub.s32 7, %v6231_v38  ;;  %v6876_v38 = vld [vmem:[%s7270_s5 + $0x140] sm:$0xff] }
  0xff   :  { %5240 = vmatmul.mubr.msk.bf16.vlgmr.msra.gmra.mrb[4].mxu1 %vm115_vm2, %v5683_v6  ;;  %5248 = vmatprep.subr.msk.bf16.mxu0 %vm119_vm1, %v2139_v29  ;;  %v2158_v32 = vsel %vm119_vm1, %v2138_v28, 0  ;;  %7312 = vst [vmem:[#allocation17_spill] sm:$0xff] %v6876_v38 }
 0x100   :  { %v2132_v31 = vpop.permute.xlu1 %2131  ;;  %2213 = vmatpush1.bf16.msra.mxu1 %v2152_v26  ;;  %2244 = vmatprep.mubr.bf16.mxu1 %v5723_v8  ;;  %v2434_v51 = vrot.slane %v6239_v42, %v2433_v27 }
 0x101   :  { %v2130_v33 = vpop.permute.xlu0 %2129 }
 0x102   :  { %v2140_v34 = vsel %vm2133_vm9, %v2128_v25, %v2130_v33  ;;  %v2141_v35 = vsel %vm2133_vm9, %v2130_v33, %v2132_v31 }
 0x103   :  { %5245 = vmatmul.mubr.msk.bf16.vlgmr.msra.gmra.mrb[0].mxu0 %vm115_vm2, %v5684_v30  ;;  %5250 = vmatprep.subr.msk.bf16.mxu1 %vm119_vm1, %v2141_v35  ;;  %v2164_v36 = vsel %vm119_vm1, %v2140_v34, 0 }
 0x104   :  { %2256 = vmatpush1.bf16.msra.mxu0 %v2158_v32  ;;  %2287 = vmatprep.mubr.bf16.mxu0 %v5723_v8 }
 0x107   :  { %5247 = vmatmul.mubr.msk.bf16.vlgmr.msra.gmra.mrb[0].mxu1 %vm115_vm2, %v5684_v30 }
 0x108   :  { %2299 = vmatpush1.bf16.msra.mxu1 %v2164_v36  ;;  %2330 = vmatprep.mubr.bf16.mxu1 %v5723_v8 }
 0x10b   :  { %5249 = vmatmul.mubr.msk.bf16.vlgmr.msra.gmra.mrb[4].mxu0 %vm115_vm2, %v5684_v30 }
 0x10c   :  { %2583 = vmatprep.mubr.bf16.mxu0 %v5723_v8 }
 0x10f   :  { %5251 = vmatmul.mubr.msk.bf16.vlgmr.msra.gmra.mrb[4].mxu1 %vm115_vm2, %v5684_v30 }
 0x110   :  { %2626 = vmatprep.mubr.bf16.mxu1 %v5723_v8 }
 0x111   :  { %v6242_v44 = vpop.permute.xlu1 %2366 }
 0x112   :  { %v6233_v39 = vpop.permute.xlu0 %2361 }
 0x1d6   :  { %v2203_v41 = vpop.f32.mrb[0].mxu0 }
 0x1d7   :  { %v2205_v45 = vpop.f32.mrb[1].mxu0  ;;  %v2369_v46 = vadd.f32 %v6233_v39, %v2203_v41 }
 0x1d8   :  { %v2370_v49 = vadd.f32 %v6233_v39, %v2205_v45  ;;  %v2207_v50 = vpop.f32.mrb[2].mxu0 }
 0x1d9   :  { %v2377_v53 = vadd.f32 %v6242_v44, %v2207_v50  ;;  %v2385_v54 = vmax.f32 %v2369_v46, 0.0  ;;  %v2209_v56 = vpop.f32.mrb[3].mxu0  ;;  %v2430_v46 = vrot.slane %v6239_v42, %v2429_v22 }
 0x1da   :  { %v2386_v57 = vmax.f32 %v2370_v49, 0.0  ;;  %v2378_v10 = vadd.f32 %v6242_v44, %v2209_v56  ;;  %v2246_v59 = vpop.f32.mrb[0].mxu1 }
 0x1db   :  { %v2393_v60 = vmax.f32 %v2377_v53, 0.0  ;;  %v2371_v61 = vadd.f32 %v6233_v39, %v2246_v59  ;;  %v2248_v63 = vpop.f32.mrb[1].mxu1  ;;  %v2443_v5 = vmul.f32 %v2406_v55, %v2385_v54 }
 0x1dc   :  { %v2394_v1 = vmax.f32 %v2378_v10, 0.0  ;;  %v2372_v2 = vadd.f32 %v6233_v39, %v2248_v63  ;;  %v2250_v3 = vpop.f32.mrb[2].mxu1  ;;  %v2444_v12 = vmul.f32 %v2410_v58, %v2386_v57 }
 0x1dd   :  { %v2451_v6 = vmul.f32 %v2406_v55, %v2393_v60  ;;  %v2387_v7 = vmax.f32 %v2371_v61, 0.0  ;;  %v2379_v9 = vadd.f32 %v6242_v44, %v2250_v3  ;;  %v2252_v11 = vpop.f32.mrb[3].mxu1 }
 0x1de   :  { %v2452_v17 = vmul.f32 %v2410_v58, %v2394_v1  ;;  %v2388_v14 = vmax.f32 %v2372_v2, 0.0  ;;  %v2380_v15 = vadd.f32 %v6242_v44, %v2252_v11  ;;  %v2289_v16 = vpop.f32.mrb[4].mxu0 }
 0x1df   :  { %v6262_v18 = vpack.c.bf16 %v2451_v6, %v2443_v5  ;;  %v2395_v19 = vmax.f32 %v2379_v9, 0.0  ;;  %v2373_v20 = vadd.f32 %v6233_v39, %v2289_v16  ;;  %v2291_v21 = vpop.f32.mrb[5].mxu0  ;;  %v2445_v28 = vmul.f32 %v2414_v62, %v2387_v7 }
 0x1e0   :  { %v6266_v23 = vpack.c.bf16 %v2452_v17, %v2444_v12  ;;  %v2396_v24 = vmax.f32 %v2380_v15, 0.0  ;;  %v2374_v25 = vadd.f32 %v6233_v39, %v2291_v21  ;;  %v2293_v26 = vpop.f32.mrb[6].mxu0  ;;  %v2446_v33 = vmul.f32 %v2418_v0, %v2388_v14 }
 0x1e1   :  { %v2453_v29 = vmul.f32 %v2414_v62, %v2395_v19  ;;  %v2389_v30 = vmax.f32 %v2373_v20, 0.0  ;;  %v2381_v31 = vadd.f32 %v6242_v44, %v2293_v26  ;;  %v2295_v32 = vpop.f32.mrb[7].mxu0  ;;  %2515 = vrot.lane.b32.xlu1 %v6262_v18, %s5722_s29  ;;  %v5685_v19 = vld [vmem:[%s7268_s3 + $0x8] sm:$0xff]  }
 0x1e2   :  { %v2454_v34 = vmul.f32 %v2418_v0, %v2396_v24  ;;  %v2390_v35 = vmax.f32 %v2374_v25, 0.0  ;;  %v2382_v36 = vadd.f32 %v6242_v44, %v2295_v32  ;;  %v2332_v40 = vpop.f32.mrb[4].mxu1 }
 0x1e3   :  { %v6274_v41 = vpack.c.bf16 %v2453_v29, %v2445_v28  ;;  %v2397_v43 = vmax.f32 %v2381_v31, 0.0  ;;  %v2375_v45 = vadd.f32 %v6233_v39, %v2332_v40  ;;  %v2334_v47 = vpop.f32.mrb[5].mxu1  ;;  %v2447_v53 = vmul.f32 %v2422_v13, %v2389_v30  ;;  %v4552_v29 = vld [vmem:[%s7269_s4] sm:$0xff] }
 0x1e4   :  { %v6278_v48 = vpack.c.bf16 %v2454_v34, %v2446_v33  ;;  %v2398_v49 = vmax.f32 %v2382_v36, 0.0  ;;  %v2376_v50 = vadd.f32 %v6233_v39, %v2334_v47  ;;  %v2336_v52 = vpop.f32.mrb[6].mxu1  ;;  %v2448_v58 = vmul.f32 %v2426_v4, %v2390_v35 }
 0x1e5   :  { %v2455_v54 = vmul.f32 %v2422_v13, %v2397_v43  ;;  %v2391_v55 = vmax.f32 %v2375_v45, 0.0  ;;  %v2383_v56 = vadd.f32 %v6242_v44, %v2336_v52  ;;  %v2338_v57 = vpop.f32.mrb[7].mxu1  ;;  %2519 = vrot.lane.b32.xlu0 %v6274_v41, %s5722_s29  ;;  %v2514_v13 = vpop.permute.xlu1 %2513  ;;  %v4553_v43 = vld [vmem:[%s7269_s4 + $0x8] sm:$0xff]  ;;  %v5686_v45 = vld [vmem:[%s7268_s3] sm:$0xff]  }
 0x1e6   :  { %v2456_v10 = vmul.f32 %v2426_v4, %v2398_v49  ;;  %v2392_v59 = vmax.f32 %v2376_v50, 0.0  ;;  %v2384_v60 = vadd.f32 %v6242_v44, %v2338_v57  ;;  %2521 = vrot.lane.b32.xlu1 %v6278_v48, %s5722_s29 }
 0x1e7   :  { %v6288_v39 = vpack.c.bf16 %v2455_v54, %v2447_v53  ;;  %v2399_v42 = vmax.f32 %v2383_v56, 0.0  ;;  %v2449_v63 = vmul.f32 %v2430_v46, %v2391_v55 }
 0x1e8   :  { %v6290_v61 = vpack.c.bf16 %v2456_v10, %v2448_v58  ;;  %v2400_v62 = vmax.f32 %v2384_v60, 0.0  ;;  %v2450_v1 = vmul.f32 %v2434_v51, %v2392_v59 }
 0x1e9   :  { %v2457_v0 = vmul.f32 %v2430_v46, %v2399_v42  ;;  %2730 = vrot.lane.b32.xlu0 %v6262_v18, %s5724_s24 }
 0x1ea   :  { %v2458_v2 = vmul.f32 %v2434_v51, %v2400_v62  ;;  %2732 = vrot.lane.b32.xlu1 %v6266_v23, %s5724_s24  ;;  %v5687_v62 = vld [vmem:[%s7268_s3 + $0x10] sm:$0xff]  }
 0x1eb   :  { %v6296_v44 = vpack.c.bf16 %v2457_v0, %v2449_v63 }
 0x1ec   :  { %v6298_v3 = vpack.c.bf16 %v2458_v2, %v2450_v1 }
 0x1ed   :  { %2517 = vrot.lane.b32.xlu0 %v6266_v23, %s5722_s29 }
 0x1ee   :  { %2525 = vrot.lane.b32.xlu1 %v6290_v61, %s5722_s29 }
 0x1f1   :  { %2728 = vrot.lane.b32.xlu0 %v5723_v8, %s5724_s24 }
 0x1f2   :  { %2529 = vrot.lane.b32.xlu1 %v6298_v3, %s5722_s29 }
 0x1f5   :  { %2523 = vrot.lane.b32.xlu0 %v6288_v39, %s5722_s29 }
 0x1f6   :  { %2734 = vrot.lane.b32.xlu1 %v6274_v41, %s5724_s24 }
 0x1f9   :  { %2527 = vrot.lane.b32.xlu0 %v6296_v44, %s5722_s29 }
 0x1fa   :  { %2738 = vrot.lane.b32.xlu1 %v6288_v39, %s5724_s24 }
 0x1fd   :  { %2736 = vrot.lane.b32.xlu0 %v6278_v48, %s5724_s24 }
 0x1fe   :  { %2742 = vrot.lane.b32.xlu1 %v6296_v44, %s5724_s24 }
 0x201   :  { %2949 = vrot.lane.b32.xlu0 %v6266_v23, %s5725_s25 }
 0x202   :  { %2947 = vrot.lane.b32.xlu1 %v6262_v18, %s5725_s25 }
 0x205   :  { %2740 = vrot.lane.b32.xlu0 %v6290_v61, %s5724_s24 }
 0x206   :  { %2945 = vrot.lane.b32.xlu1 %v5723_v8, %s5725_s25 }
 0x209   :  { %2744 = vrot.lane.b32.xlu0 %v6298_v3, %s5724_s24 }
 0x20a   :  { %2953 = vrot.lane.b32.xlu1 %v6278_v48, %s5725_s25 }
 0x20d   :  { %2951 = vrot.lane.b32.xlu0 %v6274_v41, %s5725_s25 }
 0x20e   :  { %2957 = vrot.lane.b32.xlu1 %v6290_v61, %s5725_s25 }
 0x211   :  { %2955 = vrot.lane.b32.xlu0 %v6288_v39, %s5725_s25 }
 0x212   :  { %2961 = vrot.lane.b32.xlu1 %v6298_v3, %s5725_s25 }
 0x215   :  { %2959 = vrot.lane.b32.xlu0 %v6296_v44, %s5725_s25 }
 0x216   :  { %3182 = vrot.lane.b32.xlu1 %v6266_v23, %s5726_s26 }
 0x219   :  { %3180 = vrot.lane.b32.xlu0 %v6262_v18, %s5726_s26 }
 0x21a   :  { %3184 = vrot.lane.b32.xlu1 %v6274_v41, %s5726_s26 }
 0x21d   :  { %3178 = vrot.lane.b32.xlu0 %v5723_v8, %s5726_s26 }
 0x21e   :  { %3188 = vrot.lane.b32.xlu1 %v6288_v39, %s5726_s26 }
 0x221   :  { %3186 = vrot.lane.b32.xlu0 %v6278_v48, %s5726_s26 }
 0x222   :  { %3192 = vrot.lane.b32.xlu1 %v6296_v44, %s5726_s26 }
 0x225   :  { %3190 = vrot.lane.b32.xlu0 %v6290_v61, %s5726_s26 }
 0x226   :  { %3630 = vrot.lane.b32.xlu1 %v6266_v23, %s5727_s14 }
 0x229   :  { %3194 = vrot.lane.b32.xlu0 %v6298_v3, %s5726_s26 }
 0x22a   :  { %3628 = vrot.lane.b32.xlu1 %v6262_v18, %s5727_s14 }
 0x22d   :  { %3632 = vrot.lane.b32.xlu0 %v6274_v41, %s5727_s14 }
 0x22e   :  { %3636 = vrot.lane.b32.xlu1 %v6288_v39, %s5727_s14 }
 0x231   :  { %3634 = vrot.lane.b32.xlu0 %v6278_v48, %s5727_s14 }
 0x232   :  { %3640 = vrot.lane.b32.xlu1 %v6296_v44, %s5727_s14 }
 0x235   :  { %3863 = vrot.lane.b32.xlu0 %v6266_v23, %s5728_s28 }
 0x236   :  { %3644 = vrot.lane.b32.xlu1 %v5723_v8, %s5727_s14 }
 0x239   :  { %3861 = vrot.lane.b32.xlu0 %v6262_v18, %s5728_s28 }
 0x23a   :  { %3865 = vrot.lane.b32.xlu1 %v6274_v41, %s5728_s28 }
 0x23d   :  { %3638 = vrot.lane.b32.xlu0 %v6290_v61, %s5727_s14 }
 0x23e   :  { %3867 = vrot.lane.b32.xlu1 %v6278_v48, %s5728_s28 }
 0x241   :  { %3642 = vrot.lane.b32.xlu0 %v6298_v3, %s5727_s14 }
 0x242   :  { %4096 = vrot.lane.b32.xlu1 %v6266_v23, %s5729_s30 }
 0x245   :  { %3869 = vrot.lane.b32.xlu0 %v6288_v39, %s5728_s28 }
 0x246   :  { %3871 = vrot.lane.b32.xlu1 %v6290_v61, %s5728_s28 }
 0x249   :  { %3873 = vrot.lane.b32.xlu0 %v6296_v44, %s5728_s28 }
 0x24a   :  { %3875 = vrot.lane.b32.xlu1 %v6298_v3, %s5728_s28 }
 0x24d   :  { %3877 = vrot.lane.b32.xlu0 %v5723_v8, %s5728_s28 }
 0x24e   :  { %4094 = vrot.lane.b32.xlu1 %v6262_v18, %s5729_s30 }
 0x251   :  { %4098 = vrot.lane.b32.xlu0 %v6274_v41, %s5729_s30 }
 0x252   :  { %4102 = vrot.lane.b32.xlu1 %v6288_v39, %s5729_s30 }
 0x253   :  { %v2516_v4 = vpop.permute.xlu1 %2515 }
 0x254   :  { %v2531_v16 = vsel %vm106_vm0, %v2514_v13, %v2516_v4 }
 0x255   :  { %4100 = vrot.lane.b32.xlu0 %v6278_v48, %s5729_s30 }
 0x256   :  { %4106 = vrot.lane.b32.xlu1 %v6296_v44, %s5729_s30 }
 0x257   :  { %v2520_v5 = vpop.permute.xlu0 %2519 }
 0x258   :  { %v2522_v6 = vpop.permute.xlu1 %2521 }
 0x259   :  { %4329 = vrot.lane.b32.xlu0 %v6266_v23, %s5730_s11  ;;  %v2534_v7 = vsel %vm106_vm0, %v2520_v5, %v2522_v6 }
 0x25a   :  { %4110 = vrot.lane.b32.xlu1 %v5723_v8, %s5729_s30  ;;  %2594 = vmatprep.subr.bf16.mxu1 %v2534_v7 }
 0x25b   :  { %v2731_v9 = vpop.permute.xlu0 %2730 }
 0x25c   :  { %v2733_v11 = vpop.permute.xlu1 %2732 }
 0x25d   :  { %4104 = vrot.lane.b32.xlu0 %v6290_v61, %s5729_s30  ;;  %v2747_v27 = vsel %vm339_vm3, %v2731_v9, %v2733_v11 }
 0x25e   :  { %4331 = vrot.lane.b32.xlu1 %v6274_v41, %s5730_s11 }
 0x25f   :  { %v2518_v12 = vpop.permute.xlu0 %2517 }
 0x260   :  { %v2526_v17 = vpop.permute.xlu1 %2525  ;;  %v2532_v14 = vsel %vm106_vm0, %v2516_v4, %v2518_v12  ;;  %v2533_v15 = vsel %vm106_vm0, %v2518_v12, %v2520_v5 }
 0x261   :  { %4108 = vrot.lane.b32.xlu0 %v6298_v3, %s5729_s30  ;;  %2551 = vmatprep.subr.bf16.mxu0 %v2532_v14 }
 0x262   :  { %2595 = vmatpush1.bf16.msra.mxu1 %v2533_v15  ;;  %4333 = vrot.lane.b32.xlu1 %v6278_v48, %s5730_s11  ;;  %v5688_v15 = vld [vmem:[%s7268_s3 + $0x18] sm:$0xff]  }
 0x263   :  { %2552 = vmatpush1.bf16.msra.mxu0 %v2531_v16  ;;  %v2729_v20 = vpop.permute.xlu0 %2728 }
 0x264   :  { %v2530_v21 = vpop.permute.xlu1 %2529  ;;  %v2746_v33 = vsel %vm339_vm3, %v2729_v20, %v2731_v9 }
 0x265   :  { %4327 = vrot.lane.b32.xlu0 %v6262_v18, %s5730_s11  ;;  %5256 = vmatmul.mubr.msk.bf16.vlgmr.msra.gmra.mrb[8].mxu1 %vm2547_vm10, %v5685_v19 }
 0x266   :  { %5255 = vmatmul.mubr.msk.bf16.vlgmr.msra.gmra.mrb[8].mxu0 %vm2547_vm10, %v5685_v19  ;;  %4337 = vrot.lane.b32.xlu1 %v6290_v61, %s5730_s11 }
 0x267   :  { %v2524_v22 = vpop.permute.xlu0 %2523  ;;  %2669 = vmatprep.mubr.bf16.mxu0 %v5723_v8  ;;  %2712 = vmatprep.mubr.bf16.mxu1 %v5723_v8 }
 0x268   :  { %v2535_v24 = vsel %vm106_vm0, %v2522_v6, %v2524_v22  ;;  %v2735_v25 = vpop.permute.xlu1 %2734  ;;  %v2536_v26 = vsel %vm106_vm0, %v2524_v22, %v2526_v17 }
 0x269   :  { %4335 = vrot.lane.b32.xlu0 %v6288_v39, %s5730_s11  ;;  %2637 = vmatprep.subr.bf16.mxu0 %v2536_v26  ;;  %v2748_v40 = vsel %vm339_vm3, %v2733_v11, %v2735_v25 }
 0x26a   :  { %4341 = vrot.lane.b32.xlu1 %v6298_v3, %s5730_s11  ;;  %2638 = vmatpush1.bf16.msra.mxu0 %v2535_v24 }
 0x26b   :  { %v2528_v28 = vpop.permute.xlu0 %2527  ;;  %2765 = vmatprep.subr.bf16.mxu0 %v2747_v27 }
 0x26c   :  { %v2537_v30 = vsel %vm106_vm0, %v2526_v17, %v2528_v28  ;;  %v2739_v31 = vpop.permute.xlu1 %2738  ;;  %v2538_v32 = vsel %vm106_vm0, %v2528_v28, %v2530_v21 }
 0x26d   :  { %4339 = vrot.lane.b32.xlu0 %v6296_v44, %s5730_s11  ;;  %2680 = vmatprep.subr.bf16.mxu1 %v2538_v32 }
 0x26e   :  { %5257 = vmatmul.mubr.msk.bf16.vlgmr.msra.gmra.mrb[12].mxu0 %vm2547_vm10, %v5685_v19  ;;  %4556 = vperm.xlu1 %5645, %v4552_v29  }
 0x26f   :  { %2681 = vmatpush1.bf16.msra.mxu1 %v2537_v30  ;;  %2766 = vmatpush1.bf16.msra.mxu0 %v2746_v33  ;;  %v2737_v34 = vpop.permute.xlu0 %2736 }
 0x270   :  { %v2743_v35 = vpop.permute.xlu1 %2742  ;;  %v2749_v36 = vsel %vm339_vm3, %v2735_v25, %v2737_v34  ;;  %2797 = vmatprep.mubr.bf16.mxu0 %v5723_v8  ;;  %v2750_v52 = vsel %vm339_vm3, %v2737_v34, %v2739_v31 }
 0x271   :  { %4343 = vrot.lane.b32.xlu0 %v5723_v8, %s5730_s11  ;;  %2808 = vmatprep.subr.bf16.mxu1 %v2749_v36 }
 0x272   :  { %5258 = vmatmul.mubr.msk.bf16.vlgmr.msra.gmra.mrb[12].mxu1 %vm2547_vm10, %v5685_v19 }
 0x273   :  { %2809 = vmatpush1.bf16.msra.mxu1 %v2748_v40  ;;  %v2950_v46 = vpop.permute.xlu0 %2949  ;;  %2840 = vmatprep.mubr.bf16.mxu1 %v5723_v8 }
 0x274   :  { %v2948_v47 = vpop.permute.xlu1 %2947 }
 0x275   :  { %4561 = vperm.xlu0 %5644, %v4553_v43   ;;  %v2964_v53 = vsel %vm573_vm4, %v2948_v47, %v2950_v46 }
 0x276   :  { %5260 = vmatmul.mubr.msk.bf16.vlgmr.msra.gmra.mrb[8].mxu0 %vm2547_vm10, %v5686_v45 }
 0x277   :  { %v2741_v49 = vpop.permute.xlu0 %2740  ;;  %2883 = vmatprep.mubr.bf16.mxu0 %v5723_v8 }
 0x278   :  { %v2946_v50 = vpop.permute.xlu1 %2945  ;;  %v2751_v51 = vsel %vm339_vm3, %v2739_v31, %v2741_v49  ;;  %v2752_v57 = vsel %vm339_vm3, %v2741_v49, %v2743_v35 }
 0x279   :  { %2851 = vmatprep.subr.bf16.mxu0 %v2751_v51  ;;  %v2963_v58 = vsel %vm573_vm4, %v2946_v50, %v2948_v47 }
 0x27a   :  { %5261 = vmatmul.mubr.msk.bf16.vlgmr.msra.gmra.mrb[8].mxu1 %vm2547_vm10, %v5686_v45  ;;  %2852 = vmatpush1.bf16.msra.mxu0 %v2750_v52 }
 0x27b   :  { %v2745_v54 = vpop.permute.xlu0 %2744  ;;  %2982 = vmatprep.subr.bf16.mxu0 %v2964_v53  ;;  %2926 = vmatprep.mubr.bf16.mxu1 %v5723_v8 }
 0x27c   :  { %v2954_v55 = vpop.permute.xlu1 %2953  ;;  %v2753_v56 = vsel %vm339_vm3, %v2743_v35, %v2745_v54 }
 0x27d   :  { %2894 = vmatprep.subr.bf16.mxu1 %v2753_v56 }
 0x27e   :  { %5262 = vmatmul.mubr.msk.bf16.vlgmr.msra.gmra.mrb[12].mxu0 %vm2547_vm10, %v5686_v45  ;;  %2895 = vmatpush1.bf16.msra.mxu1 %v2752_v57 }
 0x27f   :  { %2983 = vmatpush1.bf16.msra.mxu0 %v2963_v58  ;;  %v2952_v10 = vpop.permute.xlu0 %2951  ;;  %3014 = vmatprep.mubr.bf16.mxu0 %v5723_v8 }
 0x280   :  { %v2965_v59 = vsel %vm573_vm4, %v2950_v46, %v2952_v10  ;;  %v2958_v60 = vpop.permute.xlu1 %2957  ;;  %v2966_v42 = vsel %vm573_vm4, %v2952_v10, %v2954_v55 }
 0x281   :  { %3025 = vmatprep.subr.bf16.mxu1 %v2966_v42 }
 0x282   :  { %5263 = vmatmul.mubr.msk.bf16.vlgmr.msra.gmra.mrb[12].mxu1 %vm2547_vm10, %v5686_v45  ;;  %v5690_v45 = vld [vmem:[%s7268_s3 + $0x28] sm:$0xff]  }
 0x283   :  { %3026 = vmatpush1.bf16.msra.mxu1 %v2965_v59  ;;  %v2956_v63 = vpop.permute.xlu0 %2955  ;;  %3057 = vmatprep.mubr.bf16.mxu1 %v5723_v8 }
 0x284   :  { %v2967_v0 = vsel %vm573_vm4, %v2954_v55, %v2956_v63  ;;  %v2962_v1 = vpop.permute.xlu1 %2961  ;;  %v2968_v2 = vsel %vm573_vm4, %v2956_v63, %v2958_v60  ;;  %v5691_v63 = vld [vmem:[%s7268_s3 + $0x30] sm:$0xff]  }
 0x285   :  { %3068 = vmatprep.subr.bf16.mxu0 %v2968_v2 }
 0x286   :  { %5267 = vmatmul.mubr.msk.bf16.vlgmr.msra.gmra.mrb[8].mxu0 %vm2547_vm10, %v5687_v62 }
 0x287   :  { %3069 = vmatpush1.bf16.msra.mxu0 %v2967_v0  ;;  %v2960_v13 = vpop.permute.xlu0 %2959  ;;  %3100 = vmatprep.mubr.bf16.mxu0 %v5723_v8 }
 0x288   :  { %v2969_v4 = vsel %vm573_vm4, %v2958_v60, %v2960_v13  ;;  %v3183_v5 = vpop.permute.xlu1 %3182  ;;  %v2970_v6 = vsel %vm573_vm4, %v2960_v13, %v2962_v1 }
 0x289   :  { %3111 = vmatprep.subr.bf16.mxu1 %v2970_v6 }
 0x28a   :  { %5268 = vmatmul.mubr.msk.bf16.vlgmr.msra.gmra.mrb[8].mxu1 %vm2547_vm10, %v5687_v62 }
 0x28b   :  { %3112 = vmatpush1.bf16.msra.mxu1 %v2969_v4  ;;  %v3181_v7 = vpop.permute.xlu0 %3180  ;;  %3143 = vmatprep.mubr.bf16.mxu1 %v5723_v8 }
 0x28c   :  { %v3185_v9 = vpop.permute.xlu1 %3184  ;;  %v3197_v11 = vsel %vm823_vm5, %v3181_v7, %v3183_v5 }
 0x28d   :  { %3215 = vmatprep.subr.bf16.mxu0 %v3197_v11  ;;  %v3198_v21 = vsel %vm823_vm5, %v3183_v5, %v3185_v9 }
 0x28e   :  { %5269 = vmatmul.mubr.msk.bf16.vlgmr.msra.gmra.mrb[12].mxu0 %vm2547_vm10, %v5687_v62 }
 0x28f   :  { %v3179_v12 = vpop.permute.xlu0 %3178  ;;  %3247 = vmatprep.mubr.bf16.mxu0 %v5723_v8 }
 0x290   :  { %v3196_v17 = vsel %vm823_vm5, %v3179_v12, %v3181_v7  ;;  %v3189_v14 = vpop.permute.xlu1 %3188 }
 0x291   :  { %3216 = vmatpush1.bf16.msra.mxu0 %v3196_v17 }
 0x292   :  { %5270 = vmatmul.mubr.msk.bf16.vlgmr.msra.gmra.mrb[12].mxu1 %vm2547_vm10, %v5687_v62 }
 0x293   :  { %v3187_v16 = vpop.permute.xlu0 %3186  ;;  %3290 = vmatprep.mubr.bf16.mxu1 %v5723_v8 }
 0x294   :  { %v3193_v19 = vpop.permute.xlu1 %3192  ;;  %v3199_v20 = vsel %vm823_vm5, %v3185_v9, %v3187_v16  ;;  %v3200_v26 = vsel %vm823_vm5, %v3187_v16, %v3189_v14 }
 0x295   :  { %3258 = vmatprep.subr.bf16.mxu1 %v3199_v20 }
 0x296   :  { %5274 = vmatmul.mubr.msk.bf16.vlgmr.msra.gmra.mrb[8].mxu0 %vm2547_vm10, %v5688_v15  ;;  %3259 = vmatpush1.bf16.msra.mxu1 %v3198_v21 }
 0x297   :  { %v3191_v22 = vpop.permute.xlu0 %3190  ;;  %3333 = vmatprep.mubr.bf16.mxu0 %v5723_v8 }
 0x298   :  { %v3631_v24 = vpop.permute.xlu1 %3630  ;;  %v3201_v25 = vsel %vm823_vm5, %v3189_v14, %v3191_v22  ;;  %v3202_v30 = vsel %vm823_vm5, %v3191_v22, %v3193_v19 }
 0x299   :  { %3301 = vmatprep.subr.bf16.mxu0 %v3201_v25 }
 0x29a   :  { %5275 = vmatmul.mubr.msk.bf16.vlgmr.msra.gmra.mrb[8].mxu1 %vm2547_vm10, %v5688_v15  ;;  %3302 = vmatpush1.bf16.msra.mxu0 %v3200_v26 }
 0x29b   :  { %v3195_v27 = vpop.permute.xlu0 %3194  ;;  %3414 = vmatprep.subr.bf16.mxu0 %v6266_v23  ;;  %3376 = vmatprep.mubr.bf16.mxu1 %v5723_v8  ;;  %v5689_v23 = vld [vmem:[%s7268_s3 + $0x20] sm:$0xff]  }
 0x29c   :  { %v3629_v28 = vpop.permute.xlu1 %3628  ;;  %v3203_v29 = vsel %vm823_vm5, %v3193_v19, %v3195_v27  ;;  %v5692_v19 = vld [vmem:[%s7268_s3 + $0x38] sm:$0xff]  }
 0x29d   :  { %3344 = vmatprep.subr.bf16.mxu1 %v3203_v29 }
 0x29e   :  { %5276 = vmatmul.mubr.msk.bf16.vlgmr.msra.gmra.mrb[12].mxu0 %vm2547_vm10, %v5688_v15  ;;  %3345 = vmatpush1.bf16.msra.mxu1 %v3202_v30 }
 0x29f   :  { %3415 = vmatpush1.bf16.msra.mxu0 %v6262_v18  ;;  %v3633_v31 = vpop.permute.xlu0 %3632  ;;  %3457 = vmatprep.subr.bf16.mxu1 %v6278_v48 }
 0x2a0   :  { %3500 = vmatprep.subr.bf16.mxu0 %v6290_v61  ;;  %v3637_v32 = vpop.permute.xlu1 %3636  ;;  %3446 = vmatprep.mubr.bf16.mxu0 %v5723_v8  ;;  %v3647_v48 = vsel %vm1383_vm6, %v3631_v24, %v3633_v31 }
 0x2a2   :  { %5277 = vmatmul.mubr.msk.bf16.vlgmr.msra.gmra.mrb[12].mxu1 %vm2547_vm10, %v5688_v15 }
 0x2a3   :  { %3458 = vmatpush1.bf16.msra.mxu1 %v6274_v41  ;;  %v3635_v33 = vpop.permute.xlu0 %3634  ;;  %3489 = vmatprep.mubr.bf16.mxu1 %v5723_v8 }
 0x2a4   :  { %3543 = vmatprep.subr.bf16.mxu1 %v6298_v3  ;;  %v3641_v18 = vpop.permute.xlu1 %3640  ;;  %v3649_v41 = vsel %vm1383_vm6, %v3635_v33, %v3637_v32 }
 0x2a6   :  { %5281 = vmatmul.mubr.msk.bf16.vlgmr.msra.gmra.mrb[8].mxu0 %vm2547_vm10, %v5689_v23 }
 0x2a7   :  { %3501 = vmatpush1.bf16.msra.mxu0 %v6288_v39  ;;  %v3864_v61 = vpop.permute.xlu0 %3863  ;;  %3532 = vmatprep.mubr.bf16.mxu0 %v5723_v8  ;;  %v3646_v39 = vsel %vm1383_vm6, %v3629_v28, %v3631_v24 }
 0x2a8   :  { %3665 = vmatprep.subr.bf16.mxu0 %v3647_v48  ;;  %v3645_v34 = vpop.permute.xlu1 %3644 }
 0x2aa   :  { %5282 = vmatmul.mubr.msk.bf16.vlgmr.msra.gmra.mrb[8].mxu1 %vm2547_vm10, %v5689_v23 }
 0x2ab   :  { %3544 = vmatpush1.bf16.msra.mxu1 %v6296_v44  ;;  %v3862_v35 = vpop.permute.xlu0 %3861  ;;  %3575 = vmatprep.mubr.bf16.mxu1 %v5723_v8  ;;  %v3648_v44 = vsel %vm1383_vm6, %v3633_v31, %v3635_v33 }
 0x2ac   :  { %3708 = vmatprep.subr.bf16.mxu1 %v3649_v41  ;;  %v3866_v3 = vpop.permute.xlu1 %3865  ;;  %v3879_v10 = vsel %vm1633_vm7, %v3862_v35, %v3864_v61 }
 0x2ad   :  { %v3880_v51 = vsel %vm1633_vm7, %v3864_v61, %v3866_v3 }
 0x2ae   :  { %5283 = vmatmul.mubr.msk.bf16.vlgmr.msra.gmra.mrb[12].mxu0 %vm2547_vm10, %v5689_v23 }
 0x2af   :  { %3666 = vmatpush1.bf16.msra.mxu0 %v3646_v39  ;;  %v3639_v36 = vpop.permute.xlu0 %3638  ;;  %3697 = vmatprep.mubr.bf16.mxu0 %v5723_v8 }
 0x2b0   :  { %v3868_v40 = vpop.permute.xlu1 %3867  ;;  %v3651_v43 = vsel %vm1383_vm6, %v3639_v36, %v3641_v18  ;;  %v3650_v50 = vsel %vm1383_vm6, %v3637_v32, %v3639_v36 }
 0x2b1   :  { %3751 = vmatprep.subr.bf16.mxu0 %v3651_v43  ;;  %v3881_v62 = vsel %vm1633_vm7, %v3866_v3, %v3868_v40 }
 0x2b2   :  { %5284 = vmatmul.mubr.msk.bf16.vlgmr.msra.gmra.mrb[12].mxu1 %vm2547_vm10, %v5689_v23 }
 0x2b3   :  { %3709 = vmatpush1.bf16.msra.mxu1 %v3648_v44  ;;  %v3643_v46 = vpop.permute.xlu0 %3642  ;;  %3740 = vmatprep.mubr.bf16.mxu1 %v5723_v8 }
 0x2b4   :  { %v4097_v47 = vpop.permute.xlu1 %4096  ;;  %v3653_v49 = vsel %vm1383_vm6, %v3643_v46, %v3645_v34  ;;  %v3652_v55 = vsel %vm1383_vm6, %v3641_v18, %v3643_v46  ;;  %v5693_v18 = vld [vmem:[%s7268_s3 + $0x40] sm:$0xff]  }
 0x2b5   :  { %3794 = vmatprep.subr.bf16.mxu1 %v3653_v49  ;;  %v6616_v46 = vld [vmem:[%s7270_s5 + $0x40] sm:$0xff] }
 0x2b6   :  { %5288 = vmatmul.mubr.msk.bf16.vlgmr.msra.gmra.mrb[8].mxu0 %vm2547_vm10, %v5690_v45 }
 0x2b7   :  { %3752 = vmatpush1.bf16.msra.mxu0 %v3650_v50  ;;  %v3870_v52 = vpop.permute.xlu0 %3869  ;;  %3783 = vmatprep.mubr.bf16.mxu0 %v5723_v8 }
 0x2b8   :  { %3898 = vmatprep.subr.bf16.mxu0 %v3880_v51  ;;  %v3872_v53 = vpop.permute.xlu1 %3871  ;;  %v3882_v54 = vsel %vm1633_vm7, %v3868_v40, %v3870_v52  ;;  %v6629_v51 = vld [vmem:[%s7270_s5 + $0x48] sm:$0xff] }
 0x2b9   :  { %v3883_v13 = vsel %vm1633_vm7, %v3870_v52, %v3872_v53  ;;  %v6634_v52 = vld [vmem:[%s7270_s5 + $0x8] sm:$0xff] }
 0x2ba   :  { %5289 = vmatmul.mubr.msk.bf16.vlgmr.msra.gmra.mrb[8].mxu1 %vm2547_vm10, %v5690_v45 }
 0x2bb   :  { %3795 = vmatpush1.bf16.msra.mxu1 %v3652_v55  ;;  %v3874_v56 = vpop.permute.xlu0 %3873  ;;  %3826 = vmatprep.mubr.bf16.mxu1 %v5723_v8 }
 0x2bc   :  { %3941 = vmatprep.subr.bf16.mxu1 %v3882_v54  ;;  %v3876_v57 = vpop.permute.xlu1 %3875  ;;  %v3884_v58 = vsel %vm1633_vm7, %v3872_v53, %v3874_v56 }
 0x2bd   :  { %v3885_v7 = vsel %vm1633_vm7, %v3874_v56, %v3876_v57  ;;  %v6642_v56 = vld [vmem:[%s7270_s5 + $0x80] sm:$0xff] }
 0x2be   :  { %5290 = vmatmul.mubr.msk.bf16.vlgmr.msra.gmra.mrb[12].mxu0 %vm2547_vm10, %v5690_v45 }
 0x2bf   :  { %3899 = vmatpush1.bf16.msra.mxu0 %v3879_v10  ;;  %v3878_v59 = vpop.permute.xlu0 %3877  ;;  %3930 = vmatprep.mubr.bf16.mxu0 %v5723_v8 }
 0x2c0   :  { %3984 = vmatprep.subr.bf16.mxu0 %v3884_v58  ;;  %v4095_v60 = vpop.permute.xlu1 %4094  ;;  %v3886_v42 = vsel %vm1633_vm7, %v3876_v57, %v3878_v59  ;;  %v6647_v57 = vld [vmem:[%s7270_s5 + $0x88] sm:$0xff] }
 0x2c1   :  { %v4112_v12 = vsel %vm1883_vm8, %v4095_v60, %v4097_v47 }
 0x2c2   :  { %5291 = vmatmul.mubr.msk.bf16.vlgmr.msra.gmra.mrb[12].mxu1 %vm2547_vm10, %v5690_v45 }
 0x2c3   :  { %3942 = vmatpush1.bf16.msra.mxu1 %v3881_v62  ;;  %v4099_v0 = vpop.permute.xlu0 %4098  ;;  %3973 = vmatprep.mubr.bf16.mxu1 %v5723_v8 }
 0x2c4   :  { %4027 = vmatprep.subr.bf16.mxu1 %v3886_v42  ;;  %v4103_v1 = vpop.permute.xlu1 %4102  ;;  %v4113_v2 = vsel %vm1883_vm8, %v4097_v47, %v4099_v0 }
 0x2c6   :  { %5295 = vmatmul.mubr.msk.bf16.vlgmr.msra.gmra.mrb[8].mxu0 %vm2547_vm10, %v5691_v63 }
 0x2c7   :  { %3985 = vmatpush1.bf16.msra.mxu0 %v3883_v13  ;;  %v4101_v4 = vpop.permute.xlu0 %4100  ;;  %4016 = vmatprep.mubr.bf16.mxu0 %v5723_v8  ;;  %v6669_v13 = vld [vmem:[%s7270_s5 + $0x10] sm:$0xff] }
 0x2c8   :  { %4131 = vmatprep.subr.bf16.mxu0 %v4113_v2  ;;  %v4107_v5 = vpop.permute.xlu1 %4106  ;;  %v4115_v6 = vsel %vm1883_vm8, %v4101_v4, %v4103_v1  ;;  %v4114_v16 = vsel %vm1883_vm8, %v4099_v0, %v4101_v4 }
 0x2ca   :  { %5296 = vmatmul.mubr.msk.bf16.vlgmr.msra.gmra.mrb[8].mxu1 %vm2547_vm10, %v5691_v63 }
 0x2cb   :  { %4028 = vmatpush1.bf16.msra.mxu1 %v3885_v7  ;;  %v4330_v9 = vpop.permute.xlu0 %4329  ;;  %4059 = vmatprep.mubr.bf16.mxu1 %v5723_v8 }
 0x2cc   :  { %4174 = vmatprep.subr.bf16.mxu1 %v4115_v6  ;;  %v4111_v11 = vpop.permute.xlu1 %4110 }
 0x2ce   :  { %5297 = vmatmul.mubr.msk.bf16.vlgmr.msra.gmra.mrb[12].mxu0 %vm2547_vm10, %v5691_v63 }
 0x2cf   :  { %4132 = vmatpush1.bf16.msra.mxu0 %v4112_v12  ;;  %v4105_v17 = vpop.permute.xlu0 %4104  ;;  %4163 = vmatprep.mubr.bf16.mxu0 %v5723_v8 }
 0x2d0   :  { %v4117_v14 = vsel %vm1883_vm8, %v4105_v17, %v4107_v5  ;;  %v4332_v15 = vpop.permute.xlu1 %4331  ;;  %v4116_v22 = vsel %vm1883_vm8, %v4103_v1, %v4105_v17  ;;  %v6662_v1 = vld [vmem:[%s7270_s5 + $0x50] sm:$0xff] }
 0x2d1   :  { %4217 = vmatprep.subr.bf16.mxu0 %v4117_v14  ;;  %v4346_v25 = vsel %vm2133_vm9, %v4330_v9, %v4332_v15 }
 0x2d2   :  { %5298 = vmatmul.mubr.msk.bf16.vlgmr.msra.gmra.mrb[12].mxu1 %vm2547_vm10, %v5691_v63 }
 0x2d3   :  { %4175 = vmatpush1.bf16.msra.mxu1 %v4114_v16  ;;  %v4109_v20 = vpop.permute.xlu0 %4108  ;;  %4206 = vmatprep.mubr.bf16.mxu1 %v5723_v8 }
 0x2d4   :  { %v4119_v21 = vsel %vm1883_vm8, %v4109_v20, %v4111_v11  ;;  %v4334_v24 = vpop.permute.xlu1 %4333  ;;  %v4118_v27 = vsel %vm1883_vm8, %v4107_v5, %v4109_v20  ;;  %v6684_v11 = vld [vmem:[%s7270_s5 + $0x18] sm:$0xff] }
 0x2d5   :  { %4260 = vmatprep.subr.bf16.mxu1 %v4119_v21  ;;  %v4347_v33 = vsel %vm2133_vm9, %v4332_v15, %v4334_v24 }
 0x2d6   :  { %5302 = vmatmul.mubr.msk.bf16.vlgmr.msra.gmra.mrb[8].mxu0 %vm2547_vm10, %v5692_v19 }
 0x2d7   :  { %4218 = vmatpush1.bf16.msra.mxu0 %v4116_v22  ;;  %v4328_v26 = vpop.permute.xlu0 %4327  ;;  %4249 = vmatprep.mubr.bf16.mxu0 %v5723_v8 }
 0x2d8   :  { %4364 = vmatprep.subr.bf16.mxu0 %v4346_v25  ;;  %v4338_v30 = vpop.permute.xlu1 %4337  ;;  %v4345_v31 = vsel %vm2133_vm9, %v4328_v26, %v4330_v9  ;;  %v6679_v9 = vld [vmem:[%s7270_s5 + $0x58] sm:$0xff] }
 0x2da   :  { %5303 = vmatmul.mubr.msk.bf16.vlgmr.msra.gmra.mrb[8].mxu1 %vm2547_vm10, %v5692_v19 }
 0x2db   :  { %4261 = vmatpush1.bf16.msra.mxu1 %v4118_v27  ;;  %v4336_v28 = vpop.permute.xlu0 %4335  ;;  %4292 = vmatprep.mubr.bf16.mxu1 %v5723_v8  ;;  %v6703_v27 = vld [vmem:[%s7270_s5 + $0x90] sm:$0xff] }
 0x2dc   :  { %v4348_v29 = vsel %vm2133_vm9, %v4334_v24, %v4336_v28  ;;  %v4342_v48 = vpop.permute.xlu1 %4341  ;;  %v4349_v41 = vsel %vm2133_vm9, %v4336_v28, %v4338_v30  ;;  %v6708_v28 = vld [vmem:[%s7270_s5 + $0x98] sm:$0xff] }
 0x2dd   :  { %4407 = vmatprep.subr.bf16.mxu1 %v4348_v29 }
 0x2de   :  { %5304 = vmatmul.mubr.msk.bf16.vlgmr.msra.gmra.mrb[12].mxu0 %vm2547_vm10, %v5692_v19 }
 0x2df   :  { %4365 = vmatpush1.bf16.msra.mxu0 %v4345_v31  ;;  %v4340_v32 = vpop.permute.xlu0 %4339  ;;  %4396 = vmatprep.mubr.bf16.mxu0 %v5723_v8 }
 0x2e0   :  { %v4350_v23 = vsel %vm2133_vm9, %v4338_v30, %v4340_v32  ;;  %v4351_v35 = vsel %vm2133_vm9, %v4340_v32, %v4342_v48 }
 0x2e1   :  { %4450 = vmatprep.subr.bf16.mxu0 %v4350_v23 }
 0x2e2   :  { %5305 = vmatmul.mubr.msk.bf16.vlgmr.msra.gmra.mrb[12].mxu1 %vm2547_vm10, %v5692_v19 }
 0x2e3   :  { %4408 = vmatpush1.bf16.msra.mxu1 %v4347_v33  ;;  %v4344_v61 = vpop.permute.xlu0 %4343  ;;  %4439 = vmatprep.mubr.bf16.mxu1 %v5723_v8 }
 0x2e4   :  { %v4352_v34 = vsel %vm2133_vm9, %v4342_v48, %v4344_v61 }
 0x2e5   :  { %4493 = vmatprep.subr.bf16.mxu1 %v4352_v34 }
 0x2e6   :  { %5309 = vmatmul.mubr.msk.bf16.vlgmr.msra.gmra.mrb[8].mxu0 %vm2547_vm10, %v5693_v18 }
 0x2e7   :  { %4451 = vmatpush1.bf16.msra.mxu0 %v4349_v41  ;;  %4482 = vmatprep.mubr.bf16.mxu0 %v5723_v8  ;;  %v6723_v41 = vld [vmem:[%s7270_s5 + $0x60] sm:$0xff] }
 0x2ea   :  { %5310 = vmatmul.mubr.msk.bf16.vlgmr.msra.gmra.mrb[8].mxu1 %vm2547_vm10, %v5693_v18 }
 0x2eb   :  { %4494 = vmatpush1.bf16.msra.mxu1 %v4351_v35  ;;  %4525 = vmatprep.mubr.bf16.mxu1 %v5723_v8  ;;  %v6621_v8 = vld [vmem:[%s7270_s5] sm:$0xff] }
 0x2ed   :  { %v6607_v3 = vpop.permute.xlu1 %4556 }
 0x2ee   :  { %5311 = vmatmul.mubr.msk.bf16.vlgmr.msra.gmra.mrb[12].mxu0 %vm2547_vm10, %v5693_v18 }
 0x2f2   :  { %5312 = vmatmul.mubr.msk.bf16.vlgmr.msra.gmra.mrb[12].mxu1 %vm2547_vm10, %v5693_v18 }
 0x2f4   :  { %v6610_v43 = vpop.permute.xlu0 %4561 }
 0x3b9   :  { %v4398_v39 = vpop.f32.mrb[8].mxu0 }
 0x3ba   :  { %v4564_v36 = vadd.f32 %v6607_v3, %v4398_v39  ;;  %v4400_v40 = vpop.f32.mrb[9].mxu0 }
 0x3bb   :  { %v4565_v44 = vadd.f32 %v6607_v3, %v4400_v40  ;;  %v4402_v45 = vpop.f32.mrb[10].mxu0 }
 0x3bc   :  { %v6623_v47 = vmax.f32 %v4564_v36, 0.0  ;;  %v4572_v49 = vadd.f32 %v6610_v43, %v4402_v45  ;;  %v4404_v50 = vpop.f32.mrb[11].mxu0  ;;  %v6735_v45 = vld [vmem:[%s7270_s5 + $0x68] sm:$0xff] }
 0x3bd   :  { %v6636_v53 = vmax.f32 %v4565_v44, 0.0  ;;  %v4573_v54 = vadd.f32 %v6610_v43, %v4404_v50  ;;  %v4441_v55 = vpop.f32.mrb[8].mxu1 }
 0x3be   :  { %v6649_v58 = vmax.f32 %v4572_v49, 0.0  ;;  %v4566_v10 = vadd.f32 %v6607_v3, %v4441_v55  ;;  %v4443_v59 = vpop.f32.mrb[9].mxu1  ;;  %v4682_v60 = vmul.f32 %v6616_v46, %v6623_v47  ;;  %v4610_v42 = vmul.f32 %v6621_v8, %v6623_v47  ;;  %v6740_v49 = vld [vmem:[%s7270_s5 + $0x70] sm:$0xff] }
 0x3bf   :  { %v6656_v62 = vmax.f32 %v4573_v54, 0.0  ;;  %v4567_v63 = vadd.f32 %v6607_v3, %v4443_v59  ;;  %v4445_v0 = vpop.f32.mrb[10].mxu1  ;;  %v4683_v2 = vmul.f32 %v6629_v51, %v6636_v53  ;;  %v4611_v4 = vmul.f32 %v6634_v52, %v6636_v53 }
 0x3c0   :  { %v6673_v5 = vmax.f32 %v4566_v10, 0.0  ;;  %v4574_v6 = vadd.f32 %v6610_v43, %v4445_v0  ;;  %v4447_v7 = vpop.f32.mrb[11].mxu1  ;;  %v4752_v12 = vmul.f32 %v6642_v56, %v6623_v47  ;;  %v4753_v17 = vmul.f32 %v6647_v57, %v6636_v53 }
 0x3c1   :  { %v6690_v14 = vmax.f32 %v4567_v63, 0.0  ;;  %v4575_v15 = vadd.f32 %v6610_v43, %v4447_v7  ;;  %v4484_v16 = vpop.f32.mrb[12].mxu0  ;;  %v4690_v19 = vadd.f32 %v4683_v2, %v4682_v60  ;;  %v4618_v20 = vadd.f32 %v4611_v4, %v4610_v42  ;;  %v6748_v60 = vld [vmem:[%s7270_s5 + $0x78] sm:$0xff]  ;;  %v6763_v7 = vld [vmem:[%s7270_s5 + $0xc8] sm:$0xff] }
 0x3c2   :  { %v6693_v21 = vmax.f32 %v4574_v6, 0.0  ;;  %v4568_v22 = vadd.f32 %v6607_v3, %v4484_v16  ;;  %v4486_v24 = vpop.f32.mrb[13].mxu0  ;;  %v4684_v25 = vmul.f32 %v6662_v1, %v6673_v5  ;;  %v4612_v26 = vmul.f32 %v6669_v13, %v6673_v5  ;;  %v6758_v6 = vld [vmem:[%s7270_s5 + $0xc0] sm:$0xff] }
 0x3c3   :  { %v6710_v29 = vmax.f32 %v4575_v15, 0.0  ;;  %v4569_v30 = vadd.f32 %v6607_v3, %v4486_v24  ;;  %v4488_v31 = vpop.f32.mrb[14].mxu0  ;;  %v4685_v32 = vmul.f32 %v6679_v9, %v6690_v14  ;;  %v4613_v23 = vmul.f32 %v6684_v11, %v6690_v14 }
 0x3c4   :  { %v6717_v33 = vmax.f32 %v4568_v22, 0.0  ;;  %v4576_v18 = vadd.f32 %v6610_v43, %v4488_v31  ;;  %v4490_v48 = vpop.f32.mrb[15].mxu0  ;;  %v4691_v61 = vadd.f32 %v4690_v19, %v4684_v25  ;;  %v4619_v34 = vadd.f32 %v4618_v20, %v4612_v26  ;;  %v6775_v19 = vld [vmem:[%s7270_s5 + $0xd0] sm:$0xff]  ;;  %v6780_v20 = vld [vmem:[%s7270_s5 + $0xd8] sm:$0xff]  ;;  %v6795_v31 = vld [vmem:[%s7270_s5 + $0xa8] sm:$0xff] }
 0x3c5   :  { %v6725_v35 = vmax.f32 %v4569_v30, 0.0  ;;  %v4577_v39 = vadd.f32 %v6610_v43, %v4490_v48  ;;  %v4527_v36 = vpop.f32.mrb[12].mxu1  ;;  %v4754_v40 = vmul.f32 %v6703_v27, %v6673_v5  ;;  %v4755_v44 = vmul.f32 %v6708_v28, %v6690_v14  ;;  %7302 = vst [vmem:[#allocation7_spill] sm:$0xff] %v6775_v19  ;;  %7303 = vst [vmem:[#allocation8_spill] sm:$0xff] %v6780_v20  ;;  %v6790_v30 = vld [vmem:[%s7270_s5 + $0xa0] sm:$0xff] }
 0x3c6   :  { %v6742_v50 = vmax.f32 %v4576_v18, 0.0  ;;  %v4570_v54 = vadd.f32 %v6607_v3, %v4527_v36  ;;  %v4529_v55 = vpop.f32.mrb[13].mxu1  ;;  %v4692_v10 = vadd.f32 %v4691_v61, %v4685_v32  ;;  %v4620_v59 = vadd.f32 %v4619_v34, %v4613_v23  ;;  %v6800_v32 = vld [vmem:[%s7270_s5 + $0x100] sm:$0xff]  ;;  %v6811_v61 = vld [vmem:[%s7270_s5 + $0xb0] sm:$0xff]  ;;  %v6816_v34 = vld [vmem:[%s7270_s5 + $0xb8] sm:$0xff] }
 0x3c7   :  { %v6750_v42 = vmax.f32 %v4577_v39, 0.0  ;;  %v4571_v63 = vadd.f32 %v6607_v3, %v4529_v55  ;;  %v4531_v0 = vpop.f32.mrb[14].mxu1  ;;  %v4760_v2 = vadd.f32 %v4753_v17, %v4752_v12  ;;  %v4686_v4 = vmul.f32 %v6723_v41, %v6649_v58  ;;  %7304 = vst [vmem:[#allocation9_spill] sm:$0xff] %v6800_v32  ;;  %v6821_v39 = vld [vmem:[%s7270_s5 + $0x108] sm:$0xff] }
 0x3c8   :  { %v6765_v15 = vmax.f32 %v4570_v54, 0.0  ;;  %v4578_v16 = vadd.f32 %v6610_v43, %v4531_v0  ;;  %v4533_v3 = vpop.f32.mrb[15].mxu1  ;;  %4693 = vadd.xlane.f32.xlu0 %v4692_v10  ;;  %4621 = vadd.xlane.f32.xlu1 %v4620_v59  ;;  %v4687_v12 = vmul.f32 %v6735_v45, %v6656_v62  ;;  %v4688_v17 = vmul.f32 %v6740_v49, %v6693_v21  ;;  %v6832_v10 = vld [vmem:[%s7270_s5 + $0x110] sm:$0xff] }
 0x3c9   :  { %v6782_v22 = vmax.f32 %v4571_v63, 0.0  ;;  %v4579_v24 = vadd.f32 %v6610_v43, %v4533_v3  ;;  %v4761_v25 = vadd.f32 %v4760_v2, %v4754_v40  ;;  %v4689_v26 = vmul.f32 %v6748_v60, %v6710_v29  ;;  %7305 = vst [vmem:[#allocation10_spill] sm:$0xff] %v6821_v39  ;;  %7306 = vst [vmem:[#allocation11_spill] sm:$0xff] %v6832_v10 }
 0x3ca   :  { %v6802_v43 = vmax.f32 %v4578_v16, 0.0  ;;  %v4695_v23 = vadd.f32 %v4687_v12, %v4686_v4  ;;  %v4822_v18 = vmul.f32 %v6758_v6, %v6623_v47  ;;  %v4823_v48 = vmul.f32 %v6763_v7, %v6636_v53  ;;  %v6846_v4 = vld [vmem:[%s7270_s5 + $0xe0] sm:$0xff]  ;;  %v6851_v16 = vld [vmem:[%s7270_s5 + $0xe8] sm:$0xff] }
 0x3cb   :  { %v6823_v36 = vmax.f32 %v4579_v24, 0.0  ;;  %v4762_v40 = vadd.f32 %v4761_v25, %v4755_v44  ;;  %v4824_v54 = vmul.f32 %v6775_v19, %v6673_v5  ;;  %v4825_v55 = vmul.f32 %v6780_v20, %v6690_v14  ;;  %v6841_v44 = vld [vmem:[%s7270_s5 + $0x118] sm:$0xff]  ;;  %7308 = vst [vmem:[#allocation13_spill] sm:$0xff] %v6846_v4  ;;  %7309 = vst [vmem:[#allocation14_spill] sm:$0xff] %v6851_v16  ;;  %v6864_v25 = vld [vmem:[%s7270_s5 + $0xf0] sm:$0xff] }
 0x3cc   :  { %v4696_v59 = vadd.f32 %v4695_v23, %v4688_v17  ;;  %v4830_v63 = vadd.f32 %v4823_v48, %v4822_v18  ;;  %v4756_v0 = vmul.f32 %v6790_v30, %v6649_v58  ;;  %v4757_v2 = vmul.f32 %v6795_v31, %v6656_v62  ;;  %7307 = vst [vmem:[#allocation12_spill] sm:$0xff] %v6841_v44  ;;  %v6869_v23 = vld [vmem:[%s7270_s5 + $0xf8] sm:$0xff] }
 0x3cd   :  { %4763 = vadd.xlane.f32.xlu0 %v4762_v40  ;;  %v4758_v3 = vmul.f32 %v6811_v61, %v6693_v21  ;;  %v4759_v12 = vmul.f32 %v6816_v34, %v6710_v29  ;;  %v4892_v17 = vmul.f32 %v6800_v32, %v6623_v47  ;;  %v4893_v24 = vmul.f32 %v6821_v39, %v6636_v53  ;;  %v6881_v39 = vld [vmem:[%s7270_s5 + $0x148] sm:$0xff] }
 0x3ce   :  { %7310 = vst [vmem:[#allocation15_spill] sm:$0xff] %v6864_v25  ;;  %7311 = vst [vmem:[#allocation16_spill] sm:$0xff] %v6869_v23  ;;  %v4697_v18 = vadd.f32 %v4696_v59, %v4689_v26  ;;  %v4831_v48 = vadd.f32 %v4830_v63, %v4824_v54  ;;  %v4765_v40 = vadd.f32 %v4757_v2, %v4756_v0  ;;  %v6892_v59 = vld [vmem:[%s7270_s5 + $0x150] sm:$0xff]  ;;  %v6897_v63 = vld [vmem:[%s7270_s5 + $0x158] sm:$0xff] }
 0x3cf   :  { %v4894_v37 = vmul.f32 %v6832_v10, %v6673_v5  ;;  %7313 = vst [vmem:[#allocation18_spill] sm:$0xff] %v6881_v39  ;;  %v4895_v32 = vmul.f32 %v6841_v44, %v6690_v14  ;;  %v4900_v20 = vadd.f32 %v4893_v24, %v4892_v17  ;;  %v4826_v26 = vmul.f32 %v6846_v4, %v6649_v58  ;;  %v6902_v0 = vld [vmem:[%s7270_s5 + $0x120] sm:$0xff]  ;;  %v6911_v10 = vld [vmem:[%s7270_s5 + $0x128] sm:$0xff] }
 0x3d0   :  { %v4827_v54 = vmul.f32 %v6851_v16, %v6656_v62  ;;  %7314 = vst [vmem:[#allocation19_spill] sm:$0xff] %v6892_v59  ;;  %7315 = vst [vmem:[#allocation20_spill] sm:$0xff] %v6897_v63  ;;  %4698 = vadd.xlane.f32.xlu1 %v4697_v18  ;;  %v4832_v2 = vadd.f32 %v4831_v48, %v4825_v55  ;;  %v4766_v17 = vadd.f32 %v4765_v40, %v4758_v3  ;;  %v6916_v16 = vld [vmem:[%s7270_s5 + $0x180] sm:$0xff]  ;;  %v6925_v48 = vld [vmem:[%s7270_s5 + $0x130] sm:$0xff] }
 0x3d1   :  { %v4828_v24 = vmul.f32 %v6864_v25, %v6693_v21  ;;  %v4829_v44 = vmul.f32 %v6869_v23, %v6710_v29  ;;  %7316 = vst [vmem:[#allocation21_spill] sm:$0xff] %v6916_v16  ;;  %v4901_v4 = vadd.f32 %v4900_v20, %v4894_v37  ;;  %v4962_v55 = vmul.f32 %v6876_v38, %v6623_v47  ;;  %v6930_v40 = vld [vmem:[%s7270_s5 + $0x138] sm:$0xff]  ;;  %v6935_v37 = vld [vmem:[%s7270_s5 + $0x188] sm:$0xff]  ;;  %v6946_v38 = vld [vmem:[%s7270_s5 + $0x190] sm:$0xff] }
 0x3d2   :  { %v4835_v18 = vadd.f32 %v4827_v54, %v4826_v26  ;;  %v4963_v3 = vmul.f32 %v6881_v39, %v6636_v53  ;;  %7317 = vst [vmem:[#allocation22_spill] sm:$0xff] %v6925_v48  ;;  %7318 = vst [vmem:[#allocation23_spill] sm:$0xff] %v6930_v40  ;;  %4833 = vadd.xlane.f32.xlu0 %v4832_v2  ;;  %v4767_v20 = vadd.f32 %v4766_v17, %v4759_v12  ;;  %v6953_v2 = vld [vmem:[%s7270_s5 + $0x198] sm:$0xff]  ;;  %v6958_v17 = vld [vmem:[%s7270_s5 + $0x160] sm:$0xff] }
 0x3d3   :  { %7319 = vst [vmem:[#allocation24_spill] sm:$0xff] %v6935_v37  ;;  %v4964_v26 = vmul.f32 %v6892_v59, %v6673_v5  ;;  %v4965_v54 = vmul.f32 %v6897_v63, %v6690_v14  ;;  %v4896_v39 = vmul.f32 %v6902_v0, %v6649_v58  ;;  %7320 = vst [vmem:[#allocation25_spill] sm:$0xff] %v6946_v38  ;;  %v6963_v63 = vld [vmem:[%s7270_s5 + $0x168] sm:$0xff] }
 0x3d4   :  { %v4902_v23 = vadd.f32 %v4901_v4, %v4895_v32  ;;  %v4836_v25 = vadd.f32 %v4835_v18, %v4828_v24  ;;  %v4970_v19 = vadd.f32 %v4963_v3, %v4962_v55  ;;  %v4897_v12 = vmul.f32 %v6911_v10, %v6656_v62  ;;  %7321 = vst [vmem:[#allocation26_spill] sm:$0xff] %v6953_v2  ;;  %v6976_v55 = vld [vmem:[%s7270_s5 + $0x170] sm:$0xff]  ;;  %v6981_v3 = vld [vmem:[%s7270_s5 + $0x178] sm:$0xff] }
 0x3d5   :  { %7322 = vst [vmem:[#allocation27_spill] sm:$0xff] %v6958_v17  ;;  %7323 = vst [vmem:[#allocation28_spill] sm:$0xff] %v6963_v63  ;;  %4768 = vadd.xlane.f32.xlu1 %v4767_v20  ;;  %v4898_v32 = vmul.f32 %v6925_v48, %v6693_v21  ;;  %v4899_v4 = vmul.f32 %v6930_v40, %v6710_v29  ;;  %v5032_v24 = vmul.f32 %v6916_v16, %v6623_v47  ;;  %v4606_v47 = vld [vmem:[%s7270_s5 + $0x20] sm:$0xff] }
 0x3d6   :  { %v5033_v18 = vmul.f32 %v6935_v37, %v6636_v53  ;;  %7324 = vst [vmem:[#allocation29_spill] sm:$0xff] %v6976_v55  ;;  %7325 = vst [vmem:[#allocation30_spill] sm:$0xff] %v6981_v3  ;;  %v4837_v20 = vadd.f32 %v4836_v25, %v4829_v44  ;;  %v4971_v59 = vadd.f32 %v4970_v19, %v4964_v26  ;;  %v4607_v53 = vld [vmem:[%s7270_s5 + $0x28] sm:$0xff]  ;;  %4903 = vadd.xlane.f32.xlu0 %v4902_v23  ;;  %v4609_v44 = vld [vmem:[%s7270_s5 + $0x38] sm:$0xff] }
 0x3d7   :  { %v4905_v48 = vadd.f32 %v4897_v12, %v4896_v39  ;;  %v5034_v40 = vmul.f32 %v6946_v38, %v6673_v5  ;;  %v5035_v37 = vmul.f32 %v6953_v2, %v6690_v14  ;;  %v4966_v19 = vmul.f32 %v6958_v17, %v6649_v58  ;;  %v4608_v5 = vld [vmem:[%s7270_s5 + $0x30] sm:$0xff]  ;;  %v7006_v25 = vld [vmem:[%s7270_s5 + $0x1a0] sm:$0xff] }
 0x3d8   :  { %v5040_v16 = vadd.f32 %v5033_v18, %v5032_v24  ;;  %v4967_v39 = vmul.f32 %v6963_v63, %v6656_v62  ;;  %v4972_v14 = vadd.f32 %v4971_v59, %v4965_v54  ;;  %v4968_v26 = vmul.f32 %v6976_v55, %v6693_v21  ;;  %v7015_v24 = vld [vmem:[%s7270_s5 + $0x1a8] sm:$0xff]  ;;  %v7022_v59 = vld [vmem:[%s7270_s5 + $0x1b0] sm:$0xff] }
 0x3d9   :  { %v4906_v23 = vadd.f32 %v4905_v48, %v4898_v32  ;;  %v4969_v12 = vmul.f32 %v6981_v3, %v6710_v29  ;;  %4838 = vadd.xlane.f32.xlu1 %v4837_v20  ;;  %v4614_v38 = vmul.f32 %v4606_v47, %v6649_v58  ;;  %v4615_v63 = vmul.f32 %v4607_v53, %v6656_v62  ;;  %v7027_v48 = vld [vmem:[%s7270_s5 + $0x1b8] sm:$0xff] }
 0x3da   :  { %v5041_v18 = vadd.f32 %v5040_v16, %v5034_v40  ;;  %v4975_v2 = vadd.f32 %v4967_v39, %v4966_v19  ;;  %v4616_v32 = vmul.f32 %v4608_v5, %v6693_v21  ;;  %v4617_v16 = vmul.f32 %v4609_v44, %v6710_v29  ;;  %4973 = vadd.xlane.f32.xlu0 %v4972_v14 }
 0x3db   :  { %v4907_v54 = vadd.f32 %v4906_v23, %v4899_v4  ;;  %v5036_v40 = vmul.f32 %v7006_v25, %v6649_v58  ;;  %v4623_v39 = vadd.f32 %v4615_v63, %v4614_v38  ;;  %v5037_v3 = vmul.f32 %v7015_v24, %v6656_v62 }
 0x3dc   :  { %v5042_v20 = vadd.f32 %v5041_v18, %v5035_v37  ;;  %v4976_v19 = vadd.f32 %v4975_v2, %v4968_v26  ;;  %v5038_v55 = vmul.f32 %v7022_v59, %v6693_v21  ;;  %v5039_v4 = vmul.f32 %v7027_v48, %v6710_v29 }
 0x3dd   :  { %v4642_v23 = vmul.f32 %v6621_v8, %v6717_v33  ;;  %v4643_v17 = vmul.f32 %v6634_v52, %v6725_v35  ;;  %4908 = vadd.xlane.f32.xlu1 %v4907_v54  ;;  %v4624_v37 = vadd.f32 %v4623_v39, %v4616_v32  ;;  %v5045_v2 = vadd.f32 %v5037_v3, %v5036_v40 }
 0x3de   :  { %v4977_v58 = vadd.f32 %v4976_v19, %v4969_v12  ;;  %v4644_v38 = vmul.f32 %v6669_v13, %v6765_v15  ;;  %v4645_v62 = vmul.f32 %v6684_v11, %v6782_v22  ;;  %v4646_v63 = vmul.f32 %v4606_v47, %v6742_v50  ;;  %5043 = vadd.xlane.f32.xlu0 %v5042_v20 }
 0x3df   :  { %v4650_v21 = vadd.f32 %v4643_v17, %v4642_v23  ;;  %v4647_v29 = vmul.f32 %v4607_v53, %v6750_v42  ;;  %v4625_v8 = vadd.f32 %v4624_v37, %v4617_v16  ;;  %v5046_v14 = vadd.f32 %v5045_v2, %v5038_v55  ;;  %v7327_v37 = vld [vmem:[#allocation8_spill] sm:$0xff] }
 0x3e0   :  { %v4648_v52 = vmul.f32 %v4608_v5, %v6802_v43  ;;  %v4649_v26 = vmul.f32 %v4609_v44, %v6823_v36  ;;  %v4713_v13 = vmul.f32 %v6616_v46, %v6717_v33  ;;  %v4714_v11 = vmul.f32 %v6629_v51, %v6725_v35 }
 0x3e1   :  { %v4651_v12 = vadd.f32 %v4650_v21, %v4644_v38  ;;  %v4655_v3 = vadd.f32 %v4647_v29, %v4646_v63  ;;  %4978 = vadd.xlane.f32.xlu1 %v4977_v58  ;;  %v5047_v17 = vadd.f32 %v5046_v14, %v5039_v4  ;;  %v4715_v47 = vmul.f32 %v6662_v1, %v6765_v15  ;;  %v7329_v63 = vld [vmem:[#allocation14_spill] sm:$0xff]  ;;  %v7330_v29 = vld [vmem:[#allocation15_spill] sm:$0xff] }
 0x3e2   :  { %v4716_v55 = vmul.f32 %v6679_v9, %v6782_v22  ;;  %v4717_v53 = vmul.f32 %v6723_v41, %v6742_v50  ;;  %v4721_v18 = vadd.f32 %v4714_v11, %v4713_v13  ;;  %v4718_v46 = vmul.f32 %v6735_v45, %v6750_v42  ;;  %4626 = vadd.xlane.f32.xlu0 %v4625_v8  ;;  %v7331_v8 = vld [vmem:[#allocation16_spill] sm:$0xff] }
 0x3e3   :  { %v4652_v5 = vadd.f32 %v4651_v12, %v4645_v62  ;;  %v4656_v44 = vadd.f32 %v4655_v3, %v4648_v52  ;;  %v4719_v51 = vmul.f32 %v6740_v49, %v6802_v43  ;;  %v4720_v54 = vmul.f32 %v6748_v60, %v6823_v36  ;;  %v7332_v52 = vld [vmem:[#allocation9_spill] sm:$0xff]  ;;  %v7333_v12 = vld [vmem:[#allocation10_spill] sm:$0xff] }
 0x3e4   :  { %v4783_v1 = vmul.f32 %v6642_v56, %v6717_v33  ;;  %v4784_v9 = vmul.f32 %v6647_v57, %v6725_v35  ;;  %v4722_v32 = vadd.f32 %v4721_v18, %v4715_v47  ;;  %v4726_v16 = vadd.f32 %v4718_v46, %v4717_v53  ;;  %v7334_v47 = vld [vmem:[#allocation11_spill] sm:$0xff]  ;;  %v7335_v53 = vld [vmem:[#allocation12_spill] sm:$0xff] }
 0x3e5   :  { %v4657_v41 = vadd.f32 %v4656_v44, %v4649_v26  ;;  %v4785_v40 = vmul.f32 %v6703_v27, %v6765_v15  ;;  %5048 = vadd.xlane.f32.xlu1 %v5047_v17  ;;  %v4786_v45 = vmul.f32 %v6708_v28, %v6782_v22  ;;  %v4787_v60 = vmul.f32 %v6790_v30, %v6742_v50 }
 0x3e6   :  { %v4791_v49 = vadd.f32 %v4784_v9, %v4783_v1  ;;  %v4788_v56 = vmul.f32 %v6795_v31, %v6750_v42  ;;  %v4723_v20 = vadd.f32 %v4722_v32, %v4716_v55  ;;  %v4727_v19 = vadd.f32 %v4726_v16, %v4719_v51  ;;  %4653 = vadd.xlane.f32.xlu0 %v4652_v5  ;;  %v7326_v31 = vld [vmem:[#allocation7_spill] sm:$0xff]  ;;  %v7336_v1 = vld [vmem:[#allocation22_spill] sm:$0xff] }
 0x3e7   :  { %v4789_v57 = vmul.f32 %v6811_v61, %v6802_v43  ;;  %v4790_v39 = vmul.f32 %v6816_v34, %v6823_v36  ;;  %v4853_v28 = vmul.f32 %v6758_v6, %v6717_v33  ;;  %v4854_v30 = vmul.f32 %v6763_v7, %v6725_v35  ;;  %v7328_v61 = vld [vmem:[#allocation13_spill] sm:$0xff] }
 0x3e8   :  { %v4792_v27 = vadd.f32 %v4791_v49, %v4785_v40  ;;  %v4796_v4 = vadd.f32 %v4788_v56, %v4787_v60  ;;  %v4728_v23 = vadd.f32 %v4727_v19, %v4720_v54  ;;  %v4855_v58 = vmul.f32 %v7326_v31, %v6765_v15  ;;  %v7339_v60 = vld [vmem:[#allocation18_spill] sm:$0xff]  ;;  %v7341_v19 = vld [vmem:[#allocation20_spill] sm:$0xff] }
 0x3e9   :  { %v4856_v2 = vmul.f32 %v7327_v37, %v6782_v22  ;;  %v4857_v38 = vmul.f32 %v7328_v61, %v6742_v50  ;;  %4658 = vadd.xlane.f32.xlu1 %v4657_v41  ;;  %v4861_v21 = vadd.f32 %v4854_v30, %v4853_v28  ;;  %v4858_v6 = vmul.f32 %v7329_v63, %v6750_v42  ;;  %v7337_v41 = vld [vmem:[#allocation23_spill] sm:$0xff] }
 0x3ea   :  { %v4793_v34 = vadd.f32 %v4792_v27, %v4786_v45  ;;  %v4797_v62 = vadd.f32 %v4796_v4, %v4789_v57  ;;  %v4859_v7 = vmul.f32 %v7330_v29, %v6802_v43  ;;  %v4860_v14 = vmul.f32 %v7331_v8, %v6823_v36  ;;  %4724 = vadd.xlane.f32.xlu0 %v4723_v20  ;;  %v7338_v45 = vld [vmem:[#allocation17_spill] sm:$0xff] }
 0x3eb   :  { %v4923_v26 = vmul.f32 %v7332_v52, %v6717_v33  ;;  %v4924_v3 = vmul.f32 %v7333_v12, %v6725_v35  ;;  %v4862_v11 = vadd.f32 %v4861_v21, %v4855_v58  ;;  %v4866_v17 = vadd.f32 %v4858_v6, %v4857_v38  ;;  %v7344_v58 = vld [vmem:[#allocation29_spill] sm:$0xff] }
 0x3ec   :  { %v4798_v13 = vadd.f32 %v4797_v62, %v4790_v39  ;;  %v4925_v55 = vmul.f32 %v7334_v47, %v6765_v15  ;;  %v4926_v5 = vmul.f32 %v7335_v53, %v6782_v22  ;;  %v4927_v18 = vmul.f32 %v6902_v0, %v6742_v50  ;;  %v7342_v39 = vld [vmem:[#allocation27_spill] sm:$0xff]  ;;  %v7346_v38 = vld [vmem:[#allocation21_spill] sm:$0xff]  ;;  %v7347_v62 = vld [vmem:[#allocation24_spill] sm:$0xff] }
 0x3ed   :  { %v4931_v44 = vadd.f32 %v4924_v3, %v4923_v26  ;;  %v4928_v46 = vmul.f32 %v6911_v10, %v6750_v42  ;;  %4729 = vadd.xlane.f32.xlu1 %v4728_v23  ;;  %v4863_v51 = vadd.f32 %v4862_v11, %v4856_v2  ;;  %v4867_v54 = vadd.f32 %v4866_v17, %v4859_v7  ;;  %v7340_v10 = vld [vmem:[#allocation19_spill] sm:$0xff]  ;;  %v7343_v23 = vld [vmem:[#allocation28_spill] sm:$0xff]  ;;  %v7345_v2 = vld [vmem:[#allocation30_spill] sm:$0xff] }
 0x3ee   :  { %v4929_v9 = vmul.f32 %v7336_v1, %v6802_v43  ;;  %v4930_v32 = vmul.f32 %v7337_v41, %v6823_v36  ;;  %v4993_v49 = vmul.f32 %v7338_v45, %v6717_v33  ;;  %v4994_v0 = vmul.f32 %v7339_v60, %v6725_v35  ;;  %4794 = vadd.xlane.f32.xlu0 %v4793_v34  ;;  %v7348_v7 = vld [vmem:[#allocation25_spill] sm:$0xff] }
 0x3ef   :  { %v4932_v16 = vadd.f32 %v4931_v44, %v4925_v55  ;;  %v4936_v40 = vadd.f32 %v4928_v46, %v4927_v18  ;;  %v4868_v56 = vadd.f32 %v4867_v54, %v4860_v14  ;;  %v4995_v20 = vmul.f32 %v7340_v10, %v6765_v15  ;;  %v7349_v14 = vld [vmem:[#allocation26_spill] sm:$0xff] }
 0x3f0   :  { %v4996_v57 = vmul.f32 %v7341_v19, %v6782_v22  ;;  %v4997_v27 = vmul.f32 %v7342_v39, %v6742_v50  ;;  %v5001_v30 = vadd.f32 %v4994_v0, %v4993_v49  ;;  %v4998_v31 = vmul.f32 %v7343_v23, %v6750_v42  ;;  %v7351_v0 = vld [vmem:[#allocation6_spill] sm:$0xff] }
 0x3f1   :  { %v4933_v4 = vadd.f32 %v4932_v16, %v4926_v5  ;;  %v4937_v28 = vadd.f32 %v4936_v40, %v4929_v9  ;;  %4799 = vadd.xlane.f32.xlu1 %v4798_v13  ;;  %v4999_v37 = vmul.f32 %v7344_v58, %v6802_v43  ;;  %v5000_v61 = vmul.f32 %v7345_v2, %v6823_v36 }
 0x3f2   :  { %v5063_v34 = vmul.f32 %v7346_v38, %v6717_v33  ;;  %v5064_v21 = vmul.f32 %v7347_v62, %v6725_v35  ;;  %v5002_v6 = vadd.f32 %v5001_v30, %v4995_v20  ;;  %v5006_v29 = vadd.f32 %v4998_v31, %v4997_v27  ;;  %4864 = vadd.xlane.f32.xlu0 %v4863_v51 }
 0x3f3   :  { %v4938_v63 = vadd.f32 %v4937_v28, %v4930_v32  ;;  %v5065_v8 = vmul.f32 %v7348_v7, %v6765_v15  ;;  %v5066_v52 = vmul.f32 %v7349_v14, %v6782_v22  ;;  %v5067_v12 = vmul.f32 %v7006_v25, %v6742_v50 }
 0x3f4   :  { %v5071_v26 = vadd.f32 %v5064_v21, %v5063_v34  ;;  %v5068_v33 = vmul.f32 %v7015_v24, %v6750_v42  ;;  %v5003_v3 = vadd.f32 %v5002_v6, %v4996_v57  ;;  %v5007_v13 = vadd.f32 %v5006_v29, %v4999_v37 }
 0x3f5   :  { %v5069_v35 = vmul.f32 %v7022_v59, %v6802_v43  ;;  %4869 = vadd.xlane.f32.xlu1 %v4868_v56  ;;  %v5070_v15 = vmul.f32 %v7027_v48, %v6823_v36  ;;  %v7350_v9 = vlaneseq  ;;  %vm4635_vm11 = vcmp.eq.s32.totalorder %v7351_v0, 0 }
 0x3f6   :  { %v5072_v11 = vadd.f32 %v5071_v26, %v5065_v8  ;;  %v5076_v17 = vadd.f32 %v5068_v33, %v5067_v12  ;;  %v5008_v47 = vadd.f32 %v5007_v13, %v5000_v61  ;;  %4934 = vadd.xlane.f32.xlu0 %v4933_v4  ;;  %v5731_v31 = vmov 0.0  }
 0x3f7   :  { %v7150_v41 = vand.u32 127, %v7350_v9  ;;  %vm4667_vm3 = vcmp.eq.s32.totalorder %v7351_v0, 1 }
 0x3f8   :  { %v5073_v22 = vadd.f32 %v5072_v11, %v5066_v52  ;;  %v5077_v55 = vadd.f32 %v5076_v17, %v5069_v35 }
 0x3f9   :  { %4939 = vadd.xlane.f32.xlu1 %v4938_v63  ;;  %vm4707_vm12 = vcmp.eq.s32.totalorder %v7150_v41, 1  ;;  %vm4777_vm13 = vcmp.eq.s32.totalorder %v7150_v41, 2  ;;  %vm4636_vm15 = vcmp.eq.s32.totalorder %v7150_v41, 0  ;;  %vm4847_vm1 = vcmp.eq.s32.totalorder %v7150_v41, 3 }
 0x3fa   :  { %v5078_v50 = vadd.f32 %v5077_v55, %v5070_v15  ;;  %5004 = vadd.xlane.f32.xlu0 %v5003_v3  ;;  %vm4708_vm14 = vmand %vm4635_vm11, %vm4707_vm12  ;;  %vm4600_vm5 = vcmp.lt.s32.totalorder %v7150_v41, 7  ;;  %vm4917_vm8 = vcmp.eq.s32.totalorder %v7150_v41, 4 }
 0x3fb   :  { %vm4778_vm0 = vmand %vm4635_vm11, %vm4777_vm13  ;;  %v7165_v58 = vsel %vm4708_vm14, 1.0, %v5731_v31 }
 0x3fc   :  { %vm4637_vm2 = vmand %vm4635_vm11, %vm4636_vm15  ;;  %v7173_v63 = vsel %vm4778_vm0, 1.0, %v5731_v31  ;;  %vm5057_vm0 = vcmp.eq.s32.totalorder %v7150_v41, 6 }
 0x3fd   :  { %5009 = vadd.xlane.f32.xlu1 %v5008_v47  ;;  %vm4848_vm4 = vmand %vm4635_vm11, %vm4847_vm1  ;;  %v5313_v26 = vsel %vm4637_vm2, 1.0, %v5731_v31 }
 0x3fe   :  { %5074 = vadd.xlane.f32.xlu0 %v5073_v22  ;;  %vm4668_vm6 = vmand %vm4667_vm3, %vm4636_vm15  ;;  %v7187_v17 = vsel %vm4848_vm4, 1.0, %v5731_v31 }
 0x3ff   :  { %vm7197_vm7 = vmand %vm4667_vm3, %vm4707_vm12  ;;  %vm4987_vm12 = vcmp.eq.s32.totalorder %v7150_v41, 5  ;;  %v5375_v41 = vld [vmem:[%s7271_s6] ss:$0 sm:$0xff]  ;;  %s5698_s6 = scalar_lea.vmem %s5122_s22, 32 }
 0x400   :  { %vm4808_vm9 = vmand %vm4667_vm3, %vm4777_vm13  ;;  %p5699_p0 = scmp.ne.s32.totalorder %s5122_s22, %s5698_s6  ;;  %p5704_p2 = scmp.lt.s32.totalorder %s5698_s6, %s5698_s6 }
 0x401   :  { %5079 = vadd.xlane.f32.xlu1 %v5078_v50  ;;  %vm4878_vm10 = vmand %vm4667_vm3, %vm4847_vm1 }
 0x402   :  { %vm4918_vm13 = vmand %vm4635_vm11, %vm4917_vm8  ;;  %p5705_p3 = por %p5704_p2, %p5703_p1 }
 0x403   :  { %vm4948_vm14 = vmand %vm4667_vm3, %vm4917_vm8 }
 0x404   :  { %vm4988_vm15 = vmand %vm4635_vm11, %vm4987_vm12  ;;  %p5706_p4 = pnand %p5705_p3, %p5699_p0 }
 0x405   :  { %vm5018_vm1 = vmand %vm4667_vm3, %vm4987_vm12 }
 0x406   :  { %vm5058_vm2 = vmand %vm4635_vm11, %vm5057_vm0  ;;  %vm5101_vm11 = vcmask 1041408  }
 0x407   :  { %vm5088_vm4 = vmand %vm4667_vm3, %vm5057_vm0  ;;  %vm5113_vm3 = vcmask 50176  }
 0x455   :  { %v4694_v42 = vpop.xlane.xlu0 %4693  ;;  %v4622_v25 = vpop.xlane.xlu1 %4621 }
 0x45a   :  { %v4764_v24 = vpop.xlane.xlu0 %4763 }
 0x45d   :  { %v4699_v43 = vpop.xlane.xlu1 %4698 }
 0x45e   :  { %v4700_v48 = vadd.f32 %v4699_v43, %v4694_v42  ;;  %v5732_v42 = vmov -1e+30  }
 0x45f   :  { %v4834_v59 = vpop.xlane.xlu0 %4833 }
 0x460   :  { %v4701_v51 = vrot.slane %v4700_v48, 4 }
 0x462   :  { %v4769_v53 = vpop.xlane.xlu1 %4768  ;;  %v4702_v16 = vadd.f32 %v4701_v51, %v4700_v48 }
 0x463   :  { %v4904_v5 = vpop.xlane.xlu0 %4903  ;;  %v4770_v54 = vadd.f32 %v4769_v53, %v4764_v24  ;;  %v5314_v53 = vsel %vm4668_vm6, 1.0, %v5731_v31 }
 0x464   :  { %v4703_v20 = vrot.slane %v4702_v16, 2 }
 0x465   :  { %v4771_v40 = vrot.slane %v4770_v54, 4 }
 0x466   :  { %v4839_v44 = vpop.xlane.xlu1 %4838  ;;  %v4704_v37 = vadd.f32 %v4703_v20, %v4702_v16 }
 0x467   :  { %v4974_v36 = vpop.xlane.xlu0 %4973  ;;  %v4840_v45 = vadd.f32 %v4839_v44, %v4834_v59  ;;  %v4772_v19 = vadd.f32 %v4771_v40, %v4770_v54 }
 0x468   :  { %v4705_v52 = vrot.slane %v4704_v37, 1 }
 0x469   :  { %v4841_v57 = vrot.slane %v4840_v45, 4  ;;  %v4773_v61 = vrot.slane %v4772_v19, 2 }
 0x46a   :  { %v4909_v18 = vpop.xlane.xlu1 %4908 }
 0x46b   :  { %v7147_v46 = vpop.xlane.xlu0 %5043  ;;  %v4910_v39 = vadd.f32 %v4909_v18, %v4904_v5  ;;  %v4842_v38 = vadd.f32 %v4841_v57, %v4840_v45  ;;  %v4774_v3 = vadd.f32 %v4773_v61, %v4772_v19  ;;  %v4706_v18 = vadd.f32 %v4705_v52, %v4704_v37 }
 0x46d   :  { %v4911_v34 = vrot.slane %v4910_v39, 4  ;;  %v4843_v13 = vrot.slane %v4842_v38, 2  ;;  %v4775_v51 = vrot.slane %v4774_v3, 1 }
 0x46e   :  { %v4979_v1 = vpop.xlane.xlu1 %4978 }
 0x46f   :  { %v4627_v32 = vpop.xlane.xlu0 %4626  ;;  %v4980_v7 = vadd.f32 %v4979_v1, %v4974_v36  ;;  %v4912_v35 = vadd.f32 %v4911_v34, %v4910_v39  ;;  %v4844_v54 = vadd.f32 %v4843_v13, %v4842_v38 }
 0x470   :  { %v4628_v49 = vadd.f32 %v4627_v32, %v4622_v25  ;;  %v4601_v25 = vsel %vm4600_vm5, 0.0, %v5732_v42 }
 0x471   :  { %v4981_v50 = vrot.slane %v4980_v7, 4 }
 0x472   :  { %v5049_v60 = vpop.xlane.xlu1 %5048  ;;  %v4629_v56 = vrot.slane %v4628_v49, 4 }
 0x473   :  { %v4654_v10 = vpop.xlane.xlu0 %4653  ;;  %v5050_v43 = vadd.f32 %v5049_v60, %v7147_v46  ;;  %v4913_v46 = vrot.slane %v4912_v35, 2  ;;  %v4982_v45 = vadd.f32 %v4981_v50, %v4980_v7 }
 0x474   :  { %v4630_v27 = vadd.f32 %v4629_v56, %v4628_v49  ;;  %v5324_v56 = vsel %vm7197_vm7, 1.0, %v5731_v31 }
 0x475   :  { %v5051_v60 = vrot.slane %v5050_v43, 4  ;;  %v4983_v34 = vrot.slane %v4982_v45, 2 }
 0x476   :  { %v4659_v4 = vpop.xlane.xlu1 %4658  ;;  %v4631_v30 = vrot.slane %v4630_v27, 2 }
 0x477   :  { %v4660_v28 = vadd.f32 %v4659_v4, %v4654_v10  ;;  %v4725_v23 = vpop.xlane.xlu0 %4724  ;;  %v4776_v4 = vadd.f32 %v4775_v51, %v4774_v3 }
 0x478   :  { %v4632_v62 = vadd.f32 %v4631_v30, %v4630_v27  ;;  %v4711_v27 = vmul.f32 %v7165_v58, %v4706_v18  ;;  %v4914_v30 = vadd.f32 %v4913_v46, %v4912_v35 }
 0x479   :  { %v4661_v2 = vrot.slane %v4660_v28, 4  ;;  %v4781_v58 = vmul.f32 %v7173_v63, %v4776_v4 }
 0x47a   :  { %v4730_v21 = vpop.xlane.xlu1 %4729  ;;  %v4633_v8 = vrot.slane %v4632_v62, 1 }
 0x47b   :  { %v4662_v6 = vadd.f32 %v4661_v2, %v4660_v28  ;;  %v4731_v29 = vadd.f32 %v4730_v21, %v4725_v23  ;;  %v4795_v14 = vpop.xlane.xlu0 %4794  ;;  %v4845_v28 = vrot.slane %v4844_v54, 1  ;;  %v5334_v21 = vsel %vm4808_vm9, 1.0, %v5731_v31 }
 0x47c   :  { %v4634_v11 = vadd.f32 %v4633_v8, %v4632_v62  ;;  %v5052_v62 = vadd.f32 %v5051_v60, %v5050_v43 }
 0x47d   :  { %v4663_v12 = vrot.slane %v4662_v6, 2  ;;  %v4732_v33 = vrot.slane %v4731_v29, 4 }
 0x47e   :  { %v4800_v15 = vpop.xlane.xlu1 %4799  ;;  %v4640_v24 = vmul.f32 %v5313_v26, %v4634_v11  ;;  %v4846_v26 = vadd.f32 %v4845_v28, %v4844_v54  ;;  %v5353_v54 = vsel %vm4918_vm13, 1.0, %v5731_v31 }
 0x47f   :  { %v4664_v47 = vadd.f32 %v4663_v12, %v4662_v6  ;;  %v4733_v22 = vadd.f32 %v4732_v33, %v4731_v29  ;;  %v4801_v55 = vadd.f32 %v4800_v15, %v4795_v14  ;;  %v4865_v59 = vpop.xlane.xlu0 %4864  ;;  %v4915_v12 = vrot.slane %v4914_v30, 1 }
 0x480   :  { %v4641_v49 = vadd.f32 %v4640_v24, %v4601_v25  ;;  %v4851_v43 = vmul.f32 %v7187_v17, %v4846_v26 }
 0x481   :  { %v4665_v5 = vrot.slane %v4664_v47, 1  ;;  %v4734_v36 = vrot.slane %v4733_v22, 2  ;;  %v4802_v48 = vrot.slane %v4801_v55, 4 }
 0x482   :  { %v4870_v1 = vpop.xlane.xlu1 %4869 }
 0x483   :  { %v4666_v9 = vadd.f32 %v4665_v5, %v4664_v47  ;;  %v4735_v32 = vadd.f32 %v4734_v36, %v4733_v22  ;;  %v4803_v16 = vadd.f32 %v4802_v48, %v4801_v55  ;;  %v4871_v40 = vadd.f32 %v4870_v1, %v4865_v59  ;;  %v4935_v10 = vpop.xlane.xlu0 %4934 }
 0x484   :  { %v4984_v47 = vadd.f32 %v4983_v34, %v4982_v45  ;;  %v5053_v22 = vrot.slane %v5052_v62, 2  ;;  %v4916_v59 = vadd.f32 %v4915_v12, %v4914_v30  ;;  %v5354_v45 = vsel %vm4948_vm14, 1.0, %v5731_v31 }
 0x485   :  { %v4671_v20 = vmul.f32 %v5314_v53, %v4666_v9  ;;  %v4736_v19 = vrot.slane %v4735_v32, 1  ;;  %v4804_v57 = vrot.slane %v4803_v16, 2  ;;  %v4872_v39 = vrot.slane %v4871_v40, 4 }
 0x486   :  { %v4940_v23 = vpop.xlane.xlu1 %4939  ;;  %v5344_v53 = vsel %vm4878_vm10, 1.0, %v5731_v31  ;;  %v4985_v46 = vrot.slane %v4984_v47, 1  ;;  %v5054_v1 = vadd.f32 %v5053_v22, %v5052_v62  ;;  %v4921_v60 = vmul.f32 %v5353_v54, %v4916_v59 }
 0x487   :  { %v4672_v37 = vadd.f32 %v4671_v20, %v4641_v49  ;;  %v4737_v2 = vadd.f32 %v4736_v19, %v4735_v32  ;;  %v4805_v61 = vadd.f32 %v4804_v57, %v4803_v16  ;;  %v4873_v38 = vadd.f32 %v4872_v39, %v4871_v40  ;;  %v5005_v29 = vpop.xlane.xlu0 %5004 }
 0x488   :  { %v4941_v6 = vadd.f32 %v4940_v23, %v4935_v10  ;;  %v4986_v19 = vadd.f32 %v4985_v46, %v4984_v47  ;;  %v5055_v57 = vrot.slane %v5054_v1, 1 }
 0x489   :  { %v4712_v7 = vadd.f32 %v4711_v27, %v4672_v37  ;;  %v4741_v8 = vmul.f32 %v5324_v56, %v4737_v2  ;;  %v4806_v14 = vrot.slane %v4805_v61, 1  ;;  %v4874_v52 = vrot.slane %v4873_v38, 2 }
 0x48a   :  { %v4942_v33 = vrot.slane %v4941_v6, 4  ;;  %v5010_v3 = vpop.xlane.xlu1 %5009  ;;  %v5363_v27 = vsel %vm4988_vm15, 1.0, %v5731_v31  ;;  %v5364_v37 = vsel %vm5018_vm1, 1.0, %v5731_v31  ;;  %v5056_v34 = vadd.f32 %v5055_v57, %v5054_v1 }
 0x48b   :  { %v4742_v13 = vadd.f32 %v4741_v8, %v4712_v7  ;;  %v4807_v35 = vadd.f32 %v4806_v14, %v4805_v61  ;;  %v4875_v11 = vadd.f32 %v4874_v52, %v4873_v38  ;;  %v5011_v15 = vadd.f32 %v5010_v3, %v5005_v29  ;;  %v5075_v50 = vpop.xlane.xlu0 %5074 }
 0x48c   :  { %v4943_v55 = vadd.f32 %v4942_v33, %v4941_v6  ;;  %v4991_v38 = vmul.f32 %v5363_v27, %v4986_v19  ;;  %v5374_v8 = vsel %vm5088_vm4, 1.0, %v5731_v31 }
 0x48d   :  { %v4782_v63 = vadd.f32 %v4781_v58, %v4742_v13  ;;  %v4811_v42 = vmul.f32 %v5334_v21, %v4807_v35  ;;  %v4876_v25 = vrot.slane %v4875_v11, 1  ;;  %v5012_v24 = vrot.slane %v5011_v15, 4 }
 0x48e   :  { %v4944_v5 = vrot.slane %v4943_v55, 2  ;;  %v5080_v44 = vpop.xlane.xlu1 %5079  ;;  %v5373_v21 = vsel %vm5058_vm2, 1.0, %v5731_v31 }
 0x48f   :  { %v4812_v36 = vadd.f32 %v4811_v42, %v4782_v63  ;;  %v4877_v48 = vadd.f32 %v4876_v25, %v4875_v11  ;;  %v5013_v18 = vadd.f32 %v5012_v24, %v5011_v15  ;;  %v5081_v51 = vadd.f32 %v5080_v44, %v5075_v50 }
 0x490   :  { %v4945_v9 = vadd.f32 %v4944_v5, %v4943_v55  ;;  %v5061_v52 = vmul.f32 %v5373_v21, %v5056_v34 }
 0x491   :  { %v4852_v17 = vadd.f32 %v4851_v43, %v4812_v36  ;;  %v4881_v32 = vmul.f32 %v5344_v53, %v4877_v48  ;;  %v5014_v16 = vrot.slane %v5013_v18, 2  ;;  %v5082_v40 = vrot.slane %v5081_v51, 4 }
 0x492   :  { %v4946_v49 = vrot.slane %v4945_v9, 1 }
 0x493   :  { %v4882_v56 = vadd.f32 %v4881_v32, %v4852_v17  ;;  %v5015_v10 = vadd.f32 %v5014_v16, %v5013_v18  ;;  %v5083_v20 = vadd.f32 %v5082_v40, %v5081_v51 }
 0x494   :  { %v4947_v39 = vadd.f32 %v4946_v49, %v4945_v9 }
 0x495   :  { %v4922_v4 = vadd.f32 %v4921_v60, %v4882_v56  ;;  %v5016_v28 = vrot.slane %v5015_v10, 1  ;;  %v5084_v30 = vrot.slane %v5083_v20, 2 }
 0x496   :  { %v4951_v23 = vmul.f32 %v5354_v45, %v4947_v39 }
 0x497   :  { %v5017_v2 = vadd.f32 %v5016_v28, %v5015_v10  ;;  %v5085_v61 = vadd.f32 %v5084_v30, %v5083_v20 }
 0x498   :  { %v4952_v62 = vadd.f32 %v4951_v23, %v4922_v4 }
 0x499   :  { %v5021_v6 = vmul.f32 %v5364_v37, %v5017_v2  ;;  %v5086_v29 = vrot.slane %v5085_v61, 1 }
 0x49a   :  { %v4992_v7 = vadd.f32 %v4991_v38, %v4952_v62 }
 0x49b   :  { %v5087_v14 = vadd.f32 %v5086_v29, %v5085_v61 }
 0x49c   :  { %v5022_v58 = vadd.f32 %v5021_v6, %v4992_v7 }
 0x49d   :  { %v5091_v26 = vmul.f32 %v5374_v8, %v5087_v14 }
 0x49e   :  { %v5062_v12 = vadd.f32 %v5061_v52, %v5022_v58 }
 0x4a0   :  { %v5092_v0 = vadd.f32 %v5091_v26, %v5062_v12 }
 0x4a2   :  { %v5100_v33 = vadd.f32 %v5375_v41, %v5092_v0 }
 0x4a4   :  { %v5102_v3 = vsel %vm5101_vm11, %v5100_v33, -inf }
 0x4a5   :  { %5103 = vmax.xlane.f32.xlu0 %v5102_v3 }
 0x532   :  { %v5104_v13 = vpop.xlane.xlu0 %5103 }
 0x533   :  { %v5105_v35 = vsub.f32 %v5100_v33, %v5104_v13 }
 0x535   :  { %v5106_v11 = vmul.f32 1.442695, %v5105_v35 }
 0x537   :  { %5694 = vpow2.f32 %v5106_v11 }
 0x541   :  { %v5695_v15 = vpop.eup %5694 }
 0x542   :  { %v5108_v31 = vsel %vm5101_vm11, %v5695_v15, 0.0 }
 0x543   :  { %5109 = vadd.xlane.f32.xlu1 %v5108_v31 }
 0x5d0   :  { %v5110_v47 = vpop.xlane.xlu1 %5109 }
 0x5d1   :  { %5696 = vrcp.f32 %v5110_v47 }
 0x5db   :  { %v5697_v22 = vpop.eup %5696 }
 0x5dc   :  { %v5112_v55 = vmul.f32 %v5697_v22, %v5695_v15 }
 0x5de   :  { %5114 = vst.msk [vmem:[#allocation3] sm:$0x3] %vm5113_vm3, %v5112_v55 }
 0x5df   :  { %5709 = shalt.err (!%p5706_p4)
}
 0x5e0   :  { %s5710_s27 = scalar_lea.hbm %s7273_s8, 32 }
 0x5e1   :  { %p5711_p5 = scmp.ne.s32.totalorder %s7273_s8, %s5710_s27  ;;  %p5714_p6 = scmp.lt.u32.totalorder %s5710_s27, %s7273_s8 }
 0x5e3   :  { %p5716_p7 = pnand %p5714_p6, %p5711_p5 }
 0x5e5   :  { %5719 = shalt.err (!%p5716_p7)
}
 0x5e6   :  { %5124 = dma.vmem_to_hbm [thread:$0]  %s5122_s22, 32, %s7273_s8, [#allocation4]  }
 0x5e7   :  { %5720 = dma.done.wait [#allocation4], 32  }
 0x5e8   :  { %5721 = vsyncadd [#allocation4], 4294967264 }
 0x5e9   :  { %5128 = vsyncpa [#allocation4], 1 }

</bundles_post_ra>
